<compile_context>
chip_gen: v7x
topology: tpu7x:2x2x1
jax: 0.10.0
libtpu: 0.0.40
codegen_flags: <defaults>
</compile_context>

<pallas_src>
import functools

import jax
import jax.numpy as jnp
from jax.experimental import pallas as pl
from jax.experimental.pallas import tpu as pltpu


NEG_INF = -1e30                       # finite mask value (no inf-inf -> NaN)
EPS = 1e-5
GELU_C = 0.7978845608028654           # sqrt(2/pi), GELU(approximate='tanh')
VMEM_LIMIT = 64 * 1024 * 1024


# ---------------------------------------------------------------------------
# Rotary-frequency precompute (host side). Mirrors the torch reference
# exactly: interleaved np.repeat(..., 2, axis=-1) tables combined with the
# half-split rotate_half in the kernel (same convention as the module).
# ---------------------------------------------------------------------------
def precompute_theta_freqs(dim, context_length):
    assert dim % 2 == 0, "Dimension must be divisible by 2!"
    thetas = 1.0 / (10000.0 ** (jnp.arange(0, dim, 2, dtype=jnp.float32) / dim))
    m = jnp.arange(context_length, dtype=jnp.float32)
    m_theta = jnp.outer(m, thetas)                       # (ctx, dim//2)
    cos = jnp.repeat(jnp.cos(m_theta), 2, axis=-1)       # (ctx, dim)
    sin = jnp.repeat(jnp.sin(m_theta), 2, axis=-1)
    return cos.astype(jnp.float32), sin.astype(jnp.float32)


# ---------------------------------------------------------------------------
# Kernel 1: RMSNorm + fused QKV projection + rotary for one (tile_t, C) slab.
# Outputs q/k/v blocks in (H, tile_t, D) bf16 layout (head as batch dim).
# ---------------------------------------------------------------------------
def _qkv_rotary_kernel(x_ref, g1_ref, wqkv_ref, bqkv_ref, cos_ref, sin_ref,
                       q_ref, k_ref, v_ref, *, n_head, head_dim):
    Tt, C = x_ref.shape
    x = x_ref[...].astype(jnp.float32)

    # RMSNorm (matches torch: gamma * x / (||x|| * d^-0.5 + eps))
    rms = jnp.sqrt(jnp.sum(x * x, axis=-1, keepdims=True)) * (float(C) ** -0.5)
    h = g1_ref[...] * (x * pl.reciprocal(rms + EPS, approx=True))

    # Fused [Wq | Wk | Wv] projection: bf16 operands, f32 accumulation (MXU).
    qkv = jnp.dot(h.astype(jnp.bfloat16), wqkv_ref[...],
                  preferred_element_type=jnp.float32) + bqkv_ref[...]

    q = qkv[:, 0 * C:1 * C].reshape(Tt, n_head, head_dim)
    k = qkv[:, 1 * C:2 * C].reshape(Tt, n_head, head_dim)
    v = qkv[:, 2 * C:3 * C].reshape(Tt, n_head, head_dim)

    cos = cos_ref[...][:, None, :]                       # (Tt, 1, D)
    sin = sin_ref[...][:, None, :]
    half = head_dim // 2

    # NOTE: pltpu.roll was considered, but head_dim (< 128 lanes) makes the
    # concat-based rotate_half the safe, proven-to-lower choice here.
    def rotate_half(t):                                  # mirrors torch code
        return jnp.concatenate([-t[..., half:], t[..., :half]], axis=-1)

    q = q * cos + rotate_half(q) * sin
    k = k * cos + rotate_half(k) * sin

    # (Tt, H, D) -> (H, Tt, D); store bf16 for the attention matmuls.
    q_ref[...] = jnp.transpose(q, (1, 0, 2)).astype(q_ref.dtype)
    k_ref[...] = jnp.transpose(k, (1, 0, 2)).astype(k_ref.dtype)
    v_ref[...] = jnp.transpose(v, (1, 0, 2)).astype(v_ref.dtype)


# ---------------------------------------------------------------------------
# Kernel 2: flash (online-softmax) causal attention.
# Grid = (B, num_q_tiles, num_kv_tiles); kv is the innermost "arbitrary" axis.
# ---------------------------------------------------------------------------
def _flash_attn_kernel(q_ref, k_ref, v_ref, y_ref, m_sc, l_sc, acc_sc,
                       *, tile_q, tile_k, n_head, head_dim, scale):
    qi = pl.program_id(1)
    ki = pl.program_id(2)
    n_kv = pl.num_programs(2)

    @pl.when(ki == 0)
    def _init():
        m_sc[...] = jnp.full(m_sc.shape, NEG_INF, m_sc.dtype)
        l_sc[...] = jnp.zeros(l_sc.shape, l_sc.dtype)
        acc_sc[...] = jnp.zeros(acc_sc.shape, acc_sc.dtype)

    q_start = qi * tile_q
    k_start = ki * tile_k

    # Causal tile skip: kv tiles strictly above the diagonal add nothing.
    @pl.when(k_start < q_start + tile_q)
    def _compute():
        q = q_ref[...]                                   # (H, tq, D) bf16
        k = k_ref[...]                                   # (H, tk, D) bf16
        v = v_ref[...]                                   # (H, tk, D) bf16

        # scores: head-batched dot_general, contract D -> (H, tq, tk) f32
        s = jax.lax.dot_general(
            q, k, dimension_numbers=(((2,), (2,)), ((0,), (0,))),
            preferred_element_type=jnp.float32) * scale

        row = q_start + jax.lax.broadcasted_iota(jnp.int32, (1, tile_q, tile_k), 1)
        col = k_start + jax.lax.broadcasted_iota(jnp.int32, (1, tile_q, tile_k), 2)
        s = jnp.where(row >= col, s, NEG_INF)

        m_prev = m_sc[...]
        m_new = jnp.maximum(m_prev, jnp.max(s, axis=-1, keepdims=True))
        alpha = jnp.exp(m_prev - m_new)
        p = jnp.exp(s - m_new)                           # (H, tq, tk) f32

        l_sc[...] = alpha * l_sc[...] + jnp.sum(p, axis=-1, keepdims=True)
        pv = jax.lax.dot_general(
            p.astype(v.dtype), v,
            dimension_numbers=(((2,), (1,)), ((0,), (0,))),
            preferred_element_type=jnp.float32)          # (H, tq, D)
        acc_sc[...] = alpha * acc_sc[...] + pv
        m_sc[...] = m_new

    @pl.when(ki == n_kv - 1)
    def _finalize():
        out = acc_sc[...] * pl.reciprocal(l_sc[...], approx=True)   # (H, tq, D)
        # merge heads -> lane-dense (tile_q, C) output slab
        out = jnp.transpose(out, (1, 0, 2)).reshape(tile_q, n_head * head_dim)
        y_ref[...] = out.astype(y_ref.dtype)


# ---------------------------------------------------------------------------
# Kernel 3: attention output projection + residual + RMSNorm + MLP + residual.
# ---------------------------------------------------------------------------
def _proj_mlp_kernel(x_ref, y_ref, g2_ref, wap_ref, bap_ref,
                     wfc_ref, bfc_ref, wmp_ref, bmp_ref, o_ref):
    Tt, C = x_ref.shape
    x = x_ref[...].astype(jnp.float32)

    # attention output projection (bf16 x bf16 -> f32 accum) + residual
    attn_out = jnp.dot(y_ref[...], wap_ref[...],
                       preferred_element_type=jnp.float32) + bap_ref[...]
    x1 = x + attn_out

    # RMSNorm
    rms = jnp.sqrt(jnp.sum(x1 * x1, axis=-1, keepdims=True)) * (float(C) ** -0.5)
    h2 = g2_ref[...] * (x1 * pl.reciprocal(rms + EPS, approx=True))

    # MLP: c_fc -> GELU(tanh) -> c_proj
    hid = jnp.dot(h2.astype(jnp.bfloat16), wfc_ref[...],
                  preferred_element_type=jnp.float32) + bfc_ref[...]
    gelu = 0.5 * hid * (1.0 + jnp.tanh(GELU_C * (hid + 0.044715 * hid * hid * hid)))
    mlp_out = jnp.dot(gelu.astype(jnp.bfloat16), wmp_ref[...],
                      preferred_element_type=jnp.float32) + bmp_ref[...]

    o_ref[...] = (x1 + mlp_out).astype(o_ref.dtype)


# ---------------------------------------------------------------------------
# Wrapper: three pallas_calls.
# ---------------------------------------------------------------------------
@functools.partial(jax.jit, static_argnames=("n_head", "tile_t", "tile_q", "tile_k"))
def gpt2_block(x, params, cos, sin, *, n_head, tile_t=256, tile_q=128, tile_k=128):
    B, T, C = x.shape
    H = n_head
    D = C // H

    tile_t = min(tile_t, T)
    tile_q = min(tile_q, T)
    tile_k = min(tile_k, T)
    assert T % tile_t == 0 and T % tile_q == 0 and T % tile_k == 0
    nt, nq, nk = T // tile_t, T // tile_q, T // tile_k

    f32, bf16 = jnp.float32, jnp.bfloat16

    # Fused QKV weight (C, 3C) = [Wq | Wk | Wv]; all MXU operands in bf16.
    wqkv = jnp.concatenate([params["wqk"], params["wv"]], axis=1).astype(bf16)
    bqkv = jnp.concatenate([params["bqk"], params["bv"]], axis=1).astype(f32)
    wap = params["wap"].astype(bf16)
    wfc = params["wfc"].astype(bf16)
    wmp = params["wmp"].astype(bf16)

    cos_t = cos[:T].astype(f32)
    sin_t = sin[:T].astype(f32)

    # ---- call 1: RMSNorm + QKV + rotary ------------------------------------
    q, k, v = pl.pallas_call(
        functools.partial(_qkv_rotary_kernel, n_head=H, head_dim=D),
        grid=(B, nt),
        in_specs=[
            pl.BlockSpec((None, tile_t, C), lambda b, t: (b, t, 0)),   # x
            pl.BlockSpec((1, C), lambda b, t: (0, 0)),                 # gamma1
            pl.BlockSpec((C, 3 * C), lambda b, t: (0, 0)),             # W qkv
            pl.BlockSpec((1, 3 * C), lambda b, t: (0, 0)),             # b qkv
            pl.BlockSpec((tile_t, D), lambda b, t: (t, 0)),            # cos
            pl.BlockSpec((tile_t, D), lambda b, t: (t, 0)),            # sin
        ],
        out_specs=[
            pl.BlockSpec((None, H, tile_t, D), lambda b, t: (b, 0, t, 0)),
            pl.BlockSpec((None, H, tile_t, D), lambda b, t: (b, 0, t, 0)),
            pl.BlockSpec((None, H, tile_t, D), lambda b, t: (b, 0, t, 0)),
        ],
        out_shape=[
            jax.ShapeDtypeStruct((B, H, T, D), bf16),
            jax.ShapeDtypeStruct((B, H, T, D), bf16),
            jax.ShapeDtypeStruct((B, H, T, D), bf16),
        ],
        compiler_params=pltpu.CompilerParams(
            dimension_semantics=("parallel", "parallel"),
            vmem_limit_bytes=VMEM_LIMIT),
    )(x, params["g1"], wqkv, bqkv, cos_t, sin_t)

    # ---- call 2: flash causal attention ------------------------------------
    y = pl.pallas_call(
        functools.partial(_flash_attn_kernel, tile_q=tile_q, tile_k=tile_k,
                          n_head=H, head_dim=D, scale=1.0 / (float(D) ** 0.5)),
        grid=(B, nq, nk),
        in_specs=[
            pl.BlockSpec((None, H, tile_q, D), lambda b, i, j: (b, 0, i, 0)),
            pl.BlockSpec((None, H, tile_k, D), lambda b, i, j: (b, 0, j, 0)),
            pl.BlockSpec((None, H, tile_k, D), lambda b, i, j: (b, 0, j, 0)),
        ],
        out_specs=pl.BlockSpec((None, tile_q, C), lambda b, i, j: (b, i, 0)),
        out_shape=jax.ShapeDtypeStruct((B, T, C), bf16),
        scratch_shapes=[
            pltpu.VMEM((H, tile_q, 1), f32),     # running max
            pltpu.VMEM((H, tile_q, 1), f32),     # running sum
            pltpu.VMEM((H, tile_q, D), f32),     # accumulator
        ],
        compiler_params=pltpu.CompilerParams(
            dimension_semantics=("parallel", "parallel", "arbitrary"),
            vmem_limit_bytes=VMEM_LIMIT),
    )(q, k, v)

    # ---- call 3: attention proj + residual + RMSNorm + MLP + residual ------
    out = pl.pallas_call(
        _proj_mlp_kernel,
        grid=(B, nt),
        in_specs=[
            pl.BlockSpec((None, tile_t, C), lambda b, t: (b, t, 0)),   # x
            pl.BlockSpec((None, tile_t, C), lambda b, t: (b, t, 0)),   # y (attn)
            pl.BlockSpec((1, C), lambda b, t: (0, 0)),                 # gamma2
            pl.BlockSpec((C, C), lambda b, t: (0, 0)),                 # W attn proj
            pl.BlockSpec((1, C), lambda b, t: (0, 0)),                 # b attn proj
            pl.BlockSpec((C, 4 * C), lambda b, t: (0, 0)),             # W fc
            pl.BlockSpec((1, 4 * C), lambda b, t: (0, 0)),             # b fc
            pl.BlockSpec((4 * C, C), lambda b, t: (0, 0)),             # W mlp proj
            pl.BlockSpec((1, C), lambda b, t: (0, 0)),                 # b mlp proj
        ],
        out_specs=pl.BlockSpec((None, tile_t, C), lambda b, t: (b, t, 0)),
        out_shape=jax.ShapeDtypeStruct((B, T, C), x.dtype),
        compiler_params=pltpu.CompilerParams(
            dimension_semantics=("parallel", "parallel"),
            vmem_limit_bytes=VMEM_LIMIT),
    )(x, y, params["g2"], wap, params["bap"].astype(f32), wfc,
      params["bfc"].astype(f32), wmp, params["bmp"].astype(f32))

    return out


# ---------------------------------------------------------------------------
# Deterministic parameter init (shapes follow the nn.Module __init__).
# Linear weights are stored pre-transposed as (in_features, out_features).
# ---------------------------------------------------------------------------
def init_params(key, n_embed):
    C = n_embed
    ks = jax.random.split(key, 8)
    std = 0.02
    return {
        "g1":  jnp.ones((1, C), jnp.float32),
        "g2":  jnp.ones((1, C), jnp.float32),
        "wqk": (std * jax.random.normal(ks[0], (C, 2 * C))).astype(jnp.float32),
        "bqk": jnp.zeros((1, 2 * C), jnp.float32),
        "wv":  (std * jax.random.normal(ks[1], (C, C))).astype(jnp.float32),
        "bv":  jnp.zeros((1, C), jnp.float32),
        "wap": (std * jax.random.normal(ks[2], (C, C))).astype(jnp.float32),
        "bap": jnp.zeros((1, C), jnp.float32),
        "wfc": (std * jax.random.normal(ks[3], (C, 4 * C))).astype(jnp.float32),
        "bfc": jnp.zeros((1, 4 * C), jnp.float32),
        "wmp": (std * jax.random.normal(ks[4], (4 * C, C))).astype(jnp.float32),
        "bmp": jnp.zeros((1, C), jnp.float32),
    }


# ---------------------------------------------------------------------------
# Pure-JAX f32 reference (mirrors the torch Block forward) for a sanity check.
# ---------------------------------------------------------------------------
def block_reference(x, params, cos, sin, *, n_head, eps=EPS):
    B, T, C = x.shape
    D = C // n_head

    def rmsnorm(v, g):
        rms = jnp.sqrt(jnp.sum(v * v, axis=-1, keepdims=True)) * (float(C) ** -0.5)
        return g * (v / (rms + eps))

    def rotate_half(t):
        h_ = t.shape[-1] // 2
        return jnp.concatenate([-t[..., h_:], t[..., :h_]], axis=-1)

    h = rmsnorm(x, params["g1"])
    qk = h @ params["wqk"] + params["bqk"]
    v = h @ params["wv"] + params["bv"]
    q, k = qk[..., :C], qk[..., C:]
    q = q.reshape(B, T, n_head, D).transpose(0, 2, 1, 3)
    k = k.reshape(B, T, n_head, D).transpose(0, 2, 1, 3)
    v = v.reshape(B, T, n_head, D).transpose(0, 2, 1, 3)
    cos_b, sin_b = cos[:T][None, None], sin[:T][None, None]
    q = q * cos_b + rotate_half(q) * sin_b
    k = k * cos_b + rotate_half(k) * sin_b
    att = jnp.einsum("bhqd,bhkd->bhqk", q, k) * (1.0 / (float(D) ** 0.5))
    mask = jnp.tril(jnp.ones((T, T), bool))
    att = jnp.where(mask[None, None], att, -jnp.inf)
    att = jax.nn.softmax(att, axis=-1)
    y = jnp.einsum("bhqk,bhkd->bhqd", att, v)
    y = y.transpose(0, 2, 1, 3).reshape(B, T, C)
    x1 = x + (y @ params["wap"] + params["bap"])
    h2 = rmsnorm(x1, params["g2"])
    hid = h2 @ params["wfc"] + params["bfc"]
    g = 0.5 * hid * (1.0 + jnp.tanh(GELU_C * (hid + 0.044715 * hid ** 3)))
    return x1 + (g @ params["wmp"] + params["bmp"])


if __name__ == "__main__":
    # Small config consistent with the module: B=2, T=8, n_embed=32, n_head=4
    B, T, C, NH = 2, 8, 32, 4
    HD = C // NH

    key = jax.random.PRNGKey(0)
    kx, kp = jax.random.split(key)
    x = jax.random.normal(kx, (B, T, C), dtype=jnp.float32)
    params = init_params(kp, C)

    cos_full, sin_full = precompute_theta_freqs(HD, 1024)   # block_size table
    cos, sin = cos_full[:T], sin_full[:T]                    # (T, head_dim)

    out = gpt2_block(x, params, cos, sin, n_head=NH)
    out = jax.block_until_ready(out)

    assert out.shape == (B, T, C)
    assert bool(jnp.all(jnp.isfinite(out)))

    # Loose tolerance: kernel uses bf16 MXU operands + approx reciprocals.
    ref = block_reference(x, params, cos, sin, n_head=NH)
    assert bool(jnp.max(jnp.abs(out - ref)) < 5e-2)

    print("KERNEL_OK")
</pallas_src>

<mosaic_0001>
module attributes {stable_mosaic.version = 11 : i64} {
  func.func @_flash_attn_kernel(%arg0: i32, %arg1: i32, %arg2: i32, %arg3: memref<1x4x8x8xbf16, #tpu.memory_space<vmem>>, %arg4: memref<1x4x8x8xbf16, #tpu.memory_space<vmem>>, %arg5: memref<1x4x8x8xbf16, #tpu.memory_space<vmem>>, %arg6: memref<1x8x32xbf16, #tpu.memory_space<vmem>>, %arg7: memref<4x8x1xf32, #tpu.memory_space<vmem>>, %arg8: memref<4x8x1xf32, #tpu.memory_space<vmem>>, %arg9: memref<4x8x8xf32, #tpu.memory_space<vmem>>) attributes {dimension_semantics = [#tpu.dimension_semantics<parallel>, #tpu.dimension_semantics<parallel>, #tpu.dimension_semantics<arbitrary>], iteration_bounds = array<i64: 2, 1, 1>, scalar_prefetch = 0 : i64, scratch_operands = 3 : i64, tpu.core_type = #tpu.core_type<tc>, window_params = [{transform_indices = @transform_0, window_bounds = array<i64: 1, 4, 8, 8>}, {transform_indices = @transform_1, window_bounds = array<i64: 1, 4, 8, 8>}, {transform_indices = @transform_2, window_bounds = array<i64: 1, 4, 8, 8>}, {transform_indices = @transform_3, window_bounds = array<i64: 1, 8, 32>}]} {
    %c0_i32 = arith.constant 0 : i32
    %0 = arith.cmpi eq, %arg2, %c0_i32 : i32
    %1 = arith.extui %0 : i1 to i32
    %c0_i32_0 = arith.constant 0 : i32
    %2 = arith.cmpi ne, %1, %c0_i32_0 : i32
    scf.if %2 {
      %cst = arith.constant -1.000000e+30 : f32
      %12 = vector.broadcast %cst : f32 to vector<4x8x1xf32>
      %c0 = arith.constant 0 : index
      %c0_6 = arith.constant 0 : index
      %c0_7 = arith.constant 0 : index
      %13 = vector.load %arg7[%c0, %c0_6, %c0_7] : memref<4x8x1xf32, #tpu.memory_space<vmem>>, vector<4x8x1xf32>
      tpu.vector_store %arg7[%c0, %c0_6, %c0_7], %12 {strides = array<i32>} : memref<4x8x1xf32, #tpu.memory_space<vmem>>, vector<4x8x1xf32>,
      %cst_8 = arith.constant 0.000000e+00 : f32
      %14 = vector.broadcast %cst_8 : f32 to vector<4x8x1xf32>
      %c0_9 = arith.constant 0 : index
      %c0_10 = arith.constant 0 : index
      %c0_11 = arith.constant 0 : index
      %15 = vector.load %arg8[%c0_9, %c0_10, %c0_11] : memref<4x8x1xf32, #tpu.memory_space<vmem>>, vector<4x8x1xf32>
      tpu.vector_store %arg8[%c0_9, %c0_10, %c0_11], %14 {strides = array<i32>} : memref<4x8x1xf32, #tpu.memory_space<vmem>>, vector<4x8x1xf32>,
      %cst_12 = arith.constant 0.000000e+00 : f32
      %16 = vector.broadcast %cst_12 : f32 to vector<4x8x8xf32>
      %c0_13 = arith.constant 0 : index
      %c0_14 = arith.constant 0 : index
      %c0_15 = arith.constant 0 : index
      %17 = vector.load %arg9[%c0_13, %c0_14, %c0_15] : memref<4x8x8xf32, #tpu.memory_space<vmem>>, vector<4x8x8xf32>
      tpu.vector_store %arg9[%c0_13, %c0_14, %c0_15], %16 {strides = array<i32>} : memref<4x8x8xf32, #tpu.memory_space<vmem>>, vector<4x8x8xf32>,
    } else {
    }
    %c8_i32 = arith.constant 8 : i32
    %3 = arith.muli %arg1, %c8_i32 : i32
    %c8_i32_1 = arith.constant 8 : i32
    %4 = arith.muli %arg2, %c8_i32_1 : i32
    %c8_i32_2 = arith.constant 8 : i32
    %5 = arith.addi %3, %c8_i32_2 : i32
    %6 = arith.cmpi slt, %4, %5 : i32
    %7 = arith.extui %6 : i1 to i32
    %c0_i32_3 = arith.constant 0 : i32
    %8 = arith.cmpi ne, %7, %c0_i32_3 : i32
    scf.if %8 {
      %c0 = arith.constant 0 : index
      %c0_6 = arith.constant 0 : index
      %c0_7 = arith.constant 0 : index
      %c0_8 = arith.constant 0 : index
      %12 = vector.load %arg3[%c0, %c0_6, %c0_7, %c0_8] : memref<1x4x8x8xbf16, #tpu.memory_space<vmem>>, vector<1x4x8x8xbf16>
      %13 = vector.shape_cast %12 : vector<1x4x8x8xbf16> to vector<4x8x8xbf16>
      %c0_9 = arith.constant 0 : index
      %c0_10 = arith.constant 0 : index
      %c0_11 = arith.constant 0 : index
      %c0_12 = arith.constant 0 : index
      %14 = vector.load %arg4[%c0_9, %c0_10, %c0_11, %c0_12] : memref<1x4x8x8xbf16, #tpu.memory_space<vmem>>, vector<1x4x8x8xbf16>
      %15 = vector.shape_cast %14 : vector<1x4x8x8xbf16> to vector<4x8x8xbf16>
      %c0_13 = arith.constant 0 : index
      %c0_14 = arith.constant 0 : index
      %c0_15 = arith.constant 0 : index
      %c0_16 = arith.constant 0 : index
      %16 = vector.load %arg5[%c0_13, %c0_14, %c0_15, %c0_16] : memref<1x4x8x8xbf16, #tpu.memory_space<vmem>>, vector<1x4x8x8xbf16>
      %17 = vector.shape_cast %16 : vector<1x4x8x8xbf16> to vector<4x8x8xbf16>
      %cst = arith.constant dense<0.000000e+00> : vector<4x8x8xf32>
      %18 = tpu.matmul %13, %15, %cst {dimension_numbers = #tpu.dot_dimension_numbers<[2], [2], [1], [1], [0, 0, 0, 1, 1, 1], [0], [0]>} : vector<4x8x8xbf16>, vector<4x8x8xbf16>, vector<4x8x8xf32> -> vector<4x8x8xf32>
      %cst_17 = arith.constant 0.353553385 : f32
      %19 = vector.broadcast %cst_17 : f32 to vector<4x8x8xf32>
      %20 = arith.mulf %18, %19 : vector<4x8x8xf32>
      %21 = tpu.iota {dimensions = array<i32: 1>} : vector<1x8x8xi32>
      %22 = vector.broadcast %3 : i32 to vector<1x8x8xi32>
      %23 = arith.addi %22, %21 : vector<1x8x8xi32>
      %24 = tpu.iota {dimensions = array<i32: 2>} : vector<1x8x8xi32>
      %25 = vector.broadcast %4 : i32 to vector<1x8x8xi32>
      %26 = arith.addi %25, %24 : vector<1x8x8xi32>
      %27 = arith.cmpi sge, %23, %26 : vector<1x8x8xi32>
      %cst_18 = arith.constant -1.000000e+30 : f32
      %28 = vector.shape_cast %27 : vector<1x8x8xi1> to vector<1x8x8xi1>
      %29 = vector.broadcast %28 : vector<1x8x8xi1> to vector<4x8x8xi1>
      %30 = vector.broadcast %cst_18 : f32 to vector<4x8x8xf32>
      %31 = arith.select %29, %20, %30 : vector<4x8x8xi1>, vector<4x8x8xf32>
      %c0_19 = arith.constant 0 : index
      %c0_20 = arith.constant 0 : index
      %c0_21 = arith.constant 0 : index
      %32 = vector.load %arg7[%c0_19, %c0_20, %c0_21] : memref<4x8x1xf32, #tpu.memory_space<vmem>>, vector<4x8x1xf32>
      %cst_22 = arith.constant dense<0xFF800000> : vector<4x8xf32>
      %33 = vector.multi_reduction <maximumf>, %31, %cst_22 [2] : vector<4x8x8xf32> to vector<4x8xf32>
      %34 = vector.shape_cast %33 : vector<4x8xf32> to vector<4x8x1xf32>
      %35 = arith.maximumf %32, %34 : vector<4x8x1xf32>
      %36 = arith.subf %32, %35 : vector<4x8x1xf32>
      %37 = math.exp %36 : vector<4x8x1xf32>
      %38 = vector.broadcast %35 : vector<4x8x1xf32> to vector<4x8x8xf32>
      %39 = arith.subf %31, %38 : vector<4x8x8xf32>
      %40 = math.exp %39 : vector<4x8x8xf32>
      %c0_23 = arith.constant 0 : index
      %c0_24 = arith.constant 0 : index
      %c0_25 = arith.constant 0 : index
      %41 = vector.load %arg8[%c0_23, %c0_24, %c0_25] : memref<4x8x1xf32, #tpu.memory_space<vmem>>, vector<4x8x1xf32>
      %42 = arith.mulf %37, %41 : vector<4x8x1xf32>
      %cst_26 = arith.constant dense<0.000000e+00> : vector<4x8xf32>
      %43 = vector.multi_reduction <add>, %40, %cst_26 [2] : vector<4x8x8xf32> to vector<4x8xf32>
      %44 = vector.shape_cast %43 : vector<4x8xf32> to vector<4x8x1xf32>
      %45 = arith.addf %42, %44 : vector<4x8x1xf32>
      %c0_27 = arith.constant 0 : index
      %c0_28 = arith.constant 0 : index
      %c0_29 = arith.constant 0 : index
      %46 = vector.load %arg8[%c0_27, %c0_28, %c0_29] : memref<4x8x1xf32, #tpu.memory_space<vmem>>, vector<4x8x1xf32>
      tpu.vector_store %arg8[%c0_27, %c0_28, %c0_29], %45 {strides = array<i32>} : memref<4x8x1xf32, #tpu.memory_space<vmem>>, vector<4x8x1xf32>,
      %47 = arith.truncf %40 : vector<4x8x8xf32> to vector<4x8x8xbf16>
      %cst_30 = arith.constant dense<0.000000e+00> : vector<4x8x8xf32>
      %48 = tpu.matmul %47, %17, %cst_30 {dimension_numbers = #tpu.dot_dimension_numbers<[2], [1], [1], [2], [0, 0, 0, 1, 1, 2], [0], [0]>} : vector<4x8x8xbf16>, vector<4x8x8xbf16>, vector<4x8x8xf32> -> vector<4x8x8xf32>
      %c0_31 = arith.constant 0 : index
      %c0_32 = arith.constant 0 : index
      %c0_33 = arith.constant 0 : index
      %49 = vector.load %arg9[%c0_31, %c0_32, %c0_33] : memref<4x8x8xf32, #tpu.memory_space<vmem>>, vector<4x8x8xf32>
      %50 = vector.broadcast %37 : vector<4x8x1xf32> to vector<4x8x8xf32>
      %51 = arith.mulf %50, %49 : vector<4x8x8xf32>
      %52 = arith.addf %51, %48 : vector<4x8x8xf32>
      %c0_34 = arith.constant 0 : index
      %c0_35 = arith.constant 0 : index
      %c0_36 = arith.constant 0 : index
      %53 = vector.load %arg9[%c0_34, %c0_35, %c0_36] : memref<4x8x8xf32, #tpu.memory_space<vmem>>, vector<4x8x8xf32>
      tpu.vector_store %arg9[%c0_34, %c0_35, %c0_36], %52 {strides = array<i32>} : memref<4x8x8xf32, #tpu.memory_space<vmem>>, vector<4x8x8xf32>,
      %c0_37 = arith.constant 0 : index
      %c0_38 = arith.constant 0 : index
      %c0_39 = arith.constant 0 : index
      %54 = vector.load %arg7[%c0_37, %c0_38, %c0_39] : memref<4x8x1xf32, #tpu.memory_space<vmem>>, vector<4x8x1xf32>
      tpu.vector_store %arg7[%c0_37, %c0_38, %c0_39], %35 {strides = array<i32>} : memref<4x8x1xf32, #tpu.memory_space<vmem>>, vector<4x8x1xf32>,
    } else {
    }
    %c0_i32_4 = arith.constant 0 : i32
    %9 = arith.cmpi eq, %arg2, %c0_i32_4 : i32
    %10 = arith.extui %9 : i1 to i32
    %c0_i32_5 = arith.constant 0 : i32
    %11 = arith.cmpi ne, %10, %c0_i32_5 : i32
    scf.if %11 {
      %c0 = arith.constant 0 : index
      %c0_6 = arith.constant 0 : index
      %c0_7 = arith.constant 0 : index
      %12 = vector.load %arg9[%c0, %c0_6, %c0_7] : memref<4x8x8xf32, #tpu.memory_space<vmem>>, vector<4x8x8xf32>
      %c0_8 = arith.constant 0 : index
      %c0_9 = arith.constant 0 : index
      %c0_10 = arith.constant 0 : index
      %13 = vector.load %arg8[%c0_8, %c0_9, %c0_10] : memref<4x8x1xf32, #tpu.memory_space<vmem>>, vector<4x8x1xf32>
      %14 = tpu.reciprocal %13 {approx = true} : vector<4x8x1xf32> -> vector<4x8x1xf32>
      %15 = vector.broadcast %14 : vector<4x8x1xf32> to vector<4x8x8xf32>
      %16 = arith.mulf %12, %15 : vector<4x8x8xf32>
      %17 = tpu.transpose %16, [1, 0, 2] : vector<4x8x8xf32> -> vector<8x4x8xf32>
      %18 = vector.shape_cast %17 : vector<8x4x8xf32> to vector<8x32xf32>
      %19 = arith.truncf %18 : vector<8x32xf32> to vector<8x32xbf16>
      %c0_11 = arith.constant 0 : index
      %c0_12 = arith.constant 0 : index
      %c0_13 = arith.constant 0 : index
      %20 = vector.load %arg6[%c0_11, %c0_12, %c0_13] : memref<1x8x32xbf16, #tpu.memory_space<vmem>>, vector<1x8x32xbf16>
      %21 = vector.shape_cast %20 : vector<1x8x32xbf16> to vector<8x32xbf16>
      %22 = vector.shape_cast %19 : vector<8x32xbf16> to vector<1x8x32xbf16>
      tpu.vector_store %arg6[%c0_11, %c0_12, %c0_13], %22 {strides = array<i32>} : memref<1x8x32xbf16, #tpu.memory_space<vmem>>, vector<1x8x32xbf16>,
    } else {
    }
    return
  }
  func.func @transform_0(%arg0: i32, %arg1: i32, %arg2: i32) -> (i32, i32, i32, i32) {
    %c0_i32 = arith.constant 0 : i32
    %c0_i32_0 = arith.constant 0 : i32
    %c0_i32_1 = arith.constant 0 : i32
    return %arg0, %c0_i32, %arg1, %c0_i32_0 : i32, i32, i32, i32
  }
  func.func @transform_1(%arg0: i32, %arg1: i32, %arg2: i32) -> (i32, i32, i32, i32) {
    %c0_i32 = arith.constant 0 : i32
    %c0_i32_0 = arith.constant 0 : i32
    %c0_i32_1 = arith.constant 0 : i32
    return %arg0, %c0_i32, %arg2, %c0_i32_0 : i32, i32, i32, i32
  }
  func.func @transform_2(%arg0: i32, %arg1: i32, %arg2: i32) -> (i32, i32, i32, i32) {
    %c0_i32 = arith.constant 0 : i32
    %c0_i32_0 = arith.constant 0 : i32
    %c0_i32_1 = arith.constant 0 : i32
    return %arg0, %c0_i32, %arg2, %c0_i32_0 : i32, i32, i32, i32
  }
  func.func @transform_3(%arg0: i32, %arg1: i32, %arg2: i32) -> (i32, i32, i32) {
    %c0_i32 = arith.constant 0 : i32
    %c0_i32_0 = arith.constant 0 : i32
    return %arg0, %arg1, %c0_i32 : i32, i32, i32
  }
}

module attributes {stable_mosaic.version = 11 : i64} {
  func.func @_qkv_rotary_kernel(%arg0: i32, %arg1: i32, %arg2: memref<1x8x32xf32, #tpu.memory_space<vmem>>, %arg3: memref<1x32xf32, #tpu.memory_space<vmem>>, %arg4: memref<32x96xbf16, #tpu.memory_space<vmem>>, %arg5: memref<1x96xf32, #tpu.memory_space<vmem>>, %arg6: memref<8x8xf32, #tpu.memory_space<vmem>>, %arg7: memref<8x8xf32, #tpu.memory_space<vmem>>, %arg8: memref<1x4x8x8xbf16, #tpu.memory_space<vmem>>, %arg9: memref<1x4x8x8xbf16, #tpu.memory_space<vmem>>, %arg10: memref<1x4x8x8xbf16, #tpu.memory_space<vmem>>) attributes {dimension_semantics = [#tpu.dimension_semantics<parallel>, #tpu.dimension_semantics<parallel>], iteration_bounds = array<i64: 2, 1>, scalar_prefetch = 0 : i64, scratch_operands = 0 : i64, tpu.core_type = #tpu.core_type<tc>, window_params = [{transform_indices = @transform_0, window_bounds = array<i64: 1, 8, 32>}, {pipeline_mode = #tpu.pipeline_mode<synchronous>, transform_indices = @transform_1, window_bounds = array<i64: 1, 32>}, {pipeline_mode = #tpu.pipeline_mode<synchronous>, transform_indices = @transform_2, window_bounds = array<i64: 32, 96>}, {pipeline_mode = #tpu.pipeline_mode<synchronous>, transform_indices = @transform_3, window_bounds = array<i64: 1, 96>}, {transform_indices = @transform_4, window_bounds = array<i64: 8, 8>}, {transform_indices = @transform_5, window_bounds = array<i64: 8, 8>}, {transform_indices = @transform_6, window_bounds = array<i64: 1, 4, 8, 8>}, {transform_indices = @transform_7, window_bounds = array<i64: 1, 4, 8, 8>}, {transform_indices = @transform_8, window_bounds = array<i64: 1, 4, 8, 8>}]} {
    %c0 = arith.constant 0 : index
    %c0_0 = arith.constant 0 : index
    %c0_1 = arith.constant 0 : index
    %0 = vector.load %arg2[%c0, %c0_0, %c0_1] : memref<1x8x32xf32, #tpu.memory_space<vmem>>, vector<1x8x32xf32>
    %1 = vector.shape_cast %0 : vector<1x8x32xf32> to vector<8x32xf32>
    %2 = arith.mulf %1, %1 : vector<8x32xf32>
    %cst = arith.constant dense<0.000000e+00> : vector<8xf32>
    %3 = vector.multi_reduction <add>, %2, %cst [1] : vector<8x32xf32> to vector<8xf32>
    %4 = vector.shape_cast %3 : vector<8xf32> to vector<8x1xf32>
    %5 = math.sqrt %4 : vector<8x1xf32>
    %cst_2 = arith.constant 0.176776692 : f32
    %6 = vector.broadcast %cst_2 : f32 to vector<8x1xf32>
    %7 = arith.mulf %5, %6 : vector<8x1xf32>
    %c0_3 = arith.constant 0 : index
    %c0_4 = arith.constant 0 : index
    %8 = vector.load %arg3[%c0_3, %c0_4] : memref<1x32xf32, #tpu.memory_space<vmem>>, vector<1x32xf32>
    %cst_5 = arith.constant 9.99999974E-6 : f32
    %9 = vector.broadcast %cst_5 : f32 to vector<8x1xf32>
    %10 = arith.addf %7, %9 : vector<8x1xf32>
    %11 = tpu.reciprocal %10 {approx = true} : vector<8x1xf32> -> vector<8x1xf32>
    %12 = vector.broadcast %11 : vector<8x1xf32> to vector<8x32xf32>
    %13 = arith.mulf %1, %12 : vector<8x32xf32>
    %14 = vector.broadcast %8 : vector<1x32xf32> to vector<8x32xf32>
    %15 = arith.mulf %14, %13 : vector<8x32xf32>
    %16 = arith.truncf %15 : vector<8x32xf32> to vector<8x32xbf16>
    %c0_6 = arith.constant 0 : index
    %c0_7 = arith.constant 0 : index
    %17 = vector.load %arg4[%c0_6, %c0_7] : memref<32x96xbf16, #tpu.memory_space<vmem>>, vector<32x96xbf16>
    %cst_8 = arith.constant dense<0.000000e+00> : vector<8x96xf32>
    %18 = tpu.matmul %16, %17, %cst_8 {dimension_numbers = #tpu.dot_dimension_numbers<[1], [0], [0], [1], [0, 0, 1, 1], [], []>} : vector<8x32xbf16>, vector<32x96xbf16>, vector<8x96xf32> -> vector<8x96xf32>
    %c0_9 = arith.constant 0 : index
    %c0_10 = arith.constant 0 : index
    %19 = vector.load %arg5[%c0_9, %c0_10] : memref<1x96xf32, #tpu.memory_space<vmem>>, vector<1x96xf32>
    %20 = vector.broadcast %19 : vector<1x96xf32> to vector<8x96xf32>
    %21 = arith.addf %18, %20 : vector<8x96xf32>
    %22 = vector.extract_strided_slice %21 {offsets = [0, 0], sizes = [8, 32], strides = [1, 1]} : vector<8x96xf32> to vector<8x32xf32>
    %23 = vector.shape_cast %22 : vector<8x32xf32> to vector<8x4x8xf32>
    %24 = vector.extract_strided_slice %21 {offsets = [0, 32], sizes = [8, 32], strides = [1, 1]} : vector<8x96xf32> to vector<8x32xf32>
    %25 = vector.shape_cast %24 : vector<8x32xf32> to vector<8x4x8xf32>
    %26 = vector.extract_strided_slice %21 {offsets = [0, 64], sizes = [8, 32], strides = [1, 1]} : vector<8x96xf32> to vector<8x32xf32>
    %27 = vector.shape_cast %26 : vector<8x32xf32> to vector<8x4x8xf32>
    %c0_11 = arith.constant 0 : index
    %c0_12 = arith.constant 0 : index
    %28 = vector.load %arg6[%c0_11, %c0_12] : memref<8x8xf32, #tpu.memory_space<vmem>>, vector<8x8xf32>
    %29 = vector.shape_cast %28 : vector<8x8xf32> to vector<8x1x8xf32>
    %c0_13 = arith.constant 0 : index
    %c0_14 = arith.constant 0 : index
    %30 = vector.load %arg7[%c0_13, %c0_14] : memref<8x8xf32, #tpu.memory_space<vmem>>, vector<8x8xf32>
    %31 = vector.shape_cast %30 : vector<8x8xf32> to vector<8x1x8xf32>
    %32 = vector.broadcast %29 : vector<8x1x8xf32> to vector<8x4x8xf32>
    %33 = arith.mulf %23, %32 : vector<8x4x8xf32>
    %34 = vector.extract_strided_slice %23 {offsets = [0, 0, 4], sizes = [8, 4, 4], strides = [1, 1, 1]} : vector<8x4x8xf32> to vector<8x4x4xf32>
    %cst_15 = arith.constant 0.000000e+00 : f32
    %35 = vector.broadcast %cst_15 : f32 to vector<8x4x4xf32>
    %36 = arith.subf %35, %34 : vector<8x4x4xf32>
    %37 = vector.extract_strided_slice %23 {offsets = [0, 0, 0], sizes = [8, 4, 4], strides = [1, 1, 1]} : vector<8x4x8xf32> to vector<8x4x4xf32>
    %38 = tpu.concatenate %36, %37 in 2 : vector<8x4x4xf32>, vector<8x4x4xf32> -> vector<8x4x8xf32>
    %39 = vector.broadcast %31 : vector<8x1x8xf32> to vector<8x4x8xf32>
    %40 = arith.mulf %38, %39 : vector<8x4x8xf32>
    %41 = arith.addf %33, %40 : vector<8x4x8xf32>
    %42 = vector.broadcast %29 : vector<8x1x8xf32> to vector<8x4x8xf32>
    %43 = arith.mulf %25, %42 : vector<8x4x8xf32>
    %44 = vector.extract_strided_slice %25 {offsets = [0, 0, 4], sizes = [8, 4, 4], strides = [1, 1, 1]} : vector<8x4x8xf32> to vector<8x4x4xf32>
    %cst_16 = arith.constant 0.000000e+00 : f32
    %45 = vector.broadcast %cst_16 : f32 to vector<8x4x4xf32>
    %46 = arith.subf %45, %44 : vector<8x4x4xf32>
    %47 = vector.extract_strided_slice %25 {offsets = [0, 0, 0], sizes = [8, 4, 4], strides = [1, 1, 1]} : vector<8x4x8xf32> to vector<8x4x4xf32>
    %48 = tpu.concatenate %46, %47 in 2 : vector<8x4x4xf32>, vector<8x4x4xf32> -> vector<8x4x8xf32>
    %49 = vector.broadcast %31 : vector<8x1x8xf32> to vector<8x4x8xf32>
    %50 = arith.mulf %48, %49 : vector<8x4x8xf32>
    %51 = arith.addf %43, %50 : vector<8x4x8xf32>
    %52 = tpu.transpose %41, [1, 0, 2] : vector<8x4x8xf32> -> vector<4x8x8xf32>
    %53 = arith.truncf %52 : vector<4x8x8xf32> to vector<4x8x8xbf16>
    %c0_17 = arith.constant 0 : index
    %c0_18 = arith.constant 0 : index
    %c0_19 = arith.constant 0 : index
    %c0_20 = arith.constant 0 : index
    %54 = vector.load %arg8[%c0_17, %c0_18, %c0_19, %c0_20] : memref<1x4x8x8xbf16, #tpu.memory_space<vmem>>, vector<1x4x8x8xbf16>
    %55 = vector.shape_cast %54 : vector<1x4x8x8xbf16> to vector<4x8x8xbf16>
    %56 = vector.shape_cast %53 : vector<4x8x8xbf16> to vector<1x4x8x8xbf16>
    tpu.vector_store %arg8[%c0_17, %c0_18, %c0_19, %c0_20], %56 {strides = array<i32>} : memref<1x4x8x8xbf16, #tpu.memory_space<vmem>>, vector<1x4x8x8xbf16>,
    %57 = tpu.transpose %51, [1, 0, 2] : vector<8x4x8xf32> -> vector<4x8x8xf32>
    %58 = arith.truncf %57 : vector<4x8x8xf32> to vector<4x8x8xbf16>
    %c0_21 = arith.constant 0 : index
    %c0_22 = arith.constant 0 : index
    %c0_23 = arith.constant 0 : index
    %c0_24 = arith.constant 0 : index
    %59 = vector.load %arg9[%c0_21, %c0_22, %c0_23, %c0_24] : memref<1x4x8x8xbf16, #tpu.memory_space<vmem>>, vector<1x4x8x8xbf16>
    %60 = vector.shape_cast %59 : vector<1x4x8x8xbf16> to vector<4x8x8xbf16>
    %61 = vector.shape_cast %58 : vector<4x8x8xbf16> to vector<1x4x8x8xbf16>
    tpu.vector_store %arg9[%c0_21, %c0_22, %c0_23, %c0_24], %61 {strides = array<i32>} : memref<1x4x8x8xbf16, #tpu.memory_space<vmem>>, vector<1x4x8x8xbf16>,
    %62 = tpu.transpose %27, [1, 0, 2] : vector<8x4x8xf32> -> vector<4x8x8xf32>
    %63 = arith.truncf %62 : vector<4x8x8xf32> to vector<4x8x8xbf16>
    %c0_25 = arith.constant 0 : index
    %c0_26 = arith.constant 0 : index
    %c0_27 = arith.constant 0 : index
    %c0_28 = arith.constant 0 : index
    %64 = vector.load %arg10[%c0_25, %c0_26, %c0_27, %c0_28] : memref<1x4x8x8xbf16, #tpu.memory_space<vmem>>, vector<1x4x8x8xbf16>
    %65 = vector.shape_cast %64 : vector<1x4x8x8xbf16> to vector<4x8x8xbf16>
    %66 = vector.shape_cast %63 : vector<4x8x8xbf16> to vector<1x4x8x8xbf16>
    tpu.vector_store %arg10[%c0_25, %c0_26, %c0_27, %c0_28], %66 {strides = array<i32>} : memref<1x4x8x8xbf16, #tpu.memory_space<vmem>>, vector<1x4x8x8xbf16>,
    return
  }
  func.func @transform_0(%arg0: i32, %arg1: i32) -> (i32, i32, i32) {
    %c0_i32 = arith.constant 0 : i32
    %c0_i32_0 = arith.constant 0 : i32
    return %arg0, %arg1, %c0_i32 : i32, i32, i32
  }
  func.func @transform_1(%arg0: i32, %arg1: i32) -> (i32, i32) {
    %c0_i32 = arith.constant 0 : i32
    %c0_i32_0 = arith.constant 0 : i32
    %c0_i32_1 = arith.constant 0 : i32
    return %c0_i32, %c0_i32_0 : i32, i32
  }
  func.func @transform_2(%arg0: i32, %arg1: i32) -> (i32, i32) {
    %c0_i32 = arith.constant 0 : i32
    %c0_i32_0 = arith.constant 0 : i32
    %c0_i32_1 = arith.constant 0 : i32
    return %c0_i32, %c0_i32_0 : i32, i32
  }
  func.func @transform_3(%arg0: i32, %arg1: i32) -> (i32, i32) {
    %c0_i32 = arith.constant 0 : i32
    %c0_i32_0 = arith.constant 0 : i32
    %c0_i32_1 = arith.constant 0 : i32
    return %c0_i32, %c0_i32_0 : i32, i32
  }
  func.func @transform_4(%arg0: i32, %arg1: i32) -> (i32, i32) {
    %c0_i32 = arith.constant 0 : i32
    %c0_i32_0 = arith.constant 0 : i32
    return %arg1, %c0_i32 : i32, i32
  }
  func.func @transform_5(%arg0: i32, %arg1: i32) -> (i32, i32) {
    %c0_i32 = arith.constant 0 : i32
    %c0_i32_0 = arith.constant 0 : i32
    return %arg1, %c0_i32 : i32, i32
  }
  func.func @transform_6(%arg0: i32, %arg1: i32) -> (i32, i32, i32, i32) {
    %c0_i32 = arith.constant 0 : i32
    %c0_i32_0 = arith.constant 0 : i32
    %c0_i32_1 = arith.constant 0 : i32
    return %arg0, %c0_i32, %arg1, %c0_i32_0 : i32, i32, i32, i32
  }
  func.func @transform_7(%arg0: i32, %arg1: i32) -> (i32, i32, i32, i32) {
    %c0_i32 = arith.constant 0 : i32
    %c0_i32_0 = arith.constant 0 : i32
    %c0_i32_1 = arith.constant 0 : i32
    return %arg0, %c0_i32, %arg1, %c0_i32_0 : i32, i32, i32, i32
  }
  func.func @transform_8(%arg0: i32, %arg1: i32) -> (i32, i32, i32, i32) {
    %c0_i32 = arith.constant 0 : i32
    %c0_i32_0 = arith.constant 0 : i32
    %c0_i32_1 = arith.constant 0 : i32
    return %arg0, %c0_i32, %arg1, %c0_i32_0 : i32, i32, i32, i32
  }
}

module attributes {stable_mosaic.version = 11 : i64} {
  func.func @_proj_mlp_kernel(%arg0: i32, %arg1: i32, %arg2: memref<1x8x32xf32, #tpu.memory_space<vmem>>, %arg3: memref<1x8x32xbf16, #tpu.memory_space<vmem>>, %arg4: memref<1x32xf32, #tpu.memory_space<vmem>>, %arg5: memref<32x32xbf16, #tpu.memory_space<vmem>>, %arg6: memref<1x32xf32, #tpu.memory_space<vmem>>, %arg7: memref<32x128xbf16, #tpu.memory_space<vmem>>, %arg8: memref<1x128xf32, #tpu.memory_space<vmem>>, %arg9: memref<128x32xbf16, #tpu.memory_space<vmem>>, %arg10: memref<1x32xf32, #tpu.memory_space<vmem>>, %arg11: memref<1x8x32xf32, #tpu.memory_space<vmem>>) attributes {dimension_semantics = [#tpu.dimension_semantics<parallel>, #tpu.dimension_semantics<parallel>], iteration_bounds = array<i64: 2, 1>, scalar_prefetch = 0 : i64, scratch_operands = 0 : i64, tpu.core_type = #tpu.core_type<tc>, window_params = [{transform_indices = @transform_0, window_bounds = array<i64: 1, 8, 32>}, {transform_indices = @transform_1, window_bounds = array<i64: 1, 8, 32>}, {pipeline_mode = #tpu.pipeline_mode<synchronous>, transform_indices = @transform_2, window_bounds = array<i64: 1, 32>}, {pipeline_mode = #tpu.pipeline_mode<synchronous>, transform_indices = @transform_3, window_bounds = array<i64: 32, 32>}, {pipeline_mode = #tpu.pipeline_mode<synchronous>, transform_indices = @transform_4, window_bounds = array<i64: 1, 32>}, {pipeline_mode = #tpu.pipeline_mode<synchronous>, transform_indices = @transform_5, window_bounds = array<i64: 32, 128>}, {pipeline_mode = #tpu.pipeline_mode<synchronous>, transform_indices = @transform_6, window_bounds = array<i64: 1, 128>}, {pipeline_mode = #tpu.pipeline_mode<synchronous>, transform_indices = @transform_7, window_bounds = array<i64: 128, 32>}, {pipeline_mode = #tpu.pipeline_mode<synchronous>, transform_indices = @transform_8, window_bounds = array<i64: 1, 32>}, {transform_indices = @transform_9, window_bounds = array<i64: 1, 8, 32>}]} {
    %c0 = arith.constant 0 : index
    %c0_0 = arith.constant 0 : index
    %c0_1 = arith.constant 0 : index
    %0 = vector.load %arg2[%c0, %c0_0, %c0_1] : memref<1x8x32xf32, #tpu.memory_space<vmem>>, vector<1x8x32xf32>
    %1 = vector.shape_cast %0 : vector<1x8x32xf32> to vector<8x32xf32>
    %c0_2 = arith.constant 0 : index
    %c0_3 = arith.constant 0 : index
    %c0_4 = arith.constant 0 : index
    %2 = vector.load %arg3[%c0_2, %c0_3, %c0_4] : memref<1x8x32xbf16, #tpu.memory_space<vmem>>, vector<1x8x32xbf16>
    %3 = vector.shape_cast %2 : vector<1x8x32xbf16> to vector<8x32xbf16>
    %c0_5 = arith.constant 0 : index
    %c0_6 = arith.constant 0 : index
    %4 = vector.load %arg5[%c0_5, %c0_6] : memref<32x32xbf16, #tpu.memory_space<vmem>>, vector<32x32xbf16>
    %cst = arith.constant dense<0.000000e+00> : vector<8x32xf32>
    %5 = tpu.matmul %3, %4, %cst {dimension_numbers = #tpu.dot_dimension_numbers<[1], [0], [0], [1], [0, 0, 1, 1], [], []>} : vector<8x32xbf16>, vector<32x32xbf16>, vector<8x32xf32> -> vector<8x32xf32>
    %c0_7 = arith.constant 0 : index
    %c0_8 = arith.constant 0 : index
    %6 = vector.load %arg6[%c0_7, %c0_8] : memref<1x32xf32, #tpu.memory_space<vmem>>, vector<1x32xf32>
    %7 = vector.broadcast %6 : vector<1x32xf32> to vector<8x32xf32>
    %8 = arith.addf %5, %7 : vector<8x32xf32>
    %9 = arith.addf %1, %8 : vector<8x32xf32>
    %10 = arith.mulf %9, %9 : vector<8x32xf32>
    %cst_9 = arith.constant dense<0.000000e+00> : vector<8xf32>
    %11 = vector.multi_reduction <add>, %10, %cst_9 [1] : vector<8x32xf32> to vector<8xf32>
    %12 = vector.shape_cast %11 : vector<8xf32> to vector<8x1xf32>
    %13 = math.sqrt %12 : vector<8x1xf32>
    %cst_10 = arith.constant 0.176776692 : f32
    %14 = vector.broadcast %cst_10 : f32 to vector<8x1xf32>
    %15 = arith.mulf %13, %14 : vector<8x1xf32>
    %c0_11 = arith.constant 0 : index
    %c0_12 = arith.constant 0 : index
    %16 = vector.load %arg4[%c0_11, %c0_12] : memref<1x32xf32, #tpu.memory_space<vmem>>, vector<1x32xf32>
    %cst_13 = arith.constant 9.99999974E-6 : f32
    %17 = vector.broadcast %cst_13 : f32 to vector<8x1xf32>
    %18 = arith.addf %15, %17 : vector<8x1xf32>
    %19 = tpu.reciprocal %18 {approx = true} : vector<8x1xf32> -> vector<8x1xf32>
    %20 = vector.broadcast %19 : vector<8x1xf32> to vector<8x32xf32>
    %21 = arith.mulf %9, %20 : vector<8x32xf32>
    %22 = vector.broadcast %16 : vector<1x32xf32> to vector<8x32xf32>
    %23 = arith.mulf %22, %21 : vector<8x32xf32>
    %24 = arith.truncf %23 : vector<8x32xf32> to vector<8x32xbf16>
    %c0_14 = arith.constant 0 : index
    %c0_15 = arith.constant 0 : index
    %25 = vector.load %arg7[%c0_14, %c0_15] : memref<32x128xbf16, #tpu.memory_space<vmem>>, vector<32x128xbf16>
    %cst_16 = arith.constant dense<0.000000e+00> : vector<8x128xf32>
    %26 = tpu.matmul %24, %25, %cst_16 {dimension_numbers = #tpu.dot_dimension_numbers<[1], [0], [0], [1], [0, 0, 1, 1], [], []>} : vector<8x32xbf16>, vector<32x128xbf16>, vector<8x128xf32> -> vector<8x128xf32>
    %c0_17 = arith.constant 0 : index
    %c0_18 = arith.constant 0 : index
    %27 = vector.load %arg8[%c0_17, %c0_18] : memref<1x128xf32, #tpu.memory_space<vmem>>, vector<1x128xf32>
    %28 = vector.broadcast %27 : vector<1x128xf32> to vector<8x128xf32>
    %29 = arith.addf %26, %28 : vector<8x128xf32>
    %cst_19 = arith.constant 5.000000e-01 : f32
    %30 = vector.broadcast %cst_19 : f32 to vector<8x128xf32>
    %31 = arith.mulf %30, %29 : vector<8x128xf32>
    %cst_20 = arith.constant 4.471500e-02 : f32
    %32 = vector.broadcast %cst_20 : f32 to vector<8x128xf32>
    %33 = arith.mulf %32, %29 : vector<8x128xf32>
    %34 = arith.mulf %33, %29 : vector<8x128xf32>
    %35 = arith.mulf %34, %29 : vector<8x128xf32>
    %36 = arith.addf %29, %35 : vector<8x128xf32>
    %cst_21 = arith.constant 0.797884583 : f32
    %37 = vector.broadcast %cst_21 : f32 to vector<8x128xf32>
    %38 = arith.mulf %37, %36 : vector<8x128xf32>
    %39 = math.tanh %38 : vector<8x128xf32>
    %cst_22 = arith.constant 1.000000e+00 : f32
    %40 = vector.broadcast %cst_22 : f32 to vector<8x128xf32>
    %41 = arith.addf %40, %39 : vector<8x128xf32>
    %42 = arith.mulf %31, %41 : vector<8x128xf32>
    %43 = arith.truncf %42 : vector<8x128xf32> to vector<8x128xbf16>
    %c0_23 = arith.constant 0 : index
    %c0_24 = arith.constant 0 : index
    %44 = vector.load %arg9[%c0_23, %c0_24] : memref<128x32xbf16, #tpu.memory_space<vmem>>, vector<128x32xbf16>
    %cst_25 = arith.constant dense<0.000000e+00> : vector<8x32xf32>
    %45 = tpu.matmul %43, %44, %cst_25 {dimension_numbers = #tpu.dot_dimension_numbers<[1], [0], [0], [1], [0, 0, 1, 1], [], []>} : vector<8x128xbf16>, vector<128x32xbf16>, vector<8x32xf32> -> vector<8x32xf32>
    %c0_26 = arith.constant 0 : index
    %c0_27 = arith.constant 0 : index
    %46 = vector.load %arg10[%c0_26, %c0_27] : memref<1x32xf32, #tpu.memory_space<vmem>>, vector<1x32xf32>
    %47 = vector.broadcast %46 : vector<1x32xf32> to vector<8x32xf32>
    %48 = arith.addf %45, %47 : vector<8x32xf32>
    %49 = arith.addf %9, %48 : vector<8x32xf32>
    %c0_28 = arith.constant 0 : index
    %c0_29 = arith.constant 0 : index
    %c0_30 = arith.constant 0 : index
    %50 = vector.load %arg11[%c0_28, %c0_29, %c0_30] : memref<1x8x32xf32, #tpu.memory_space<vmem>>, vector<1x8x32xf32>
    %51 = vector.shape_cast %50 : vector<1x8x32xf32> to vector<8x32xf32>
    %52 = vector.shape_cast %49 : vector<8x32xf32> to vector<1x8x32xf32>
    tpu.vector_store %arg11[%c0_28, %c0_29, %c0_30], %52 {strides = array<i32>} : memref<1x8x32xf32, #tpu.memory_space<vmem>>, vector<1x8x32xf32>,
    return
  }
  func.func @transform_0(%arg0: i32, %arg1: i32) -> (i32, i32, i32) {
    %c0_i32 = arith.constant 0 : i32
    %c0_i32_0 = arith.constant 0 : i32
    return %arg0, %arg1, %c0_i32 : i32, i32, i32
  }
  func.func @transform_1(%arg0: i32, %arg1: i32) -> (i32, i32, i32) {
    %c0_i32 = arith.constant 0 : i32
    %c0_i32_0 = arith.constant 0 : i32
    return %arg0, %arg1, %c0_i32 : i32, i32, i32
  }
  func.func @transform_2(%arg0: i32, %arg1: i32) -> (i32, i32) {
    %c0_i32 = arith.constant 0 : i32
    %c0_i32_0 = arith.constant 0 : i32
    %c0_i32_1 = arith.constant 0 : i32
    return %c0_i32, %c0_i32_0 : i32, i32
  }
  func.func @transform_3(%arg0: i32, %arg1: i32) -> (i32, i32) {
    %c0_i32 = arith.constant 0 : i32
    %c0_i32_0 = arith.constant 0 : i32
    %c0_i32_1 = arith.constant 0 : i32
    return %c0_i32, %c0_i32_0 : i32, i32
  }
  func.func @transform_4(%arg0: i32, %arg1: i32) -> (i32, i32) {
    %c0_i32 = arith.constant 0 : i32
    %c0_i32_0 = arith.constant 0 : i32
    %c0_i32_1 = arith.constant 0 : i32
    return %c0_i32, %c0_i32_0 : i32, i32
  }
  func.func @transform_5(%arg0: i32, %arg1: i32) -> (i32, i32) {
    %c0_i32 = arith.constant 0 : i32
    %c0_i32_0 = arith.constant 0 : i32
    %c0_i32_1 = arith.constant 0 : i32
    return %c0_i32, %c0_i32_0 : i32, i32
  }
  func.func @transform_6(%arg0: i32, %arg1: i32) -> (i32, i32) {
    %c0_i32 = arith.constant 0 : i32
    %c0_i32_0 = arith.constant 0 : i32
    %c0_i32_1 = arith.constant 0 : i32
    return %c0_i32, %c0_i32_0 : i32, i32
  }
  func.func @transform_7(%arg0: i32, %arg1: i32) -> (i32, i32) {
    %c0_i32 = arith.constant 0 : i32
    %c0_i32_0 = arith.constant 0 : i32
    %c0_i32_1 = arith.constant 0 : i32
    return %c0_i32, %c0_i32_0 : i32, i32
  }
  func.func @transform_8(%arg0: i32, %arg1: i32) -> (i32, i32) {
    %c0_i32 = arith.constant 0 : i32
    %c0_i32_0 = arith.constant 0 : i32
    %c0_i32_1 = arith.constant 0 : i32
    return %c0_i32, %c0_i32_0 : i32, i32
  }
  func.func @transform_9(%arg0: i32, %arg1: i32) -> (i32, i32, i32) {
    %c0_i32 = arith.constant 0 : i32
    %c0_i32_0 = arith.constant 0 : i32
    return %arg0, %arg1, %c0_i32 : i32, i32, i32
  }
}

</mosaic_0001>

<bundles_post_ra>
// kernel: gpt2_block.5
= control target key start
LH: loop header
LB: loop body
LE: loop exit
PB: predicated region body
PF: predicated region fallthrough
CT: control target
= control target key end

     0   :  { %s2078_s0 = inlined_call_operand.hbm [shape: f32[2,8,32], index: 0, kind: input, shape index: {}]   ;;  %s2079_s1 = inlined_call_operand.hbm [shape: bf16[2,8,32], index: 1, kind: input, shape index: {}]   ;;  %s2080_s2 = inlined_call_operand.hbm [shape: f32[1,32], index: 2, kind: input, shape index: {}]   ;;  %s2081_s3 = inlined_call_operand.hbm [shape: bf16[32,32], index: 3, kind: input, shape index: {}]   ;;  %s2082_s4 = inlined_call_operand.hbm [shape: f32[1,32], index: 4, kind: input, shape index: {}]   ;;  %s2083_s5 = inlined_call_operand.hbm [shape: bf16[32,128], index: 5, kind: input, shape index: {}]   ;;  %s2084_s6 = inlined_call_operand.hbm [shape: f32[1,128], index: 6, kind: input, shape index: {}]   ;;  %s2085_s7 = inlined_call_operand.hbm [shape: bf16[128,32], index: 7, kind: input, shape index: {}]   ;;  %s2086_s8 = inlined_call_operand.hbm [shape: f32[1,32], index: 8, kind: input, shape index: {}]   ;;  %s2087_s9 = inlined_call_operand.hbm [shape: f32[2,8,32], index: 9, kind: output, shape index: {}]  }
   0x1   :  { %2093 = sst [smem:[#allocation26_spill]] %s2078_s0 }
   0x2   :  { %2094 = sst [smem:[#allocation27_spill]] %s2080_s2 }
   0x3   :  { %2095 = sst [smem:[#allocation28_spill]] %s2081_s3 }
   0x4   :  { %2096 = sst [smem:[#allocation29_spill]] %s2082_s4 }
   0x5   :  { %2097 = sst [smem:[#allocation30_spill]] %s2083_s5 }
   0x6   :  { %2098 = sst [smem:[#allocation31_spill]] %s2087_s9 }
   0x7   :  { %14 = vsyncpa [#allocation3], 0 }
   0x8   :  { %16 = vsyncpa [#allocation3 + $0x1], 0 }
   0x9   :  { %17 = vsyncpa [#allocation6], 0 }
   0xa   :  { %19 = vsyncpa [#allocation6 + $0x1], 0 }
   0xb   :  { %20 = vsyncpa [#allocation9], 0 }
   0xc   :  { %21 = vsyncpa [#allocation12], 0 }
   0xd   :  { %22 = vsyncpa [#allocation15], 0 }
   0xe   :  { %23 = vsyncpa [#allocation4], 0 }
   0xf   :  { %25 = vsyncpa [#allocation4 + $0x1], 0  ;;  %s1650_s30 = smov 0   ;;  %s1652_s10 = smov 0  }
  0x10   :  { %s1654_s11 = smov 0   ;;  %s1656_s12 = smov 0  }
  0x11   :  { %s1658_s13 = smov 0   ;;  %s1660_s14 = smov 0  }
  0x12 LB: > { %2099 = sst [smem:[#allocation25_spill]] %s1576_s12  ;;  %s1681_s15 = sadd.s32 4294967295, %s1584_s14   ;;  %s1584_s14 = sphi %s1660_s14, %s31_s14   ;;  %s1580_s13 = sphi %s1658_s13, %s2134_s13   ;;  %s1576_s12 = sphi %s1656_s12, %s2133_s12   ;;  %s1572_s11 = sphi %s1654_s11, %s2132_s11   ;;  %s1568_s10 = sphi %s1652_s10, %s2131_s10   ;;  %s1564_s30 = sphi %s1650_s30, %s2130_s30  }
  0x13   : > { %p969_p0 = scmp.ge.s32.totalorder %s1584_s14, 1  ;;  %p2088_p1 = scmp.eq.s32.totalorder %s1681_s15, 0 }
  0x14   : > { %p279_p2 = scmp.lt.s32.totalorder %s1584_s14, 3  ;;  %s1586_s17 = smov [#allocation7]  }
  0x15   : > { %s292_s18 = sshll.u32 %s1586_s17, 4  ;;  %s1587_s19 = smov [#allocation8]   ;;  %s293_s18 = int_to_ptr.vmem [resolvable:$true] %s292_s18 }
  0x16   : > { %p1686_p3 = pnand %p969_p0, %p279_p2  ;;  %s302_s20 = sshll.u32 %s1587_s19, 4  ;;  %s1699_s20 = int_to_ptr.vmem [resolvable:$true] %s302_s20 }
  0x17   : > { %s1588_s22 = smov [#allocation11]   ;;  %s2102_s2 = sld [smem:[#allocation27_spill]] }
  0x18   : > { %s2100_s16 = scalar_select %p1686_p3, 1, 0 }
  0x19   : > { %p1100_p5 = pneg %p1686_p3  ;;  %s1701_s23 = sshll.u32 %s1588_s22, 4  ;;  %s327_s23 = int_to_ptr.vmem [resolvable:$true] %s1701_s23 }
  0x1b   : > { %p1695_p6 = pnand %p1100_p5, %p2088_p1 }
  0x1d   : > { %s1226_s26 = scalar_lea.hbm %s2102_s2, 16  ;;  %p1711_p8 = pneg %p1695_p6 }
  0x1e   : > { %p1227_p7 = scmp.ne.s32.totalorder %s2102_s2, %s1226_s26  ;;  %p1233_p11 = scmp.lt.u32.totalorder %s1226_s26, %s2102_s2 }
  0x20   : > { %p1229_p9 = pnand %p1711_p8, %p1227_p7 }
  0x22   : > { %p1230_p10 = pneg %p1229_p9 }
  0x24   : > { %p1235_p12 = pnand %p1233_p11, %p1230_p10 }
  0x26   : > { %1238 = shalt.err (!%p1235_p12)
}
  0x27   : > { %s1239_s22 = scalar_lea.vmem %s293_s18, 16  ;;  %s1246_s24 = scalar_lea.vmem %s293_s18, 32 }
  0x28   : > { %p1240_p13 = scmp.ne.s32.totalorder %s293_s18, %s1239_s22  ;;  %p1247_p5 = scmp.lt.s32.totalorder %s293_s18, %s293_s18 }
  0x29   : > { %p1248_p4 = scmp.lt.s32.totalorder %s1246_s24, %s1239_s22 }
  0x2a   : > { %p1242_p0 = pnand %p1240_p13, %p1711_p8 }
  0x2b   : > { %p1249_p1 = por %p1248_p4, %p1247_p5 }
  0x2c   : > { %p1243_p2 = pneg %p1242_p0 }
  0x2e   : > { %p1250_p3 = pnand %p1249_p1, %p1243_p2 }
  0x30   : > { %1253 = shalt.err (!%p1250_p3)
}
  0x31   : > { %1103 = dma.hbm_to_vmem [thread:$0]  (!%p1695_p6), %s2102_s2, 16, %s293_s18, [#allocation6]  }
  0x32   : > { %s2104_s3 = sld [smem:[#allocation28_spill]] }
  0x38   : > { %s1254_s17 = scalar_lea.hbm %s2104_s3, 256 }
  0x39   : > { %p1255_p7 = scmp.ne.s32.totalorder %s2104_s3, %s1254_s17  ;;  %p1261_p1 = scmp.lt.u32.totalorder %s1254_s17, %s2104_s3 }
  0x3b   : > { %p1257_p9 = pnand %p1255_p7, %p1711_p8 }
  0x3d   : > { %p1258_p4 = pneg %p1257_p9 }
  0x3f   : > { %p1263_p3 = pnand %p1261_p1, %p1258_p4 }
  0x41   : > { %1266 = shalt.err (!%p1263_p3)
}
  0x42   : > { %s1267_s18 = scalar_lea.vmem %s1699_s20, 256  ;;  %p1275_p13 = scmp.lt.s32.totalorder %s1699_s20, %s1699_s20 }
  0x43   : > { %p1268_p10 = scmp.ne.s32.totalorder %s1699_s20, %s1267_s18  ;;  %p1276_p0 = scmp.lt.s32.totalorder %s1267_s18, %s1267_s18 }
  0x45   : > { %p1270_p11 = pnand %p1268_p10, %p1711_p8  ;;  %p1277_p2 = por %p1276_p0, %p1275_p13 }
  0x47   : > { %p1271_p12 = pneg %p1270_p11 }
  0x49   : > { %p1278_p5 = pnand %p1277_p2, %p1271_p12 }
  0x4b   : > { %1281 = shalt.err (!%p1278_p5)
}
  0x4c   : > { %s1589_s9 = smov 64   ;;  %s1590_s25 = smov 4  }
  0x4d   : > { %1106 = dma.hbm_to_vmem [thread:$0]  (!%p1695_p6), %s2104_s3, 256, %s1699_s20, [#allocation9], %s1589_s9, %s1589_s9, %s1590_s25  }
  0x4e   : > { %s2105_s5 = sld [smem:[#allocation30_spill]] }
  0x54   : > { %s1282_s19 = scalar_lea.hbm %s2105_s5, 256 }
  0x55   : > { %p1283_p7 = scmp.ne.s32.totalorder %s2105_s5, %s1282_s19  ;;  %p1289_p1 = scmp.lt.u32.totalorder %s1282_s19, %s2105_s5 }
  0x57   : > { %p1285_p9 = pnand %p1283_p7, %p1711_p8 }
  0x59   : > { %p1286_p4 = pneg %p1285_p9 }
  0x5b   : > { %p1291_p3 = pnand %p1289_p1, %p1286_p4 }
  0x5d   : > { %1294 = shalt.err (!%p1291_p3)
}
  0x5e   : > { %s1295_s27 = scalar_lea.vmem %s327_s23, 256  ;;  %p1303_p13 = scmp.lt.s32.totalorder %s327_s23, %s327_s23 }
  0x5f   : > { %p1296_p10 = scmp.ne.s32.totalorder %s327_s23, %s1295_s27  ;;  %p1304_p0 = scmp.lt.s32.totalorder %s1295_s27, %s1295_s27 }
  0x61   : > { %p1298_p11 = pnand %p1296_p10, %p1711_p8  ;;  %p1305_p2 = por %p1304_p0, %p1303_p13 }
  0x63   : > { %p1299_p12 = pneg %p1298_p11 }
  0x65   : > { %p1306_p5 = pnand %p1305_p2, %p1299_p12 }
  0x67   : > { %1309 = shalt.err (!%p1306_p5)
}
  0x68   : > { %1112 = dma.hbm_to_vmem [thread:$0]  (!%p1695_p6), %s2105_s5, 256, %s327_s23, [#allocation12], %s1589_s9, %s1589_s9, %s1590_s25  }
  0x69   : > { %s1591_s26 = smov [#allocation14]   ;;  %s1592_s17 = smov [#allocation10]  }
  0x6a   : > { %s350_s28 = sshll.u32 %s1591_s26, 4  ;;  %s316_s19 = sshll.u32 %s1592_s17, 4  ;;  %s351_s28 = int_to_ptr.vmem [resolvable:$true] %s350_s28  ;;  %s317_s19 = int_to_ptr.vmem [resolvable:$true] %s316_s19 }
  0x6b   : > { %s1310_s18 = scalar_lea.hbm %s2085_s7, 1024 }
  0x6c   : > { %p1311_p7 = scmp.ne.s32.totalorder %s2085_s7, %s1310_s18  ;;  %p1317_p1 = scmp.lt.u32.totalorder %s1310_s18, %s2085_s7 }
  0x6e   : > { %p1313_p9 = pnand %p1311_p7, %p1711_p8 }
  0x70   : > { %p1314_p4 = pneg %p1313_p9 }
  0x72   : > { %p1319_p3 = pnand %p1317_p1, %p1314_p4 }
  0x74   : > { %1322 = shalt.err (!%p1319_p3)
}
  0x75   : > { %s1323_s23 = scalar_lea.vmem %s351_s28, 1024  ;;  %p1331_p13 = scmp.lt.s32.totalorder %s351_s28, %s351_s28 }
  0x76   : > { %p1324_p10 = scmp.ne.s32.totalorder %s351_s28, %s1323_s23  ;;  %p1332_p0 = scmp.lt.s32.totalorder %s1323_s23, %s1323_s23 }
  0x78   : > { %p1326_p11 = pnand %p1324_p10, %p1711_p8  ;;  %p1333_p2 = por %p1332_p0, %p1331_p13 }
  0x7a   : > { %p1327_p12 = pneg %p1326_p11 }
  0x7c   : > { %p1334_p5 = pnand %p1333_p2, %p1327_p12 }
  0x7e   : > { %1337 = shalt.err (!%p1334_p5)
}
  0x7f   : > { %1118 = dma.hbm_to_vmem [thread:$0]  (!%p1695_p6), %s2085_s7, 1024, %s351_s28, [#allocation15], %s1589_s9, %s1589_s9, %s1590_s25  }
  0x80   : > { %s2106_s4 = sld [smem:[#allocation29_spill]] }
  0x86   : > { %s1338_s17 = scalar_lea.hbm %s2106_s4, 16 }
  0x87   : > { %p1339_p7 = scmp.ne.s32.totalorder %s2106_s4, %s1338_s17  ;;  %p1345_p1 = scmp.lt.u32.totalorder %s1338_s17, %s2106_s4 }
  0x89   : > { %p1341_p9 = pnand %p1339_p7, %p1711_p8 }
  0x8b   : > { %p1342_p4 = pneg %p1341_p9 }
  0x8d   : > { %p1347_p3 = pnand %p1345_p1, %p1342_p4 }
  0x8f   : > { %1350 = shalt.err (!%p1347_p3)
}
  0x90   : > { %s1351_s2 = scalar_lea.vmem %s317_s19, 16  ;;  %s1358_s9 = scalar_lea.vmem %s317_s19, 32 }
  0x91   : > { %p1352_p10 = scmp.ne.s32.totalorder %s317_s19, %s1351_s2  ;;  %p1359_p13 = scmp.lt.s32.totalorder %s317_s19, %s317_s19 }
  0x92   : > { %p1360_p0 = scmp.lt.s32.totalorder %s1358_s9, %s1351_s2 }
  0x93   : > { %p1354_p11 = pnand %p1352_p10, %p1711_p8 }
  0x94   : > { %p1361_p2 = por %p1360_p0, %p1359_p13 }
  0x95   : > { %p1355_p12 = pneg %p1354_p11 }
  0x97   : > { %p1362_p5 = pnand %p1361_p2, %p1355_p12 }
  0x99   : > { %1365 = shalt.err (!%p1362_p5)
}
  0x9a   : > { %1109 = dma.hbm_to_vmem [thread:$0]  (!%p1695_p6), %s2106_s4, 16, %s317_s19, [#allocation9]  }
  0x9b   : > { %s1593_s23 = smov [#allocation13]   ;;  %s1594_s12 = smov [#allocation16]  }
  0x9c   : > { %s340_s3 = sshll.u32 %s1593_s23, 4  ;;  %s364_s20 = sshll.u32 %s1594_s12, 4  ;;  %s341_s3 = int_to_ptr.vmem [resolvable:$true] %s340_s3  ;;  %s365_s20 = int_to_ptr.vmem [resolvable:$true] %s364_s20 }
  0x9d   : > { %s1366_s22 = scalar_lea.hbm %s2084_s6, 16 }
  0x9e   : > { %p1367_p7 = scmp.ne.s32.totalorder %s2084_s6, %s1366_s22  ;;  %p1373_p1 = scmp.lt.u32.totalorder %s1366_s22, %s2084_s6 }
  0xa0   : > { %p1369_p9 = pnand %p1367_p7, %p1711_p8 }
  0xa2   : > { %p1370_p4 = pneg %p1369_p9 }
  0xa4   : > { %p1375_p3 = pnand %p1373_p1, %p1370_p4 }
  0xa6   : > { %1378 = shalt.err (!%p1375_p3)
}
  0xa7   : > { %s1379_s19 = scalar_lea.vmem %s341_s3, 16  ;;  %s1386_s9 = scalar_lea.vmem %s341_s3, 32 }
  0xa8   : > { %p1380_p10 = scmp.ne.s32.totalorder %s341_s3, %s1379_s19  ;;  %p1387_p13 = scmp.lt.s32.totalorder %s341_s3, %s341_s3 }
  0xa9   : > { %p1388_p0 = scmp.lt.s32.totalorder %s1386_s9, %s1379_s19 }
  0xaa   : > { %p1382_p11 = pnand %p1380_p10, %p1711_p8 }
  0xab   : > { %p1389_p2 = por %p1388_p0, %p1387_p13 }
  0xac   : > { %p1383_p12 = pneg %p1382_p11 }
  0xae   : > { %p1390_p5 = pnand %p1389_p2, %p1383_p12 }
  0xb0   : > { %1393 = shalt.err (!%p1390_p5)
}
  0xb1   : > { %1115 = dma.hbm_to_vmem [thread:$0]  (!%p1695_p6), %s2084_s6, 16, %s341_s3, [#allocation12]  }
  0xb2   : > { %s1394_s26 = scalar_lea.hbm %s2086_s8, 16 }
  0xb3   : > { %p1395_p7 = scmp.ne.s32.totalorder %s2086_s8, %s1394_s26  ;;  %p1401_p1 = scmp.lt.u32.totalorder %s1394_s26, %s2086_s8 }
  0xb5   : > { %p1397_p9 = pnand %p1395_p7, %p1711_p8 }
  0xb7   : > { %p1398_p4 = pneg %p1397_p9 }
  0xb9   : > { %p1403_p3 = pnand %p1401_p1, %p1398_p4 }
  0xbb   : > { %1406 = shalt.err (!%p1403_p3)
}
  0xbc   : > { %s1407_s27 = scalar_lea.vmem %s365_s20, 16  ;;  %s1414_s3 = scalar_lea.vmem %s365_s20, 32 }
  0xbd   : > { %p1408_p10 = scmp.ne.s32.totalorder %s365_s20, %s1407_s27  ;;  %p1415_p13 = scmp.lt.s32.totalorder %s365_s20, %s365_s20 }
  0xbe   : > { %p1416_p0 = scmp.lt.s32.totalorder %s1414_s3, %s1407_s27 }
  0xbf   : > { %p1410_p11 = pnand %p1408_p10, %p1711_p8 }
  0xc0   : > { %p1417_p2 = por %p1416_p0, %p1415_p13 }
  0xc1   : > { %p1411_p12 = pneg %p1410_p11 }
  0xc3   : > { %p1418_p5 = pnand %p1417_p2, %p1411_p12 }
  0xc5   : > { %1421 = shalt.err (!%p1418_p5)
}
  0xc6   : > { %1121 = dma.hbm_to_vmem [thread:$0]  (!%p1695_p6), %s2086_s8, 16, %s365_s20, [#allocation15]  }
  0xc7   : > { %s968_s29 = sadd.s32 4294967294, %s1584_s14   ;;  %s43_s9 = sadd.s32 1, %s1580_s13 }
  0xc8   : > { %s52_s21 = sadd.s32 1, %s1572_s11  ;;  %p45_p8 = scmp.ge.s32.totalorder %s43_s9, 2 }
  0xc9   : > { %p59_p7 = scmp.ne.s32.totalorder %s1572_s11, %s1568_s10  ;;  %p60_p9 = scmp.eq.s32.totalorder %s1584_s14, 0 }
  0xca   : > { %p65_p4 = scmp.ne.s32.totalorder %s1568_s10, %s1564_s30  ;;  %s2136_s9 = smov (%p45_p8, %s43_s9), 0 }
  0xcb   : > { %p1860_p1 = por %p60_p9, %p59_p7  ;;  %p2108_p3 = scmp.eq.s32.totalorder %s1681_s15, 0 }
  0xcc   : > { %s47_s28 = ssub.s32 %s1580_s13, %s2136_s9  ;;  %p266_p10 = scmp.eq.s32.totalorder %s1681_s15, 1 }
  0xcd   : > { %p1866_p6 = por %p2108_p3, %p65_p4  ;;  %p50_p11 = scmp.eq.s32.totalorder %s47_s28, 0 }
  0xce   : > { %p272_p12 = scmp.eq.s32.totalorder %s968_s29, 1  ;;  %p1873_p13 = por %p266_p10, %p59_p7 }
  0xcf   : > { %s2109_s20 = scalar_select %p1866_p6, 1, 0 }
  0xd0   : > { %s2110_s23 = scalar_select %p1873_p13, 1, 0 }
  0xd1   : > { %p1140_p0 = scmp.lt.s32.totalorder %s1584_s14, 2  ;;  %p1881_p2 = por %p272_p12, %p65_p4 }
  0xd2   : > { %s1879_s12 = scalar_select %p50_p11, %s1572_s11, %s52_s21  }
  0xd3   : > { %s2111_s26 = scalar_select %p1881_p2, 1, 0 }
  0xd4   : > { %s1886_s17 = sand.u32 1, %s1572_s11   ;;  %s979_s24 = sshll.u32 %s1580_s13, 7 }
  0xd5   : > { %s978_s22 = sshll.u32 %s1886_s17, 3  ;;  %s2112_s0 = sld [smem:[#allocation26_spill]] }
  0xd6   : > { %s379_s2 = scalar_lea.vmem [#allocation2], %s978_s22  ;;  %p1899_p5 = pnand %p1140_p0, %p1860_p1 }
  0xd7   : > { %s387_s19 = sshll.u32 %s379_s2, 4  ;;  %s980_s28 = sshll.u32 %s1886_s17, 2  ;;  %s1895_s19 = int_to_ptr.vmem [resolvable:$true] %s387_s19 }
  0xd8   : > { %s376_s18 = scalar_lea.sflag [#allocation3], %s1886_s17  ;;  %p1424_p7 = pneg %p1899_p5 }
  0xdb   : > { %s1893_s3 = scalar_lea.hbm %s2112_s0, %s979_s24  ;;  %s1427_s25 = scalar_lea.hbm %s2112_s0, 256 }
  0xdc   : > { %s1422_s24 = scalar_lea.hbm %s1893_s3, 128  ;;  %p1428_p1 = scmp.lt.u32.totalorder %s1893_s3, %s2112_s0 }
  0xdd   : > { %p1423_p8 = scmp.ne.s32.totalorder %s1893_s3, %s1422_s24  ;;  %p1429_p3 = scmp.lt.u32.totalorder %s1427_s25, %s1422_s24 }
  0xde   : > { %p1431_p11 = scmp.lt.u32.totalorder %s1422_s24, %s1893_s3 }
  0xdf   : > { %p1425_p9 = pnand %p1424_p7, %p1423_p8  ;;  %p1430_p10 = por %p1429_p3, %p1428_p1 }
  0xe1   : > { %p1426_p4 = pneg %p1425_p9  ;;  %p1432_p12 = por %p1431_p11, %p1430_p10 }
  0xe3   : > { %p1433_p0 = pnand %p1432_p12, %p1426_p4 }
  0xe5   : > { %1436 = shalt.err (!%p1433_p0)
}
  0xe6   : > { %s1437_s21 = scalar_lea.vmem %s1895_s19, 128  ;;  %s1595_s22 = smov [#allocation2]  }
  0xe7   : > { %p1438_p8 = scmp.ne.s32.totalorder %s1895_s19, %s1437_s21  ;;  %s1442_s27 = sshll.u32 %s1595_s22, 4  ;;  %s1443_s27 = int_to_ptr.vmem [resolvable:$false] %s1442_s27 }
  0xe8   : > { %s1444_s4 = scalar_lea.vmem %s1443_s27, 256  ;;  %p1445_p13 = scmp.lt.s32.totalorder %s1895_s19, %s1443_s27 }
  0xe9   : > { %p1440_p9 = pnand %p1438_p8, %p1424_p7  ;;  %p1446_p1 = scmp.lt.s32.totalorder %s1444_s4, %s1437_s21 }
  0xeb   : > { %p1441_p2 = pneg %p1440_p9  ;;  %p1447_p3 = por %p1446_p1, %p1445_p13 }
  0xed   : > { %p1448_p10 = pnand %p1447_p3, %p1441_p2 }
  0xef   : > { %1451 = shalt.err (!%p1448_p10)
}
  0xf0   : > { %1125 = dma.hbm_to_vmem [thread:$0]  (!%p1899_p5), %s1893_s3, 128, %s1895_s19, %s376_s18  }
  0xf1   : > { %s981_s24 = sshll.u32 %s1580_s13, 6  ;;  %s398_s21 = scalar_lea.vmem [#allocation5], %s980_s28 }
  0xf2   : > { %s1935_s22 = scalar_lea.hbm %s2079_s1, %s981_s24  ;;  %s406_s27 = sshll.u32 %s398_s21, 4  ;;  %s407_s27 = int_to_ptr.vmem [resolvable:$true] %s406_s27 }
  0xf3   : > { %s2114_s4 = sand.u32 1, %s1584_s14   ;;  %s1452_s5 = scalar_lea.hbm %s1935_s22, 64 }
  0xf4   : > { %s395_s0 = scalar_lea.sflag [#allocation6], %s2114_s4  ;;  %p1453_p13 = scmp.ne.s32.totalorder %s1935_s22, %s1452_s5 }
  0xf5   : > { %s1457_s18 = scalar_lea.hbm %s2079_s1, 128  ;;  %p1458_p11 = scmp.lt.u32.totalorder %s1935_s22, %s2079_s1 }
  0xf6   : > { %p1455_p2 = pnand %p1453_p13, %p1424_p7  ;;  %p1459_p12 = scmp.lt.u32.totalorder %s1457_s18, %s1452_s5 }
  0xf7   : > { %p1461_p8 = scmp.lt.u32.totalorder %s1452_s5, %s1935_s22 }
  0xf8   : > { %p1456_p4 = pneg %p1455_p2  ;;  %p1460_p0 = por %p1459_p12, %p1458_p11 }
  0xfa   : > { %p1462_p9 = por %p1461_p8, %p1460_p0 }
  0xfc   : > { %p1463_p1 = pnand %p1462_p9, %p1456_p4 }
  0xfe   : > { %1466 = shalt.err (!%p1463_p1)
}
  0xff   : > { %s1467_s28 = scalar_lea.vmem %s407_s27, 64  ;;  %s1596_s25 = smov [#allocation5]  }
 0x100   : > { %p1468_p3 = scmp.ne.s32.totalorder %s407_s27, %s1467_s28  ;;  %s1472_s2 = sshll.u32 %s1596_s25, 4  ;;  %s1473_s2 = int_to_ptr.vmem [resolvable:$false] %s1472_s2 }
 0x101   : > { %s1474_s21 = scalar_lea.vmem %s1473_s2, 128  ;;  %p1475_p2 = scmp.lt.s32.totalorder %s407_s27, %s1473_s2 }
 0x102   : > { %p1470_p10 = pnand %p1468_p3, %p1424_p7  ;;  %p1476_p6 = scmp.lt.s32.totalorder %s1474_s21, %s1467_s28 }
 0x104   : > { %p1471_p13 = pneg %p1470_p10  ;;  %p1477_p11 = por %p1476_p6, %p1475_p2 }
 0x106   : > { %p1478_p12 = pnand %p1477_p11, %p1471_p13 }
 0x108   : > { %1481 = shalt.err (!%p1478_p12)
}
 0x109   : > { %1128 = dma.hbm_to_vmem [thread:$0]  (!%p1899_p5), %s1935_s22, 64, %s407_s27, %s395_s0  }
 0x10a   : > { %p2115_p4 = scmp.ne.s32.totalorder %s2100_s16, 0 }
 0x10b   : > { %s1963_s5 = sand.u32 (!%p2115_p4), 1, %s1568_s10   ;;  %p2116_p6 = scmp.ne.s32.totalorder (!%p2115_p4), %s2109_s20, 0 }
 0x10c   : > { %415 = sbr.rel (%p2115_p4) target bundleno = 1169 (0x491), region = 56  ;;  %s983_s4 = sshll.u32 (!%p2115_p4), %s1963_s5, 3 }
 0x10d   : > { %s418_s3 = scalar_lea.sflag (!%p2115_p4), [#allocation3], %s1963_s5  ;;  %s1969_s19 = scalar_lea.vmem (!%p2115_p4), [#allocation2], %s983_s4 }
 0x113   : > { %1535 = dma.done.wait (%p2116_p6), %s418_s3, 128  }
 0x114   : > { %1537 = vsyncadd (%p2116_p6), %s418_s3, 4294967168  ;;  %s426_s0 = sand.u32 1, %s1681_s15   ;;  %s984_s16 = sshll.u32 %s1963_s5, 2 }
 0x115   : > { %s427_s29 = scalar_lea.sflag [#allocation6], %s426_s0  ;;  %s430_s22 = scalar_lea.vmem [#allocation5], %s984_s16 }
 0x116   : > { %1539 = dma.done.wait (%p2116_p6), %s427_s29, 64  }
 0x117   : > { %1541 = vsyncadd (%p2116_p6), %s427_s29, 4294967232  ;;  %p2117_p5 = scmp.eq.s32.totalorder %s1681_s15, 0 }
 0x119   : > { %1543 = dma.done.wait (%p2117_p5), [#allocation6], 16   ;;  %p2118_p7 = pmov %p2117_p5 }
 0x11a   : > { %p2119_p0 = pmov %p2117_p5 }
 0x11b   : > { %1545 = vsyncadd (%p2118_p7), [#allocation6], 4294967280 }
 0x11c   : > { %1547 = dma.done.wait (%p2119_p0), [#allocation9], 272   ;;  %p2120_p8 = pmov %p2119_p0 }
 0x11d   : > { %p2121_p9 = pmov %p2119_p0 }
 0x11e   : > { %1549 = vsyncadd (%p2120_p8), [#allocation9], 4294967024 }
 0x11f   : > { %1551 = dma.done.wait (%p2121_p9), [#allocation12], 272   ;;  %p2122_p1 = pmov %p2119_p0 }
 0x120   : > { %p2123_p3 = pmov %p2119_p0 }
 0x121   : > { %1553 = vsyncadd (%p2122_p1), [#allocation12], 4294967024 }
 0x122   : > { %1555 = dma.done.wait (%p2123_p3), [#allocation15], 1040   ;;  %p2124_p10 = pmov %p2119_p0 }
 0x123   : > { %v1597_v0 = vmov 0.0   ;;  %vm1598_vm0 = vmmov 0   ;;  %v1208_v1 = vld [vmem:[#allocation8] sm:$0xff]   ;;  %v1209_v2 = vld [vmem:[#allocation8 + $0x8] sm:$0xff]   ;;  %vm524_vm1 = vcmask 261120   ;;  %v1210_v14 = vld [vmem:[#allocation11] sm:$0xff]  }
 0x124   : > { %1557 = vsyncadd (%p2124_p10), [#allocation15], 4294966256  ;;  %1030 = vmatprep.subr.bf16.mxu1 %v1597_v0  ;;  %1034 = vmatprep.mubr.msk.bf16.mxu1 %vm1598_vm0, %v1597_v0  ;;  %v500_v3 = vld [vmem:[%s430_s22] sm:$0xf]  ;;  %v993_v4 = vld [vmem:[#allocation10] ss:$0 sm:$0xff] }
 0x125   : > { %1046 = vmatprep.subr.bf16.mxu0 %v1597_v0  ;;  %1062 = vmatprep.mubr.msk.bf16.mxu0 %vm1598_vm0, %v1597_v0  ;;  %v499_v5 = vld [vmem:[%s1969_s19] sm:$0xff]  ;;  %v1211_v15 = vld [vmem:[#allocation11 + $0x8] sm:$0xff]   ;;  %v998_v37 = vld [vmem:[#allocation13] ss:$0 sm:$0xff]  ;;  %s2125_s15 = sld [smem:[#allocation25_spill]]  ;;  %s497_s27 = scalar_lea.vmem [#allocation17], %s983_s4 }
 0x126   : > { %1031 = vmatpush3.bf16.msra.mxu1 %v1208_v1  ;;  %v1212_v16 = vld [vmem:[#allocation14] sm:$0xff]   ;;  %v997_v26 = vld [vmem:[#allocation7] ss:$0 sm:$0xff]  ;;  %v1213_v30 = vld [vmem:[#allocation14 + $0x8] sm:$0xff]   ;;  %s797_s18 = sshll.u32 %s497_s27, 4  ;;  %s2126_s28 = sld [smem:[#allocation31_spill]]  ;;  %s2030_s18 = int_to_ptr.vmem [resolvable:$true] %s797_s18 }
 0x127   : > { %1032 = vmatprep.subr.bf16.mxu1 %v1597_v0  ;;  %1047 = vmatpush3.bf16.msra.mxu0 %v1212_v16  ;;  %v1214_v31 = vld [vmem:[#allocation14 + $0x10] sm:$0xff]   ;;  %v1215_v32 = vld [vmem:[#allocation14 + $0x18] sm:$0xff]   ;;  %v1216_v33 = vld [vmem:[#allocation14 + $0x20] sm:$0xff]   ;;  %s783_s2 = scalar_lea.sflag [#allocation4], %s1963_s5  ;;  %s1482_s21 = scalar_lea.vmem %s2030_s18, 128 }
 0x128   : > { %1048 = vmatprep.subr.bf16.mxu0 %v1597_v0  ;;  %v1217_v34 = vld [vmem:[#allocation14 + $0x28] sm:$0xff]   ;;  %v1218_v35 = vld [vmem:[#allocation14 + $0x30] sm:$0xff]   ;;  %v1219_v36 = vld [vmem:[#allocation14 + $0x38] sm:$0xff]   ;;  %p1483_p13 = scmp.ne.s32.totalorder %s2030_s18, %s1482_s21  ;;  %p2127_p2 = scmp.ne.s32.totalorder %s2110_s23, 0 }
 0x129   : > { %v1002_v53 = vld [vmem:[#allocation16] ss:$0 sm:$0xff]  ;;  %s1599_s4 = smov [#allocation17]  }
 0x12a   : > { %1033 = vmatpush3.bf16.msra.mxu1 %v1209_v2  ;;  %p1484_p11 = pnand %p1483_p13, %p2127_p2  ;;  %s1486_s3 = sshll.u32 %s1599_s4, 4  ;;  %s1487_s3 = int_to_ptr.vmem [resolvable:$false] %s1486_s3 }
 0x12b   : > { %1038 = vmatprep.subr.bf16.mxu1 %v1597_v0  ;;  %1049 = vmatpush3.bf16.msra.mxu0 %v1213_v30  ;;  %s1012_s20 = sshll.u32 %s2125_s15, 7  ;;  %s1488_s19 = scalar_lea.vmem %s1487_s3, 256 }
 0x12c   : > { %1050 = vmatprep.subr.bf16.mxu0 %v1597_v0  ;;  %s2028_s25 = scalar_lea.hbm %s2126_s28, %s1012_s20  ;;  %p1485_p12 = pneg %p1484_p11 }
 0x12d   : > { %1035 = vmatmul.mubr.msk.bf16.vlgmr.msra.gmra.mrb[0].mxu1 %vm524_vm1, %v500_v3  ;;  %p1489_p4 = scmp.lt.s32.totalorder %s2030_s18, %s1487_s3  ;;  %p1490_p6 = scmp.lt.s32.totalorder %s1488_s19, %s1482_s21 }
 0x12e   : > { %1042 = vmatprep.mubr.msk.bf16.mxu1 %vm1598_vm0, %v1597_v0  ;;  %1039 = vmatpush3.bf16.msra.mxu1 %v1210_v14 }
 0x12f   : > { %1040 = vmatprep.subr.bf16.mxu1 %v1597_v0  ;;  %1051 = vmatpush3.bf16.msra.mxu0 %v1214_v31  ;;  %p1491_p5 = por %p1490_p6, %p1489_p4 }
 0x130   : > { %1052 = vmatprep.subr.bf16.mxu0 %v1597_v0 }
 0x131   : > { %p1492_p7 = pnand %p1491_p5, %p1485_p12 }
 0x132   : > { %1041 = vmatpush3.bf16.msra.mxu1 %v1211_v15 }
 0x133   : > { %1053 = vmatpush3.bf16.msra.mxu0 %v1215_v32 }
 0x134   : > { %1054 = vmatprep.subr.bf16.mxu0 %v1597_v0 }
 0x137   : > { %1055 = vmatpush3.bf16.msra.mxu0 %v1216_v33 }
 0x138   : > { %1056 = vmatprep.subr.bf16.mxu0 %v1597_v0 }
 0x13b   : > { %1057 = vmatpush3.bf16.msra.mxu0 %v1217_v34 }
 0x13c   : > { %1058 = vmatprep.subr.bf16.mxu0 %v1597_v0 }
 0x13f   : > { %1059 = vmatpush3.bf16.msra.mxu0 %v1218_v35 }
 0x140   : > { %1060 = vmatprep.subr.bf16.mxu0 %v1597_v0 }
 0x143   : > { %1061 = vmatpush3.bf16.msra.mxu0 %v1219_v36 }
 0x200   : > { %v562_v6 = vpop.f32.mrb[0].mxu1 }
 0x201   : > { %v563_v7 = vadd.f32 %v993_v4, %v562_v6  ;;  %v1036_v8 = vpop.f32.mrb[1].mxu1 }
 0x202   : > { %v565_v9 = vpop.f32.mrb[2].mxu1 }
 0x203   : > { %v2006_v10 = vadd.f32 %v563_v7, %v499_v5  ;;  %v1037_v11 = vpop.f32.mrb[3].mxu1 }
 0x205   : > { %v569_v12 = vmul.f32 %v2006_v10, %v2006_v10 }
 0x207   : > { %v570_v13 = vsel %vm524_vm1, %v569_v12, 0.0 }
 0x208   : > { %571 = vadd.xlane.f32.xlu0 %v570_v13 }
 0x295   : > { %v572_v17 = vpop.xlane.xlu0 %571 }
 0x296   : > { %1220 = vrsqrt.f32 %v572_v17  ;;  %vm575_vm2 = vcmp.eq.f32.partialorder %v572_v17, inf  ;;  %v578_v20 = vand.u32 2147483648, %v572_v17  ;;  %vm577_vm3 = vcmp.eq.f32.partialorder %v572_v17, 0.0 }
 0x2a0   : > { %v1221_v18 = vpop.eup %1220 }
 0x2a1   : > { %v574_v19 = vmul.f32 %v1221_v18, %v572_v17 }
 0x2a3   : > { %v576_v21 = vsel %vm575_vm2, %v572_v17, %v574_v19 }
 0x2a4   : > { %v579_v22 = vsel %vm577_vm3, %v578_v20, %v576_v21 }
 0x2a5   : > { %v580_v23 = vmul.f32 0.17677669, %v579_v22 }
 0x2a7   : > { %v582_v24 = vadd.f32 1e-05, %v580_v23 }
 0x2a9   : > { %1222 = vrcp.f32 %v582_v24 }
 0x2b3   : > { %v1223_v25 = vpop.eup %1222 }
 0x2b4   : > { %v584_v27 = vmul.f32 %v1223_v25, %v2006_v10 }
 0x2b6   : > { %v591_v28 = vmul.f32 %v997_v26, %v584_v27 }
 0x2b8   : > { %v592_v29 = vpack.c.bf16 %v591_v28, %v591_v28 }
 0x2ba   : > { %1043 = vmatmul.mubr.msk.bf16.vlgmr.msra.gmra.mrb[4].mxu1 %vm524_vm1, %v592_v29 }
 0x38d   : > { %v653_v38 = vpop.f32.mrb[4].mxu1 }
 0x38e   : > { %v654_v39 = vadd.f32 %v998_v37, %v653_v38  ;;  %v1044_v40 = vpop.f32.mrb[5].mxu1 }
 0x38f   : > { %v656_v41 = vpop.f32.mrb[6].mxu1 }
 0x390   : > { %v660_v42 = vmul.f32 0.044715, %v654_v39  ;;  %v1045_v43 = vpop.f32.mrb[7].mxu1  ;;  %v659_v49 = vmul.f32 0.5, %v654_v39 }
 0x392   : > { %v661_v44 = vmul.f32 %v660_v42, %v654_v39 }
 0x394   : > { %v662_v45 = vmul.f32 %v661_v44, %v654_v39 }
 0x396   : > { %v663_v46 = vadd.f32 %v662_v45, %v654_v39 }
 0x398   : > { %v664_v47 = vmul.f32 0.7978846, %v663_v46 }
 0x39a   : > { %1224 = vtanh.f32 %v664_v47 }
 0x3a4   : > { %v1225_v48 = vpop.eup %1224 }
 0x3a5   : > { %v666_v50 = vadd.f32 1.0, %v1225_v48 }
 0x3a7   : > { %v667_v51 = vmul.f32 %v666_v50, %v659_v49 }
 0x3a9   : > { %v668_v52 = vpack.c.bf16 %v667_v51, %v667_v51 }
 0x3ab   : > { %1063 = vmatmul.mubr.bf16.vlgmr.msra.gmra.mrb[0].mxu0 %v668_v52 }
 0x47e   : > { %v774_v54 = vpop.f32.mrb[0].mxu0 }
 0x47f   : > { %v775_v55 = vadd.f32 %v1002_v53, %v774_v54  ;;  %v1064_v56 = vpop.f32.mrb[1].mxu0 }
 0x480   : > { %v777_v57 = vpop.f32.mrb[2].mxu0 }
 0x481   : > { %v780_v58 = vadd.f32 %v775_v55, %v2006_v10  ;;  %v1065_v59 = vpop.f32.mrb[3].mxu0 }
 0x483   : > { %781 = vst.msk [vmem:[%s497_s27] sm:$0xff] %vm524_vm1, %v780_v58 }
 0x484   : > { %1495 = shalt.err (!%p1492_p7)
}
 0x485   : > { %s1496_s5 = scalar_lea.hbm %s2028_s25, 128  ;;  %s1500_s29 = scalar_lea.hbm %s2126_s28, 256 }
 0x486   : > { %p1497_p0 = scmp.ne.s32.totalorder %s2028_s25, %s1496_s5  ;;  %p1501_p1 = scmp.lt.u32.totalorder %s2028_s25, %s2126_s28 }
 0x487   : > { %p1502_p3 = scmp.lt.u32.totalorder %s1500_s29, %s1496_s5  ;;  %p1504_p13 = scmp.lt.u32.totalorder %s1496_s5, %s2028_s25 }
 0x488   : > { %p1498_p8 = pnand %p1497_p0, %p2127_p2 }
 0x489   : > { %p1503_p10 = por %p1502_p3, %p1501_p1 }
 0x48a   : > { %p1499_p9 = pneg %p1498_p8 }
 0x48b   : > { %p1505_p11 = por %p1504_p13, %p1503_p10 }
 0x48d   : > { %p1506_p12 = pnand %p1505_p11, %p1499_p9 }
 0x48f   : > { %1509 = shalt.err (!%p1506_p12)
}
 0x490   : > { %1098 = dma.vmem_to_hbm [thread:$0]  (%p2127_p2), %s2030_s18, 128, %s2028_s25, %s783_s2  }
 0x491 PF: > { %s809_s20 = sand.u32 1, %s1564_s30   ;;  %p2128_p4 = scmp.ne.s32.totalorder %s2111_s26, 0 }
 0x492   : > { %p2129_p6 = scmp.ge.s32.totalorder %s1584_s14, 2  ;;  %s810_s27 = scalar_lea.sflag [#allocation4], %s809_s20 }
 0x494   : > { %p1130_p5 = pnand %p2129_p6, %p2128_p4 }
 0x496   : > { %1559 = dma.done.wait (!%p1130_p5), %s810_s27, 128  }
 0x497   : > { %1561 = vsyncadd (!%p1130_p5), %s810_s27, 4294967168  ;;  %s31_s14 = sadd.s32 1, %s1584_s14   ;;  %s2130_s30 = smov %s1568_s10 }
 0x498   : > { %p28_p7 = scmp.ge.s32.totalorder %s31_s14, 4   ;;  %s2131_s10 = smov %s1572_s11 }
 0x499   : > { %s2132_s11 = smov %s1879_s12  ;;  %s2133_s12 = smov %s1580_s13 }
 0x49a   : > { %s2134_s13 = smov %s2136_s9  ;;  %30 = sbr.rel (!%p28_p7) target bundleno = 18 (0x12), region = 142 }
 0x4a1   :  { %815 = vsyncpa [#allocation3], 1 }
 0x4a2   :  { %817 = vsyncpa [#allocation3 + $0x1], 1 }
 0x4a3   :  { %818 = vsyncpa [#allocation6], 1 }
 0x4a4   :  { %820 = vsyncpa [#allocation6 + $0x1], 1 }
 0x4a5   :  { %821 = vsyncpa [#allocation9], 1 }
 0x4a6   :  { %822 = vsyncpa [#allocation12], 1 }
 0x4a7   :  { %823 = vsyncpa [#allocation15], 1 }
 0x4a8   :  { %824 = vsyncpa [#allocation4], 1 }
 0x4a9   :  { %826 = vsyncpa [#allocation4 + $0x1], 1 }

// kernel: gpt2_block.3
= control target key start
LH: loop header
LB: loop body
LE: loop exit
PB: predicated region body
PF: predicated region fallthrough
CT: control target
= control target key end

     0   :  { %s3015_s0 = inlined_call_operand.hbm [shape: f32[2,8,32], index: 0, kind: input, shape index: {}]   ;;  %s3016_s1 = inlined_call_operand.hbm [shape: f32[1,32], index: 1, kind: input, shape index: {}]   ;;  %s3017_s2 = inlined_call_operand.hbm [shape: bf16[32,96], index: 2, kind: input, shape index: {}]   ;;  %s3018_s3 = inlined_call_operand.hbm [shape: f32[1,96], index: 3, kind: input, shape index: {}]   ;;  %s3019_s4 = inlined_call_operand.hbm [shape: f32[8,8], index: 4, kind: input, shape index: {}]   ;;  %s3020_s5 = inlined_call_operand.hbm [shape: f32[8,8], index: 5, kind: input, shape index: {}]   ;;  %s3021_s6 = inlined_call_operand.hbm [shape: bf16[2,4,8,8], index: 6, kind: output, shape index: {0}]   ;;  %s3022_s7 = inlined_call_operand.hbm [shape: bf16[2,4,8,8], index: 7, kind: output, shape index: {1}]   ;;  %s3023_s8 = inlined_call_operand.hbm [shape: bf16[2,4,8,8], index: 8, kind: output, shape index: {2}]  }
   0x1   :  { %3034 = sst [smem:[#allocation23_spill]] %s3016_s1 }
   0x2   :  { %3035 = sst [smem:[#allocation24_spill]] %s3018_s3 }
   0x3   :  { %3036 = sst [smem:[#allocation25_spill]] %s3021_s6 }
   0x4   :  { %3037 = sst [smem:[#allocation26_spill]] %s3023_s8 }
   0x5   :  { %14 = vsyncpa [#allocation3], 0 }
   0x6   :  { %16 = vsyncpa [#allocation3 + $0x1], 0 }
   0x7   :  { %17 = vsyncpa [#allocation6], 0 }
   0x8   :  { %18 = vsyncpa [#allocation9], 0 }
   0x9   :  { %19 = vsyncpa [#allocation12], 0 }
   0xa   :  { %20 = vsyncpa [#allocation4], 0 }
   0xb   :  { %22 = vsyncpa [#allocation4 + $0x1], 0 }
   0xc   :  { %23 = vsyncpa [#allocation15], 0 }
   0xd   :  { %25 = vsyncpa [#allocation15 + $0x1], 0  ;;  %s2242_s27 = smov 0   ;;  %s2244_s28 = smov 0  }
   0xe   :  { %s2246_s29 = smov 0   ;;  %s2248_s30 = smov 0  }
   0xf   :  { %s2250_s9 = smov 0   ;;  %s2252_s10 = smov 0  }
  0x10 LB: > { %s2273_s11 = sadd.s32 4294967295, %s2172_s10   ;;  %p1652_p0 = scmp.ge.s32.totalorder %s2172_s10, 1  ;;  %s2172_s10 = sphi %s2252_s10, %s31_s10   ;;  %s2168_s9 = sphi %s2250_s9, %s3069_s9   ;;  %s2164_s30 = sphi %s2248_s30, %s3068_s30   ;;  %s2160_s29 = sphi %s2246_s29, %s3067_s29   ;;  %s2156_s28 = sphi %s2244_s28, %s3066_s28   ;;  %s2152_s27 = sphi %s2242_s27, %s3065_s27  }
  0x11   : > { %p3024_p1 = scmp.eq.s32.totalorder %s2273_s11, 0  ;;  %p275_p2 = scmp.lt.s32.totalorder %s2172_s10, 3 }
  0x12   : > { %s2174_s13 = smov [#allocation5]   ;;  %s2175_s15 = smov [#allocation8]  }
  0x13   : > { %p2278_p3 = pnand %p1652_p0, %p275_p2  ;;  %s288_s14 = sshll.u32 %s2174_s13, 4  ;;  %s289_s14 = int_to_ptr.vmem [resolvable:$true] %s288_s14 }
  0x14   : > { %s312_s16 = sshll.u32 %s2175_s15, 4  ;;  %s2176_s18 = smov [#allocation7]   ;;  %s2291_s16 = int_to_ptr.vmem [resolvable:$true] %s312_s16 }
  0x15   : > { %s3038_s12 = scalar_select %p2278_p3, 1, 0 }
  0x16   : > { %p1731_p5 = pneg %p2278_p3  ;;  %s298_s19 = sshll.u32 %s2176_s18, 4  ;;  %s2293_s19 = int_to_ptr.vmem [resolvable:$true] %s298_s19 }
  0x17   : > { %s3040_s1 = sld [smem:[#allocation23_spill]] }
  0x18   : > { %p2287_p6 = pnand %p1731_p5, %p3024_p1 }
  0x1a   : > { %p2303_p8 = pneg %p2287_p6 }
  0x1d   : > { %s1848_s22 = scalar_lea.hbm %s3040_s1, 16 }
  0x1e   : > { %p1849_p7 = scmp.ne.s32.totalorder %s3040_s1, %s1848_s22  ;;  %p1855_p11 = scmp.lt.u32.totalorder %s1848_s22, %s3040_s1 }
  0x20   : > { %p1851_p9 = pnand %p2303_p8, %p1849_p7 }
  0x22   : > { %p1852_p10 = pneg %p1851_p9 }
  0x24   : > { %p1857_p12 = pnand %p1855_p11, %p1852_p10 }
  0x26   : > { %1860 = shalt.err (!%p1857_p12)
}
  0x27   : > { %s1861_s15 = scalar_lea.vmem %s289_s14, 16  ;;  %s1868_s18 = scalar_lea.vmem %s289_s14, 32 }
  0x28   : > { %p1862_p13 = scmp.ne.s32.totalorder %s289_s14, %s1861_s15  ;;  %p1869_p5 = scmp.lt.s32.totalorder %s289_s14, %s289_s14 }
  0x29   : > { %p1870_p4 = scmp.lt.s32.totalorder %s1868_s18, %s1861_s15 }
  0x2a   : > { %p1864_p0 = pnand %p1862_p13, %p2303_p8 }
  0x2b   : > { %p1871_p1 = por %p1870_p4, %p1869_p5 }
  0x2c   : > { %p1865_p2 = pneg %p1864_p0 }
  0x2e   : > { %p1872_p3 = pnand %p1871_p1, %p1865_p2 }
  0x30   : > { %1875 = shalt.err (!%p1872_p3)
}
  0x31   : > { %1734 = dma.hbm_to_vmem [thread:$0]  (!%p2287_p6), %s3040_s1, 16, %s289_s14, [#allocation6]  }
  0x32   : > { %s3042_s3 = sld [smem:[#allocation24_spill]] }
  0x38   : > { %s1876_s24 = scalar_lea.hbm %s3042_s3, 16 }
  0x39   : > { %p1877_p7 = scmp.ne.s32.totalorder %s3042_s3, %s1876_s24  ;;  %p1883_p1 = scmp.lt.u32.totalorder %s1876_s24, %s3042_s3 }
  0x3b   : > { %p1879_p9 = pnand %p1877_p7, %p2303_p8 }
  0x3d   : > { %p1880_p4 = pneg %p1879_p9 }
  0x3f   : > { %p1885_p3 = pnand %p1883_p1, %p1880_p4 }
  0x41   : > { %1888 = shalt.err (!%p1885_p3)
}
  0x42   : > { %s1889_s14 = scalar_lea.vmem %s2291_s16, 16  ;;  %s1896_s20 = scalar_lea.vmem %s2291_s16, 32 }
  0x43   : > { %p1890_p10 = scmp.ne.s32.totalorder %s2291_s16, %s1889_s14  ;;  %p1897_p13 = scmp.lt.s32.totalorder %s2291_s16, %s2291_s16 }
  0x44   : > { %p1898_p0 = scmp.lt.s32.totalorder %s1896_s20, %s1889_s14 }
  0x45   : > { %p1892_p11 = pnand %p1890_p10, %p2303_p8 }
  0x46   : > { %p1899_p2 = por %p1898_p0, %p1897_p13 }
  0x47   : > { %p1893_p12 = pneg %p1892_p11 }
  0x49   : > { %p1900_p5 = pnand %p1899_p2, %p1893_p12 }
  0x4b   : > { %1903 = shalt.err (!%p1900_p5)
}
  0x4c   : > { %1740 = dma.hbm_to_vmem [thread:$0]  (!%p2287_p6), %s3042_s3, 16, %s2291_s16, [#allocation9]  }
  0x4d   : > { %s1904_s26 = scalar_lea.hbm %s3017_s2, 256 }
  0x4e   : > { %p1905_p7 = scmp.ne.s32.totalorder %s3017_s2, %s1904_s26  ;;  %p1911_p1 = scmp.lt.u32.totalorder %s1904_s26, %s3017_s2 }
  0x50   : > { %p1907_p9 = pnand %p1905_p7, %p2303_p8 }
  0x52   : > { %p1908_p4 = pneg %p1907_p9 }
  0x54   : > { %p1913_p3 = pnand %p1911_p1, %p1908_p4 }
  0x56   : > { %1916 = shalt.err (!%p1913_p3)
}
  0x57   : > { %s1917_s16 = scalar_lea.vmem %s2293_s19, 256  ;;  %p1925_p13 = scmp.lt.s32.totalorder %s2293_s19, %s2293_s19 }
  0x58   : > { %p1918_p10 = scmp.ne.s32.totalorder %s2293_s19, %s1917_s16  ;;  %p1926_p0 = scmp.lt.s32.totalorder %s1917_s16, %s1917_s16 }
  0x5a   : > { %p1920_p11 = pnand %p1918_p10, %p2303_p8  ;;  %p1927_p2 = por %p1926_p0, %p1925_p13 }
  0x5c   : > { %p1921_p12 = pneg %p1920_p11 }
  0x5e   : > { %p1928_p5 = pnand %p1927_p2, %p1921_p12 }
  0x60   : > { %1931 = shalt.err (!%p1928_p5)
}
  0x61   : > { %s2177_s20 = smov 64   ;;  %s2178_s21 = smov 4  }
  0x62   : > { %1737 = dma.hbm_to_vmem [thread:$0]  (!%p2287_p6), %s3017_s2, 256, %s2293_s19, [#allocation6], %s2177_s20, %s2177_s20, %s2178_s21  }
  0x63   : > { %s2179_s24 = smov [#allocation10]   ;;  %s2180_s13 = smov [#allocation11]  }
  0x64   : > { %s325_s26 = sshll.u32 %s2179_s24, 4  ;;  %s338_s15 = sshll.u32 %s2180_s13, 4  ;;  %s326_s26 = int_to_ptr.vmem [resolvable:$true] %s325_s26  ;;  %s339_s15 = int_to_ptr.vmem [resolvable:$true] %s338_s15 }
  0x65   : > { %s1932_s16 = scalar_lea.hbm %s3019_s4, 128 }
  0x66   : > { %p1933_p7 = scmp.ne.s32.totalorder %s3019_s4, %s1932_s16  ;;  %p1939_p1 = scmp.lt.u32.totalorder %s1932_s16, %s3019_s4 }
  0x68   : > { %p1935_p9 = pnand %p1933_p7, %p2303_p8 }
  0x6a   : > { %p1936_p4 = pneg %p1935_p9 }
  0x6c   : > { %p1941_p3 = pnand %p1939_p1, %p1936_p4 }
  0x6e   : > { %1944 = shalt.err (!%p1941_p3)
}
  0x6f   : > { %s1945_s19 = scalar_lea.vmem %s326_s26, 128  ;;  %p1953_p13 = scmp.lt.s32.totalorder %s326_s26, %s326_s26 }
  0x70   : > { %p1946_p10 = scmp.ne.s32.totalorder %s326_s26, %s1945_s19  ;;  %p1954_p0 = scmp.lt.s32.totalorder %s1945_s19, %s1945_s19 }
  0x72   : > { %p1948_p11 = pnand %p1946_p10, %p2303_p8  ;;  %p1955_p2 = por %p1954_p0, %p1953_p13 }
  0x74   : > { %p1949_p12 = pneg %p1948_p11 }
  0x76   : > { %p1956_p5 = pnand %p1955_p2, %p1949_p12 }
  0x78   : > { %1959 = shalt.err (!%p1956_p5)
}
  0x79   : > { %1743 = dma.hbm_to_vmem [thread:$0]  (!%p2287_p6), %s3019_s4, 128, %s326_s26, [#allocation9]  }
  0x7a   : > { %s1960_s20 = scalar_lea.hbm %s3020_s5, 128 }
  0x7b   : > { %p1961_p7 = scmp.ne.s32.totalorder %s3020_s5, %s1960_s20  ;;  %p1967_p1 = scmp.lt.u32.totalorder %s1960_s20, %s3020_s5 }
  0x7d   : > { %p1963_p9 = pnand %p1961_p7, %p2303_p8 }
  0x7f   : > { %p1964_p4 = pneg %p1963_p9 }
  0x81   : > { %p1969_p3 = pnand %p1967_p1, %p1964_p4 }
  0x83   : > { %1972 = shalt.err (!%p1969_p3)
}
  0x84   : > { %s1973_s13 = scalar_lea.vmem %s339_s15, 128  ;;  %p1981_p13 = scmp.lt.s32.totalorder %s339_s15, %s339_s15 }
  0x85   : > { %p1974_p10 = scmp.ne.s32.totalorder %s339_s15, %s1973_s13  ;;  %p1982_p0 = scmp.lt.s32.totalorder %s1973_s13, %s1973_s13 }
  0x87   : > { %p1976_p11 = pnand %p1974_p10, %p2303_p8  ;;  %p1983_p2 = por %p1982_p0, %p1981_p13 }
  0x89   : > { %p1977_p12 = pneg %p1976_p11 }
  0x8b   : > { %p1984_p5 = pnand %p1983_p2, %p1977_p12 }
  0x8d   : > { %1987 = shalt.err (!%p1984_p5)
}
  0x8e   : > { %1746 = dma.hbm_to_vmem [thread:$0]  (!%p2287_p6), %s3020_s5, 128, %s339_s15, [#allocation12]  }
  0x8f   : > { %s3029_s25 = sadd.s32 4294967294, %s2172_s10   ;;  %s43_s17 = sadd.s32 1, %s2168_s9 }
  0x90   : > { %s52_s14 = sadd.s32 1, %s2160_s29  ;;  %p45_p8 = scmp.ge.s32.totalorder %s43_s17, 2 }
  0x91   : > { %p59_p7 = scmp.ne.s32.totalorder %s2160_s29, %s2156_s28  ;;  %p60_p9 = scmp.eq.s32.totalorder %s2172_s10, 0 }
  0x92   : > { %p65_p4 = scmp.ne.s32.totalorder %s2156_s28, %s2152_s27  ;;  %s3071_s17 = smov (%p45_p8, %s43_s17), 0 }
  0x93   : > { %p2412_p1 = por %p60_p9, %p59_p7  ;;  %p3044_p3 = scmp.eq.s32.totalorder %s2273_s11, 0 }
  0x94   : > { %s47_s19 = ssub.s32 %s2168_s9, %s3071_s17  ;;  %p206_p10 = scmp.eq.s32.totalorder %s2273_s11, 1 }
  0x95   : > { %p2418_p6 = por %p3044_p3, %p65_p4  ;;  %p50_p11 = scmp.eq.s32.totalorder %s47_s19, 0 }
  0x96   : > { %p212_p12 = scmp.eq.s32.totalorder %s3029_s25, 1  ;;  %p2427_p13 = por %p206_p10, %p59_p7 }
  0x97   : > { %p1766_p0 = scmp.lt.s32.totalorder %s2172_s10, 2  ;;  %s349_s8 = sand.u32 1, %s2160_s29  }
  0x98   : > { %s3046_s1 = scalar_select %p2427_p13, 1, 0 }
  0x99   : > { %s2433_s3 = scalar_select %p50_p11, %s2160_s29, %s52_s14  }
  0x9a   : > { %p2435_p2 = por %p212_p12, %p65_p4  ;;  %s1659_s20 = sshll.u32 %s349_s8, 3 }
  0x9b   : > { %s1660_s21 = sshll.u32 %s2168_s9, 7  ;;  %s353_s13 = scalar_lea.vmem [#allocation2], %s1659_s20 }
  0x9c   : > { %s3047_s6 = scalar_select %p2435_p2, 1, 0 }
  0x9d   : > { %s2444_s24 = scalar_lea.hbm %s3015_s0, %s1660_s21  ;;  %s361_s26 = sshll.u32 %s353_s13, 4  ;;  %s2446_s26 = int_to_ptr.vmem [resolvable:$true] %s361_s26 }
  0x9e   : > { %p2450_p5 = pnand %p1766_p0, %p2412_p1  ;;  %s350_s14 = scalar_lea.sflag [#allocation3], %s349_s8 }
  0x9f   : > { %s1988_s19 = scalar_lea.hbm %s2444_s24, 128  ;;  %s1993_s22 = scalar_lea.hbm %s3015_s0, 256 }
  0xa0   : > { %p1989_p8 = scmp.ne.s32.totalorder %s2444_s24, %s1988_s19  ;;  %p1990_p7 = pneg %p2450_p5 }
  0xa1   : > { %p1994_p1 = scmp.lt.u32.totalorder %s2444_s24, %s3015_s0  ;;  %p1995_p3 = scmp.lt.u32.totalorder %s1993_s22, %s1988_s19 }
  0xa2   : > { %p1991_p9 = pnand %p1990_p7, %p1989_p8  ;;  %p1997_p11 = scmp.lt.u32.totalorder %s1988_s19, %s2444_s24 }
  0xa3   : > { %p1996_p10 = por %p1995_p3, %p1994_p1 }
  0xa4   : > { %p1992_p4 = pneg %p1991_p9 }
  0xa5   : > { %p1998_p12 = por %p1997_p11, %p1996_p10 }
  0xa7   : > { %p1999_p0 = pnand %p1998_p12, %p1992_p4 }
  0xa9   : > { %2002 = shalt.err (!%p1999_p0)
}
  0xaa   : > { %s2003_s8 = scalar_lea.vmem %s2446_s26, 128  ;;  %s2181_s13 = smov [#allocation2]  }
  0xab   : > { %p2004_p8 = scmp.ne.s32.totalorder %s2446_s26, %s2003_s8  ;;  %s2008_s20 = sshll.u32 %s2181_s13, 4  ;;  %s2009_s20 = int_to_ptr.vmem [resolvable:$false] %s2008_s20 }
  0xac   : > { %s2010_s21 = scalar_lea.vmem %s2009_s20, 256  ;;  %p2011_p13 = scmp.lt.s32.totalorder %s2446_s26, %s2009_s20 }
  0xad   : > { %p2006_p9 = pnand %p2004_p8, %p1990_p7  ;;  %p2012_p1 = scmp.lt.s32.totalorder %s2010_s21, %s2003_s8 }
  0xaf   : > { %p2007_p2 = pneg %p2006_p9  ;;  %p2013_p3 = por %p2012_p1, %p2011_p13 }
  0xb1   : > { %p2014_p10 = pnand %p2013_p3, %p2007_p2 }
  0xb3   : > { %2017 = shalt.err (!%p2014_p10)
}
  0xb4   : > { %1750 = dma.hbm_to_vmem [thread:$0]  (!%p2450_p5), %s2444_s24, 128, %s2446_s26, %s350_s14  }
  0xb5   : > { %p3049_p4 = scmp.ne.s32.totalorder %s3038_s12, 0 }
  0xb6   : > { %s2482_s19 = sand.u32 (!%p3049_p4), 1, %s2156_s28  }
  0xb7   : > { %370 = sbr.rel (%p3049_p4) target bundleno = 1079 (0x437), region = 44  ;;  %s1662_s22 = sshll.u32 (!%p3049_p4), %s2482_s19, 3 }
  0xb8   : > { %s373_s16 = scalar_lea.sflag (!%p3049_p4), [#allocation3], %s2482_s19  ;;  %s376_s23 = scalar_lea.vmem (!%p3049_p4), [#allocation2], %s1662_s22 }
  0xbe   : > { %2127 = dma.done.wait (%p2418_p6), %s373_s16, 128  }
  0xbf   : > { %2129 = vsyncadd (%p2418_p6), %s373_s16, 4294967168  ;;  %p3050_p13 = scmp.eq.s32.totalorder %s2273_s11, 0 }
  0xc1   : > { %2131 = dma.done.wait (%p3050_p13), [#allocation6], 272   ;;  %p3051_p2 = pmov %p3050_p13 }
  0xc3   : > { %2133 = vsyncadd (%p3051_p2), [#allocation6], 4294967024  ;;  %p3052_p5 = pmov %p3051_p2 }
  0xc4   : > { %p3053_p7 = pmov %p3051_p2 }
  0xc5   : > { %2135 = dma.done.wait (%p3052_p5), [#allocation9], 144  }
  0xc6   : > { %2137 = vsyncadd (%p3053_p7), [#allocation9], 4294967152  ;;  %p3054_p11 = pmov %p3051_p2 }
  0xc7   : > { %p3055_p12 = pmov %p3051_p2 }
  0xc8   : > { %2139 = dma.done.wait (%p3054_p11), [#allocation12], 128  }
  0xc9   : > { %2141 = vsyncadd (%p3055_p12), [#allocation12], 4294967168  ;;  %v440_v0 = vld [vmem:[%s376_s23] sm:$0xff]  ;;  %vm442_vm0 = vcmask 261120   ;;  %v1840_v3 = vld [vmem:[#allocation7] sm:$0xff]   ;;  %v2182_v4 = vmov 0.0   ;;  %v547_v27 = vlaneseq }
  0xca   : > { %v441_v1 = vmul.f32 %v440_v0, %v440_v0  ;;  %1695 = vmatprep.subr.bf16.mxu0 %v2182_v4  ;;  %vm2183_vm1 = vmmov 0   ;;  %v1841_v5 = vld [vmem:[#allocation7 + $0x8] sm:$0xff]   ;;  %v1671_v15 = vld [vmem:[#allocation5] ss:$0 sm:$0xff]  ;;  %v1672_v19 = vld [vmem:[#allocation8] ss:$0 sm:$0xff] }
  0xcb   : > { %1699 = vmatprep.mubr.msk.bf16.mxu0 %vm2183_vm1, %v2182_v4  ;;  %1696 = vmatpush3.bf16.msra.mxu0 %v1840_v3  ;;  %s2184_s12 = smov 112   ;;  %s2185_s15 = smov 120   ;;  %v2188_v25 = vmov 1983009808   ;;  %v2507_v29 = vshrl.u32 %v547_v27, 7  ;;  %vm992_vm4 = vcmask 31744  }
  0xcc   : > { %v443_v2 = vsel %vm442_vm0, %v441_v1, 0.0  ;;  %1697 = vmatprep.subr.bf16.mxu0 %v2182_v4  ;;  %s2186_s24 = smov 104   ;;  %s2187_s26 = smov 96   ;;  %v545_v26 = vunpack.c.l.s4 %v2188_v25  ;;  %v2189_v30 = vmov 1934713408   ;;  %vm1233_vm5 = vcmask 60416  }
  0xcd   : > { %444 = vadd.xlane.f32.xlu0 %v443_v2  ;;  %v577_v31 = vunpack.c.l.s4 %v2189_v30  ;;  %s3030_s18 = smov 64   ;;  %s3032_s14 = smov 4   ;;  %v2193_v2 = vmov 1966171168  }
  0xce   : > { %v546_v28 = vunpack.c.0.s8 %v545_v26  ;;  %s2192_s8 = smov 124   ;;  %v774_v3 = vunpack.c.l.s4 %v2193_v2  ;;  %v2589_v26 = vld [vmem:[#allocation11] sm:$0xff]  ;;  %s2693_s13 = sshll.u32 %s2482_s19, 4 }
  0xcf   : > { %1698 = vmatpush3.bf16.msra.mxu0 %v1841_v5  ;;  %v578_v36 = vunpack.c.0.s8 %v577_v31  ;;  %s2719_s20 = scalar_lea.vmem [#allocation16], %s2693_s13  ;;  %s1395_s21 = sand.u32 1, %s2273_s11  }
  0xd0   : > { %v2511_v34 = vsub.s32 %v546_v28, %v2507_v29  ;;  %s2837_s22 = sshll.u32 %s2164_s30, 8  ;;  %s431_s16 = scalar_lea.vmem [#allocation14], %s2693_s13 }
  0xd1   : > { %v2516_v42 = vsub.s32 %v578_v36, %v2507_v29  ;;  %s1432_s23 = sshll.u32 %s431_s16, 4  ;;  %s2845_s30 = scalar_lea.hbm %s3022_s7, %s2837_s22  ;;  %s2847_s23 = int_to_ptr.vmem [resolvable:$true] %s1432_s23 }
  0xd2   : > { %p3057_p0 = scmp.ne.s32.totalorder %s3046_s1, 0 }
 0x15a   : > { %v445_v6 = vpop.xlane.xlu0 %444 }
 0x15b   : > { %1844 = vrsqrt.f32 %v445_v6  ;;  %vm448_vm2 = vcmp.eq.f32.partialorder %v445_v6, inf  ;;  %v451_v9 = vand.u32 2147483648, %v445_v6  ;;  %vm450_vm3 = vcmp.eq.f32.partialorder %v445_v6, 0.0 }
 0x165   : > { %v1845_v7 = vpop.eup %1844 }
 0x166   : > { %v447_v8 = vmul.f32 %v1845_v7, %v445_v6 }
 0x168   : > { %v449_v10 = vsel %vm448_vm2, %v445_v6, %v447_v8  ;;  %v775_v6 = vunpack.c.0.s8 %v774_v3 }
 0x169   : > { %v452_v11 = vsel %vm450_vm3, %v451_v9, %v449_v10 }
 0x16a   : > { %v453_v12 = vmul.f32 0.17677669, %v452_v11  ;;  %v2580_v8 = vsub.s32 %v775_v6, %v2507_v29  ;;  %v2582_v11 = vld [vmem:[#allocation10] sm:$0xff] }
 0x16c   : > { %v455_v13 = vadd.f32 1e-05, %v453_v12  ;;  %v779_v12 = vrot.slane %v2582_v11, %v2580_v8 }
 0x16e   : > { %1846 = vrcp.f32 %v455_v13 }
 0x178   : > { %v1847_v14 = vpop.eup %1846 }
 0x179   : > { %v457_v16 = vmul.f32 %v1847_v14, %v440_v0 }
 0x17b   : > { %v464_v17 = vmul.f32 %v1671_v15, %v457_v16 }
 0x17d   : > { %v465_v18 = vpack.c.bf16 %v464_v17, %v464_v17 }
 0x17f   : > { %1700 = vmatmul.mubr.msk.bf16.vlgmr.msra.gmra.mrb[0].mxu0 %vm442_vm0, %v465_v18 }
 0x252   : > { %v526_v20 = vpop.f32.mrb[0].mxu0 }
 0x253   : > { %v527_v21 = vadd.f32 %v1672_v19, %v526_v20  ;;  %v1701_v22 = vpop.f32.mrb[1].mxu0  ;;  %v787_v19 = vcombine.high %v779_v12, %v779_v12 }
 0x254   : > { %v529_v23 = vpop.f32.mrb[2].mxu0 }
 0x255   : > { %536 = vrot.lane.b32.xlu1 %v527_v21, %s2184_s12  ;;  %533 = vrot.lane.b32.xlu0 %v527_v21, %s2185_s15  ;;  %v1702_v24 = vpop.f32.mrb[3].mxu0  ;;  %v809_v30 = vrot.slane %v787_v19, %v2580_v8  ;;  %s1449_s12 = sshll.u32 %s2719_s20, 4  ;;  %s2865_s12 = int_to_ptr.vmem [resolvable:$true] %s1449_s12 }
 0x259   : > { %539 = vrot.lane.b32.xlu1 %v527_v21, %s2186_s24  ;;  %s2872_s24 = scalar_lea.vmem [#allocation13], %s2693_s13  ;;  %s2194_s13 = smov [#allocation14]  }
 0x25d   : > { %610 = vrot.lane.b32.xlu1 %v527_v21, %s2187_s26 }
 0x2c7   : > { %v537_v32 = vpop.permute.xlu1 %536  ;;  %v534_v33 = vpop.permute.xlu0 %533 }
 0x2c8   : > { %692 = vrot.lane.b32.xlu0 %v534_v33, %s3030_s18  ;;  %612 = vrot.lane.b32.xlu1 %v534_v33, %s2187_s26  ;;  %v542_v35 = vcombine.low %v527_v21, %v537_v32  ;;  %v543_v40 = vcombine.high %v527_v21, %v537_v32 }
 0x2ca   : > { %v550_v41 = vrot.slane %v542_v35, %v2511_v34  ;;  %v557_v47 = vrot.slane %v543_v40, %v2511_v34 }
 0x2cb   : > { %v540_v37 = vpop.permute.xlu1 %539 }
 0x2cc   : > { %v558_v38 = vcombine.low %v534_v33, %v540_v37  ;;  %v559_v39 = vcombine.high %v534_v33, %v540_v37  ;;  %696 = vrot.lane.b32.xlu0 %v540_v37, %s3030_s18  ;;  %614 = vrot.lane.b32.xlu1 %v537_v32, %s2187_s26 }
 0x2ce   : > { %v566_v43 = vrot.slane %v558_v38, %v2511_v34  ;;  %v573_v44 = vrot.slane %v559_v39, %v2511_v34  ;;  %v830_v38 = vrot.slane %v2589_v26, %v2580_v8 }
 0x2cf   : > { %v611_v5 = vpop.permute.xlu1 %610 }
 0x2d0   : > { %v574_v45 = vcombine.low %v550_v41, %v566_v43  ;;  %v575_v46 = vcombine.high %v550_v41, %v566_v43  ;;  %616 = vrot.lane.b32.xlu1 %v540_v37, %s2187_s26  ;;  %v590_v50 = vcombine.low %v557_v47, %v573_v44  ;;  %v591_v55 = vcombine.high %v557_v47, %v573_v44  ;;  %s2885_s26 = scalar_lea.sflag [#allocation15], %s1395_s21 }
 0x2d1   : > { %v2612_v44 = vsub.s32 0, %v2507_v29 }
 0x2d2   : > { %v2522_v48 = vrot.slane %v574_v45, %v2516_v42  ;;  %v2525_v49 = vrot.slane %v575_v46, %v2516_v42  ;;  %v2535_v52 = vrot.slane %v590_v50, %v2516_v42  ;;  %v2557_v57 = vrot.slane %v591_v55, %v2516_v42 }
 0x2d3   : > { %v819_v45 = vcombine.high %v809_v30, %v809_v30  ;;  %v795_v46 = vrot.slane %v779_v12, %v2580_v8 }
 0x2d4   : > { %690 = vrot.lane.b32.xlu1 %v527_v21, %s3030_s18  ;;  %v2530_v51 = vcombine.high %v2522_v48, %v2182_v4  ;;  %v2540_v53 = vcombine.high %v2525_v49, %v2182_v4  ;;  %v2548_v54 = vcombine.high %v2535_v52, %v2182_v4  ;;  %v920_v59 = vsub.f32 0.0, %v2522_v48 }
 0x2d5   : > { %v2568_v61 = vcombine.high %v2557_v57, %v2182_v4  ;;  %v922_v62 = vsub.f32 0.0, %v2525_v49  ;;  %v924_v0 = vsub.f32 0.0, %v2535_v52  ;;  %v926_v1 = vsub.f32 0.0, %v2557_v57 }
 0x2d6   : > { %970 = vrot.lane.b32.xlu0 %v2530_v51, %s3032_s14  ;;  %v921_v56 = vsub.f32 0.0, %v2530_v51  ;;  %v923_v58 = vsub.f32 0.0, %v2540_v53  ;;  %v925_v60 = vsub.f32 0.0, %v2548_v54  ;;  %v2638_v6 = vrot.slane %v819_v45, %v2612_v44 }
 0x2d7   : > { %v927_v63 = vsub.f32 0.0, %v2568_v61  ;;  %v846_v45 = vrot.slane %v830_v38, %v2580_v8 }
 0x2d8   : > { %694 = vrot.lane.b32.xlu1 %v537_v32, %s3030_s18 }
 0x2da   : > { %974 = vrot.lane.b32.xlu0 %v2540_v53, %s3032_s14 }
 0x2dc   : > { %968 = vrot.lane.b32.xlu1 %v2522_v48, %s3032_s14 }
 0x2de   : > { %978 = vrot.lane.b32.xlu0 %v2548_v54, %s3032_s14 }
 0x2e0   : > { %972 = vrot.lane.b32.xlu1 %v2525_v49, %s3032_s14 }
 0x2e2   : > { %938 = vrot.lane.b32.xlu0 %v921_v56, %s2192_s8 }
 0x2e4   : > { %976 = vrot.lane.b32.xlu1 %v2535_v52, %s3032_s14 }
 0x2e6   : > { %942 = vrot.lane.b32.xlu0 %v923_v58, %s2192_s8 }
 0x2e8   : > { %936 = vrot.lane.b32.xlu1 %v920_v59, %s2192_s8 }
 0x2ea   : > { %946 = vrot.lane.b32.xlu0 %v925_v60, %s2192_s8 }
 0x2ec   : > { %940 = vrot.lane.b32.xlu1 %v922_v62, %s2192_s8  ;;  %v838_v62 = vcombine.high %v830_v38, %v830_v38 }
 0x2ee   : > { %950 = vrot.lane.b32.xlu0 %v927_v63, %s2192_s8 }
 0x2f0   : > { %944 = vrot.lane.b32.xlu1 %v924_v0, %s2192_s8 }
 0x2f4   : > { %948 = vrot.lane.b32.xlu1 %v926_v1, %s2192_s8 }
 0x33a   : > { %v613_v7 = vpop.permute.xlu1 %612  ;;  %v693_v9 = vpop.permute.xlu0 %692 }
 0x33e   : > { %v615_v10 = vpop.permute.xlu1 %614  ;;  %v697_v17 = vpop.permute.xlu0 %696 }
 0x33f   : > { %v622_v13 = vcombine.low %v611_v5, %v615_v10  ;;  %v623_v18 = vcombine.high %v611_v5, %v615_v10  ;;  %v718_v31 = vcombine.low %v693_v9, %v697_v17  ;;  %v719_v32 = vcombine.high %v693_v9, %v697_v17 }
 0x340   : > { %v2635_v5 = vrot.slane %v809_v30, %v2612_v44  ;;  %v817_v9 = vcombine.high %v795_v46, %v795_v46 }
 0x341   : > { %v630_v20 = vrot.slane %v622_v13, %v2511_v34  ;;  %v637_v27 = vrot.slane %v623_v18, %v2511_v34  ;;  %v726_v47 = vrot.slane %v718_v31, %v2511_v34  ;;  %v733_v50 = vrot.slane %v719_v32, %v2511_v34 }
 0x342   : > { %v617_v14 = vpop.permute.xlu1 %616 }
 0x343   : > { %v638_v15 = vcombine.low %v613_v7, %v617_v14  ;;  %v639_v16 = vcombine.high %v613_v7, %v617_v14  ;;  %v2641_v7 = vrot.slane %v795_v46, %v2612_v44 }
 0x345   : > { %v646_v21 = vrot.slane %v638_v15, %v2511_v34  ;;  %v653_v22 = vrot.slane %v639_v16, %v2511_v34  ;;  %v860_v16 = vrot.slane %v838_v62, %v2580_v8 }
 0x346   : > { %v691_v23 = vpop.permute.xlu1 %690 }
 0x347   : > { %v654_v24 = vcombine.low %v630_v20, %v646_v21  ;;  %v655_v25 = vcombine.high %v630_v20, %v646_v21  ;;  %v670_v35 = vcombine.low %v637_v27, %v653_v22  ;;  %v671_v58 = vcombine.high %v637_v27, %v653_v22 }
 0x348   : > { %v2592_v28 = vpop.permute.xlu0 %970  ;;  %v2664_v27 = vrot.slane %v817_v9, %v2612_v44  ;;  %v2705_v9 = vrot.slane %v846_v45, %v2612_v44 }
 0x349   : > { %v2596_v33 = vrot.slane %v654_v24, %v2516_v42  ;;  %v2599_v37 = vrot.slane %v655_v25, %v2516_v42  ;;  %v2628_v60 = vrot.slane %v670_v35, %v2516_v42  ;;  %v2657_v18 = vrot.slane %v671_v58, %v2516_v42 }
 0x34a   : > { %v695_v36 = vpop.permute.xlu1 %694  ;;  %v870_v25 = vcombine.high %v860_v16, %v860_v16 }
 0x34b   : > { %v702_v39 = vcombine.low %v691_v23, %v695_v36  ;;  %v703_v40 = vcombine.high %v691_v23, %v695_v36  ;;  %1113 = vrot.lane.b32.xlu1 %v2596_v33, %s3032_s14  ;;  %v2607_v41 = vcombine.high %v2596_v33, %v2182_v4  ;;  %v2625_v29 = vcombine.high %v2599_v37, %v2182_v4 }
 0x34c   : > { %v2609_v43 = vpop.permute.xlu0 %974  ;;  %v2654_v17 = vcombine.high %v2628_v60, %v2182_v4  ;;  %v913_v23 = vmul.f32 %v2635_v5, %v2530_v51  ;;  %v2673_v36 = vrot.slane %v860_v16, %v2612_v44  ;;  %v1065_v62 = vsub.f32 0.0, %v2596_v33 }
 0x34d   : > { %v710_v55 = vrot.slane %v702_v39, %v2511_v34  ;;  %v717_v56 = vrot.slane %v703_v40, %v2511_v34  ;;  %1115 = vrot.lane.b32.xlu0 %v2607_v41, %s3032_s14  ;;  %v2681_v40 = vcombine.high %v2657_v18, %v2182_v4  ;;  %v868_v4 = vcombine.high %v846_v45, %v846_v45 }
 0x34e   : > { %v2621_v59 = vpop.permute.xlu1 %968 }
 0x34f   : > { %v734_v63 = vcombine.low %v710_v55, %v726_v47  ;;  %v735_v0 = vcombine.high %v710_v55, %v726_v47  ;;  %v750_v1 = vcombine.low %v717_v56, %v733_v50  ;;  %v751_v2 = vcombine.high %v717_v56, %v733_v50  ;;  %1117 = vrot.lane.b32.xlu1 %v2599_v37, %s3032_s14 }
 0x350   : > { %v2632_v3 = vpop.permute.xlu0 %978  ;;  %v915_v56 = vmul.f32 %v2638_v6, %v2540_v53 }
 0x351   : > { %v742_v10 = vrot.slane %v734_v63, %v2516_v42  ;;  %v749_v12 = vrot.slane %v735_v0, %v2516_v42  ;;  %v758_v13 = vrot.slane %v750_v1, %v2516_v42  ;;  %v765_v14 = vrot.slane %v751_v2, %v2516_v42  ;;  %1119 = vrot.lane.b32.xlu0 %v2625_v29, %s3032_s14 }
 0x352   : > { %v2649_v15 = vpop.permute.xlu1 %972 }
 0x353   : > { %v1314_v19 = vcombine.low %v742_v10, %v749_v12  ;;  %v1676_v20 = vcombine.high %v742_v10, %v749_v12  ;;  %v1330_v21 = vcombine.low %v758_v13, %v765_v14  ;;  %v1677_v22 = vcombine.high %v758_v13, %v765_v14  ;;  %1121 = vrot.lane.b32.xlu1 %v2628_v60, %s3032_s14 }
 0x354   : > { %v939_v24 = vpop.permute.xlu0 %938  ;;  %v1066_v12 = vsub.f32 0.0, %v2607_v41 }
 0x355   : > { %v1321_v30 = vrot.slane %v1314_v19, %v2511_v34  ;;  %v1329_v31 = vrot.slane %v1676_v20, %v2511_v34  ;;  %v1337_v32 = vrot.slane %v1330_v21, %v2511_v34  ;;  %v1345_v35 = vrot.slane %v1677_v22, %v2511_v34  ;;  %1123 = vrot.lane.b32.xlu0 %v2654_v17, %s3032_s14 }
 0x356   : > { %v994_v51 = vsel %vm992_vm4, %v939_v24, %v2592_v28  ;;  %v2677_v39 = vpop.permute.xlu1 %976  ;;  %v2689_v28 = vrot.slane %v870_v25, %v2612_v44  ;;  %v1067_v22 = vsub.f32 0.0, %v2599_v37 }
 0x357   : > { %v1346_v46 = vcombine.low %v1321_v30, %v1329_v31  ;;  %v1347_v47 = vcombine.high %v1321_v30, %v1329_v31  ;;  %v1362_v50 = vcombine.low %v1337_v32, %v1345_v35  ;;  %v1363_v55 = vcombine.high %v1337_v32, %v1345_v35  ;;  %1125 = vrot.lane.b32.xlu1 %v2657_v18, %s3032_s14 }
 0x358   : > { %v943_v58 = vpop.permute.xlu0 %942  ;;  %v1042_v53 = vmul.f32 %v2673_v36, %v994_v51 }
 0x359   : > { %v1354_v38 = vrot.slane %v1346_v46, %v2516_v42  ;;  %v1361_v63 = vrot.slane %v1347_v47, %v2516_v42  ;;  %v1370_v0 = vrot.slane %v1362_v50, %v2516_v42  ;;  %v1377_v1 = vrot.slane %v1363_v55, %v2516_v42  ;;  %1127 = vrot.lane.b32.xlu0 %v2681_v40, %s3032_s14 }
 0x35a   : > { %v996_v2 = vsel %vm992_vm4, %v943_v58, %v2609_v43  ;;  %v937_v10 = vpop.permute.xlu1 %936  ;;  %v2713_v43 = vrot.slane %v868_v4, %v2612_v44  ;;  %v1050_v32 = vadd.f32 %v1042_v53, %v913_v23  ;;  %v1068_v23 = vsub.f32 0.0, %v2625_v29 }
 0x35b   : > { %v1378_v13 = vcombine.low %v1354_v38, %v1370_v0  ;;  %v1379_v14 = vcombine.high %v1354_v38, %v1370_v0  ;;  %v1380_v16 = vcombine.low %v1361_v63, %v1377_v1  ;;  %v1381_v19 = vcombine.high %v1361_v63, %v1377_v1  ;;  %1081 = vrot.lane.b32.xlu1 %v1065_v62, %s2192_s8 }
 0x35c   : > { %v1044_v20 = vmul.f32 %v2689_v28, %v996_v2  ;;  %v993_v21 = vsel %vm992_vm4, %v937_v10, %v2621_v59  ;;  %v912_v47 = vmul.f32 %v2641_v7, %v2522_v48  ;;  %v914_v50 = vmul.f32 %v2664_v27, %v2525_v49  ;;  %v2763_v2 = vpop.permute.xlu0 %946 }
 0x35d   : > { %v1382_v24 = vpack.c.bf16 %v1378_v13, %v1378_v13  ;;  %v1383_v25 = vpack.c.bf16 %v1379_v14, %v1379_v14  ;;  %v1384_v30 = vpack.c.bf16 %v1380_v16, %v1380_v16  ;;  %v1385_v31 = vpack.c.bf16 %v1381_v19, %v1381_v19  ;;  %1083 = vrot.lane.b32.xlu0 %v1066_v12, %s2192_s8 }
 0x35e   : > { %v1052_v35 = vadd.f32 %v1044_v20, %v915_v56  ;;  %v1041_v51 = vmul.f32 %v2705_v9, %v993_v21  ;;  %v941_v45 = vpop.permute.xlu1 %940  ;;  %v1069_v56 = vsub.f32 0.0, %v2628_v60  ;;  %v1071_v48 = vsub.f32 0.0, %v2657_v18 }
 0x35f   : > { %1386 = vst.msk [vmem:[%s2719_s20] sm:$0xf] %vm1233_vm5, %v1382_v24  ;;  %1387 = vst.msk [vmem:[%s2719_s20 + $0x4] sm:$0xf] %vm1233_vm5, %v1383_v25  ;;  %v995_v59 = vsel %vm992_vm4, %v941_v45, %v2649_v15  ;;  %1085 = vrot.lane.b32.xlu1 %v1067_v22, %s2192_s8  ;;  %v1070_v15 = vsub.f32 0.0, %v2654_v17  ;;  %v1072_v63 = vsub.f32 0.0, %v2681_v40  ;;  %v772_v20 = vcombine.high %v2582_v11, %v2582_v11 }
 0x360   : > { %1388 = vst.msk [vmem:[%s2719_s20 + $0x8] sm:$0xf] %vm1233_vm5, %v1384_v30  ;;  %1389 = vst.msk [vmem:[%s2719_s20 + $0xc] sm:$0xf] %vm1233_vm5, %v1385_v31  ;;  %v1169_v46 = vcombine.low %v1050_v32, %v1052_v35  ;;  %v1043_v55 = vmul.f32 %v2713_v43, %v995_v59  ;;  %v1049_v58 = vadd.f32 %v1041_v51, %v912_v47  ;;  %v2767_v12 = vpop.permute.xlu0 %950  ;;  %s3056_s20 = sld [smem:[#allocation26_spill]] }
 0x361   : > { %1087 = vrot.lane.b32.xlu0 %v1068_v23, %s2192_s8  ;;  %v823_v22 = vcombine.high %v2589_v26, %v2589_v26  ;;  %v786_v25 = vrot.slane %v772_v20, %v2580_v8 }
 0x362   : > { %v1051_v62 = vadd.f32 %v1043_v55, %v914_v50  ;;  %v2745_v38 = vrot.slane %v1169_v46, %v2511_v34  ;;  %v2761_v53 = vpop.permute.xlu1 %944 }
 0x363   : > { %1089 = vrot.lane.b32.xlu1 %v1069_v56, %s2192_s8  ;;  %v837_v31 = vrot.slane %v823_v22, %v2580_v8  ;;  %v788_v35 = vcombine.high %v786_v25, %v786_v25  ;;  %v802_v59 = vrot.slane %v786_v25, %v2580_v8 }
 0x364   : > { %v1161_v4 = vcombine.low %v1049_v58, %v1051_v62  ;;  %v1057_v58 = vmul.f32 %v2641_v7, %v2596_v33 }
 0x365   : > { %1091 = vrot.lane.b32.xlu0 %v1070_v15, %s2192_s8  ;;  %v839_v45 = vcombine.high %v837_v31, %v837_v31  ;;  %v816_v11 = vrot.slane %v788_v35, %v2580_v8  ;;  %v853_v26 = vrot.slane %v837_v31, %v2580_v8  ;;  %v818_v15 = vcombine.high %v802_v59, %v802_v59 }
 0x366   : > { %v2748_v49 = vrot.slane %v1161_v4, %v2511_v34  ;;  %v2765_v10 = vpop.permute.xlu1 %948  ;;  %s2863_s15 = scalar_lea.hbm %s3056_s20, %s2837_s22 }
 0x367   : > { %1093 = vrot.lane.b32.xlu1 %v1071_v48, %s2192_s8  ;;  %v867_v56 = vrot.slane %v839_v45, %v2580_v8  ;;  %v1059_v48 = vmul.f32 %v2664_v27, %v2599_v37  ;;  %v1060_v8 = vmul.f32 %v2638_v6, %v2625_v29  ;;  %v820_v7 = vcombine.high %v816_v11, %v816_v11 }
 0x368   : > { %v1193_v0 = vcombine.low %v2748_v49, %v2745_v38  ;;  %v1194_v1 = vcombine.high %v2748_v49, %v2745_v38  ;;  %v895_v37 = vrot.slane %v816_v11, %v2612_v44  ;;  %v891_v27 = vrot.slane %v802_v59, %v2612_v44 }
 0x369   : > { %1095 = vrot.lane.b32.xlu0 %v1072_v63, %s2192_s8  ;;  %v871_v25 = vcombine.high %v867_v56, %v867_v56  ;;  %v903_v45 = vrot.slane %v820_v7, %v2612_v44  ;;  %s2018_s8 = scalar_lea.vmem %s2847_s23, 256 }
 0x36a   : > { %p2019_p6 = scmp.ne.s32.totalorder %s2847_s23, %s2018_s8 }
 0x36b   : > { %980 = vrot.lane.b32.xlu1 %v2557_v57, %s3032_s14 }
 0x36c   : > { %p2020_p8 = pnand %p2019_p6, %p3057_p0 }
 0x36d   : > { %982 = vrot.lane.b32.xlu0 %v2568_v61, %s3032_s14 }
 0x36e   : > { %p2021_p9 = pneg %p2020_p8 }
 0x3bd   : > { %v1114_v13 = vpop.permute.xlu1 %1113 }
 0x3bf   : > { %v1116_v14 = vpop.permute.xlu0 %1115 }
 0x3c1   : > { %v1118_v16 = vpop.permute.xlu1 %1117 }
 0x3c3   : > { %v1120_v19 = vpop.permute.xlu0 %1119 }
 0x3c5   : > { %v1122_v21 = vpop.permute.xlu1 %1121 }
 0x3c7   : > { %v1124_v24 = vpop.permute.xlu0 %1123 }
 0x3c9   : > { %v1126_v30 = vpop.permute.xlu1 %1125 }
 0x3cb   : > { %v1128_v32 = vpop.permute.xlu0 %1127 }
 0x3cd   : > { %v1082_v51 = vpop.permute.xlu1 %1081 }
 0x3ce   : > { %v1137_v23 = vsel %vm992_vm4, %v1082_v51, %v1114_v13 }
 0x3cf   : > { %v1084_v46 = vpop.permute.xlu0 %1083  ;;  %v1145_v50 = vmul.f32 %v1137_v23, %v2705_v9  ;;  %v1058_v9 = vmul.f32 %v2635_v5, %v2607_v41  ;;  %v1024_v23 = vrot.slane %v867_v56, %v2612_v44 }
 0x3d0   : > { %v1138_v47 = vsel %vm992_vm4, %v1084_v46, %v1116_v14  ;;  %v869_v14 = vcombine.high %v853_v26, %v853_v26  ;;  %v1061_v46 = vmul.f32 %v891_v27, %v2628_v60 }
 0x3d1   : > { %v1086_v55 = vpop.permute.xlu1 %1085  ;;  %v1146_v4 = vmul.f32 %v1138_v47, %v2673_v36  ;;  %v997_v47 = vsel %vm992_vm4, %v2761_v53, %v2677_v39  ;;  %v1064_v39 = vmul.f32 %v903_v45, %v2681_v40 }
 0x3d2   : > { %v1139_v62 = vsel %vm992_vm4, %v1086_v55, %v1118_v16  ;;  %v1153_v16 = vadd.f32 %v1145_v50, %v1057_v58 }
 0x3d3   : > { %v1147_v63 = vmul.f32 %v1139_v62, %v2713_v43  ;;  %v1088_v13 = vpop.permute.xlu0 %1087  ;;  %v1020_v43 = vrot.slane %v853_v26, %v2612_v44  ;;  %v1154_v5 = vadd.f32 %v1146_v4, %v1058_v9  ;;  %v1062_v26 = vmul.f32 %v895_v37, %v2654_v17 }
 0x3d4   : > { %v1140_v33 = vsel %vm992_vm4, %v1088_v13, %v1120_v19  ;;  %v1028_v19 = vrot.slane %v869_v14, %v2612_v44 }
 0x3d5   : > { %v1155_v20 = vadd.f32 %v1147_v63, %v1059_v48  ;;  %v1148_v36 = vmul.f32 %v1140_v33, %v2689_v28  ;;  %v1090_v22 = vpop.permute.xlu1 %1089  ;;  %v899_v28 = vrot.slane %v818_v15, %v2612_v44  ;;  %v1045_v63 = vmul.f32 %v1020_v43, %v997_v47 }
 0x3d6   : > { %v1141_v41 = vsel %vm992_vm4, %v1090_v22, %v1122_v21  ;;  %v1032_v21 = vrot.slane %v871_v25, %v2612_v44  ;;  %v998_v44 = vsel %vm992_vm4, %v2763_v2, %v2632_v3  ;;  %v916_v3 = vmul.f32 %v891_v27, %v2535_v52 }
 0x3d7   : > { %v1238_v31 = vcombine.low %v1153_v16, %v1155_v20  ;;  %v1156_v29 = vadd.f32 %v1148_v36, %v1060_v8  ;;  %v1092_v6 = vpop.permute.xlu0 %1091  ;;  %v1149_v35 = vmul.f32 %v1141_v41, %v1020_v43  ;;  %v1046_v14 = vmul.f32 %v1024_v23, %v998_v44 }
 0x3d8   : > { %v1142_v51 = vsel %vm992_vm4, %v1092_v6, %v1124_v24  ;;  %v1063_v24 = vmul.f32 %v899_v28, %v2657_v18  ;;  %v918_v40 = vmul.f32 %v899_v28, %v2557_v57  ;;  %v917_v16 = vmul.f32 %v895_v37, %v2548_v54 }
 0x3d9   : > { %v1246_v59 = vcombine.low %v1154_v5, %v1156_v29  ;;  %v1094_v11 = vpop.permute.xlu1 %1093  ;;  %v1245_v55 = vrot.slane %v1238_v31, %v2511_v34  ;;  %v1150_v58 = vmul.f32 %v1142_v51, %v1024_v23  ;;  %v1157_v15 = vadd.f32 %v1149_v35, %v1061_v46 }
 0x3da   : > { %v1143_v50 = vsel %vm992_vm4, %v1094_v11, %v1126_v30  ;;  %v919_v36 = vmul.f32 %v903_v45, %v2568_v61  ;;  %v1054_v43 = vadd.f32 %v1046_v14, %v917_v16 }
 0x3db   : > { %v1253_v56 = vrot.slane %v1246_v59, %v2511_v34  ;;  %v1151_v62 = vmul.f32 %v1143_v50, %v1028_v19  ;;  %v1096_v60 = vpop.permute.xlu0 %1095  ;;  %v1158_v9 = vadd.f32 %v1150_v58, %v1062_v26  ;;  %v1208_v26 = vrot.slane %v1194_v1, %v2516_v42 }
 0x3dc   : > { %v1144_v17 = vsel %vm992_vm4, %v1096_v60, %v1128_v32 }
 0x3dd   : > { %v1270_v53 = vcombine.low %v1245_v55, %v1253_v56  ;;  %v1271_v18 = vcombine.high %v1245_v55, %v1253_v56  ;;  %v1159_v4 = vadd.f32 %v1151_v62, %v1063_v24  ;;  %v1152_v30 = vmul.f32 %v1144_v17, %v1032_v21  ;;  %v981_v48 = vpop.permute.xlu1 %980 }
 0x3de   : > { %v999_v13 = vsel %vm992_vm4, %v2765_v10, %v981_v48  ;;  %v1053_v10 = vadd.f32 %v1045_v63, %v916_v3 }
 0x3df   : > { %v1254_v8 = vcombine.low %v1157_v15, %v1159_v4  ;;  %v1160_v33 = vadd.f32 %v1152_v30, %v1064_v39  ;;  %v983_v7 = vpop.permute.xlu0 %982  ;;  %v1047_v2 = vmul.f32 %v1028_v19, %v999_v13  ;;  %v1278_v37 = vrot.slane %v1270_v53, %v2516_v42 }
 0x3e0   : > { %v1000_v32 = vsel %vm992_vm4, %v2767_v12, %v983_v7  ;;  %v1285_v61 = vrot.slane %v1271_v18, %v2516_v42 }
 0x3e1   : > { %v1262_v20 = vcombine.low %v1158_v9, %v1160_v33  ;;  %v1048_v22 = vmul.f32 %v1032_v21, %v1000_v32  ;;  %v1055_v25 = vadd.f32 %v1047_v2, %v918_v40  ;;  %v1261_v52 = vrot.slane %v1254_v8, %v2511_v34 }
 0x3e3   : > { %v1269_v57 = vrot.slane %v1262_v20, %v2511_v34  ;;  %v1056_v27 = vadd.f32 %v1048_v22, %v919_v36  ;;  %v1177_v41 = vcombine.low %v1053_v10, %v1055_v25 }
 0x3e5   : > { %v1286_v5 = vcombine.low %v1261_v52, %v1269_v57  ;;  %v1287_v12 = vcombine.high %v1261_v52, %v1269_v57  ;;  %v1185_v54 = vcombine.low %v1054_v43, %v1056_v27  ;;  %v1184_v19 = vrot.slane %v1177_v41, %v2511_v34 }
 0x3e7   : > { %v1294_v31 = vrot.slane %v1286_v5, %v2516_v42  ;;  %v1301_v29 = vrot.slane %v1287_v12, %v2516_v42  ;;  %v1192_v6 = vrot.slane %v1185_v54, %v2511_v34  ;;  %v1201_v34 = vrot.slane %v1193_v0, %v2516_v42 }
 0x3e9   : > { %v1302_v35 = vcombine.low %v1278_v37, %v1294_v31  ;;  %v1303_v51 = vcombine.high %v1278_v37, %v1294_v31  ;;  %v1304_v28 = vcombine.low %v1285_v61, %v1301_v29  ;;  %v1305_v45 = vcombine.high %v1285_v61, %v1301_v29 }
 0x3ea   : > { %v1209_v23 = vcombine.low %v1184_v19, %v1192_v6  ;;  %v1210_v59 = vcombine.high %v1184_v19, %v1192_v6 }
 0x3eb   : > { %v1306_v46 = vpack.c.bf16 %v1302_v35, %v1302_v35  ;;  %v1307_v11 = vpack.c.bf16 %v1303_v51, %v1303_v51  ;;  %v1308_v21 = vpack.c.bf16 %v1304_v28, %v1304_v28  ;;  %v1309_v47 = vpack.c.bf16 %v1305_v45, %v1305_v45 }
 0x3ec   : > { %v1217_v24 = vrot.slane %v1209_v23, %v2516_v42  ;;  %v1224_v50 = vrot.slane %v1210_v59, %v2516_v42 }
 0x3ed   : > { %1310 = vst.msk [vmem:[%s431_s16] sm:$0xf] %vm1233_vm5, %v1306_v46  ;;  %1311 = vst.msk [vmem:[%s431_s16 + $0x4] sm:$0xf] %vm1233_vm5, %v1307_v11 }
 0x3ee   : > { %1312 = vst.msk [vmem:[%s431_s16 + $0x8] sm:$0xf] %vm1233_vm5, %v1308_v21  ;;  %1313 = vst.msk [vmem:[%s431_s16 + $0xc] sm:$0xf] %vm1233_vm5, %v1309_v47  ;;  %v2875_v42 = vcombine.low %v1201_v34, %v1217_v24  ;;  %v2877_v38 = vcombine.high %v1201_v34, %v1217_v24  ;;  %v2879_v49 = vcombine.low %v1208_v26, %v1224_v50  ;;  %s2022_s16 = sshll.u32 %s2194_s13, 4  ;;  %s2023_s16 = int_to_ptr.vmem [resolvable:$false] %s2022_s16 }
 0x3ef   : > { %v2881_v0 = vcombine.high %v1208_v26, %v1224_v50  ;;  %s2024_s25 = scalar_lea.vmem %s2023_s16, 512  ;;  %p2025_p1 = scmp.lt.s32.totalorder %s2847_s23, %s2023_s16 }
 0x3f0   : > { %p2026_p3 = scmp.lt.s32.totalorder %s2024_s25, %s2018_s8 }
 0x3f2   : > { %p2027_p10 = por %p2026_p3, %p2025_p1 }
 0x3f4   : > { %p2028_p4 = pnand %p2027_p10, %p2021_p9 }
 0x3f6   : > { %2031 = shalt.err (!%p2028_p4)
}
 0x3f7   : > { %s2032_s11 = scalar_lea.hbm %s2845_s30, 256  ;;  %s2036_s13 = scalar_lea.hbm %s3022_s7, 512 }
 0x3f8   : > { %p2033_p13 = scmp.ne.s32.totalorder %s2845_s30, %s2032_s11  ;;  %p2037_p7 = scmp.lt.u32.totalorder %s2845_s30, %s3022_s7 }
 0x3f9   : > { %p2038_p11 = scmp.lt.u32.totalorder %s2036_s13, %s2032_s11  ;;  %p2040_p6 = scmp.lt.u32.totalorder %s2032_s11, %s2845_s30 }
 0x3fa   : > { %p2034_p2 = pnand %p2033_p13, %p3057_p0 }
 0x3fb   : > { %p2039_p12 = por %p2038_p11, %p2037_p7 }
 0x3fc   : > { %p2035_p5 = pneg %p2034_p2 }
 0x3fd   : > { %p2041_p8 = por %p2040_p6, %p2039_p12 }
 0x3ff   : > { %p2042_p9 = pnand %p2041_p8, %p2035_p5 }
 0x401   : > { %2045 = shalt.err (!%p2042_p9)
}
 0x402   : > { %s3058_s25 = smov 4   ;;  %s3059_s8 = smov 64  }
 0x403   : > { %1726 = dma.vmem_to_hbm [thread:$0]  (%p3057_p0), %s2847_s23, 256, %s2845_s30, %s2885_s26, %s3059_s8, %s3059_s8, %s3058_s25  }
 0x404   : > { %s2046_s18 = scalar_lea.vmem %s2865_s12, 256  ;;  %s2195_s14 = smov [#allocation16]  }
 0x405   : > { %p2047_p1 = scmp.ne.s32.totalorder %s2865_s12, %s2046_s18  ;;  %s2050_s11 = sshll.u32 %s2195_s14, 4  ;;  %s2051_s11 = int_to_ptr.vmem [resolvable:$false] %s2050_s11 }
 0x406   : > { %s2052_s21 = scalar_lea.vmem %s2051_s11, 512  ;;  %p2053_p4 = scmp.lt.s32.totalorder %s2865_s12, %s2051_s11 }
 0x407   : > { %p2048_p3 = pnand %p2047_p1, %p3057_p0  ;;  %p2054_p13 = scmp.lt.s32.totalorder %s2052_s21, %s2046_s18 }
 0x409   : > { %p2049_p10 = pneg %p2048_p3  ;;  %p2055_p2 = por %p2054_p13, %p2053_p4 }
 0x40b   : > { %p2056_p5 = pnand %p2055_p2, %p2049_p10 }
 0x40d   : > { %2059 = shalt.err (!%p2056_p5)
}
 0x40e   : > { %s2060_s23 = scalar_lea.hbm %s2863_s15, 256  ;;  %s2064_s16 = scalar_lea.hbm %s3056_s20, 512 }
 0x40f   : > { %p2061_p7 = scmp.ne.s32.totalorder %s2863_s15, %s2060_s23  ;;  %p2065_p6 = scmp.lt.u32.totalorder %s2863_s15, %s3056_s20 }
 0x410   : > { %p2066_p8 = scmp.lt.u32.totalorder %s2064_s16, %s2060_s23  ;;  %p2068_p1 = scmp.lt.u32.totalorder %s2060_s23, %s2863_s15 }
 0x411   : > { %p2062_p11 = pnand %p2061_p7, %p3057_p0 }
 0x412   : > { %p2067_p9 = por %p2066_p8, %p2065_p6 }
 0x413   : > { %p2063_p12 = pneg %p2062_p11 }
 0x414   : > { %p2069_p3 = por %p2068_p1, %p2067_p9 }
 0x416   : > { %p2070_p10 = pnand %p2069_p3, %p2063_p12 }
 0x418   : > { %2073 = shalt.err (!%p2070_p10)
}
 0x419   : > { %1727 = dma.vmem_to_hbm [thread:$0]  (%p3057_p0), %s2865_s12, 256, %s2863_s15, %s2885_s26, %s3059_s8, %s3059_s8, %s3058_s25   ;;  %v1229_v1 = vpack.c.bf16 %v2875_v42, %v2875_v42  ;;  %v1230_v55 = vpack.c.bf16 %v2877_v38, %v2877_v38  ;;  %v1231_v56 = vpack.c.bf16 %v2879_v49, %v2879_v49  ;;  %v1232_v58 = vpack.c.bf16 %v2881_v0, %v2881_v0 }
 0x41a   : > { %s3060_s23 = sld [smem:[#allocation25_spill]]  ;;  %s3061_s13 = sshll.u32 %s2872_s24, 4  ;;  %s2953_s13 = int_to_ptr.vmem [resolvable:$true] %s3061_s13 }
 0x41b   : > { %1234 = vst.msk [vmem:[%s2872_s24] sm:$0xf] %vm1233_vm5, %v1229_v1  ;;  %1235 = vst.msk [vmem:[%s2872_s24 + $0x4] sm:$0xf] %vm1233_vm5, %v1230_v55  ;;  %s1391_s12 = scalar_lea.sflag [#allocation4], %s2482_s19  ;;  %s2074_s15 = scalar_lea.vmem %s2953_s13, 256 }
 0x41c   : > { %1236 = vst.msk [vmem:[%s2872_s24 + $0x8] sm:$0xf] %vm1233_vm5, %v1231_v56  ;;  %1237 = vst.msk [vmem:[%s2872_s24 + $0xc] sm:$0xf] %vm1233_vm5, %v1232_v58  ;;  %p2075_p4 = scmp.ne.s32.totalorder %s2953_s13, %s2074_s15 }
 0x41e   : > { %p2076_p13 = pnand %p2075_p4, %p3057_p0 }
 0x420   : > { %s2949_s30 = scalar_lea.hbm %s3060_s23, %s2837_s22  ;;  %p2077_p2 = pneg %p2076_p13 }
 0x421   : > { %s2196_s22 = smov [#allocation13]  }
 0x422   : > { %s2078_s26 = sshll.u32 %s2196_s22, 4  ;;  %s2079_s26 = int_to_ptr.vmem [resolvable:$false] %s2078_s26 }
 0x423   : > { %s2080_s16 = scalar_lea.vmem %s2079_s26, 512  ;;  %p2081_p5 = scmp.lt.s32.totalorder %s2953_s13, %s2079_s26 }
 0x424   : > { %p2082_p7 = scmp.lt.s32.totalorder %s2080_s16, %s2074_s15 }
 0x426   : > { %p2083_p11 = por %p2082_p7, %p2081_p5 }
 0x428   : > { %p2084_p12 = pnand %p2083_p11, %p2077_p2 }
 0x42a   : > { %2087 = shalt.err (!%p2084_p12)
}
 0x42b   : > { %s2088_s24 = scalar_lea.hbm %s2949_s30, 256  ;;  %s2092_s18 = scalar_lea.hbm %s3060_s23, 512 }
 0x42c   : > { %p2089_p6 = scmp.ne.s32.totalorder %s2949_s30, %s2088_s24  ;;  %p2093_p1 = scmp.lt.u32.totalorder %s2949_s30, %s3060_s23 }
 0x42d   : > { %p2094_p3 = scmp.lt.u32.totalorder %s2092_s18, %s2088_s24  ;;  %p2096_p4 = scmp.lt.u32.totalorder %s2088_s24, %s2949_s30 }
 0x42e   : > { %p2090_p8 = pnand %p2089_p6, %p3057_p0 }
 0x42f   : > { %p2095_p10 = por %p2094_p3, %p2093_p1 }
 0x430   : > { %p2091_p9 = pneg %p2090_p8 }
 0x431   : > { %p2097_p13 = por %p2096_p4, %p2095_p10 }
 0x433   : > { %p2098_p2 = pnand %p2097_p13, %p2091_p9 }
 0x435   : > { %2101 = shalt.err (!%p2098_p2)
}
 0x436   : > { %1725 = dma.vmem_to_hbm [thread:$0]  (%p3057_p0), %s2953_s13, 256, %s2949_s30, %s1391_s12, %s3059_s8, %s3059_s8, %s3058_s25  }
 0x437 PF: > { %s1464_s15 = sand.u32 1, %s2152_s27   ;;  %p3062_p5 = scmp.ne.s32.totalorder %s3047_s6, 0 }
 0x438   : > { %p3063_p7 = scmp.ge.s32.totalorder %s2172_s10, 2  ;;  %s1465_s26 = scalar_lea.sflag [#allocation4], %s1464_s15 }
 0x43a   : > { %p1752_p11 = pnand %p3063_p7, %p3062_p5 }
 0x43c   : > { %2143 = dma.done.wait (!%p1752_p11), %s1465_s26, 256  }
 0x43d   : > { %2145 = vsyncadd (!%p1752_p11), %s1465_s26, 4294967040  ;;  %s3064_s1 = sadd.s32 4294967294, %s2172_s10  }
 0x43e   : > { %s1473_s16 = sand.u32 1, %s3064_s1  }
 0x43f   : > { %s1474_s24 = scalar_lea.sflag [#allocation15], %s1473_s16 }
 0x440   : > { %2147 = dma.done.wait (!%p1752_p11), %s1474_s24, 512  }
 0x441   : > { %2149 = vsyncadd (!%p1752_p11), %s1474_s24, 4294966784  ;;  %s31_s10 = sadd.s32 1, %s2172_s10   ;;  %s3065_s27 = smov %s2156_s28 }
 0x442   : > { %p28_p0 = scmp.ge.s32.totalorder %s31_s10, 4   ;;  %s3066_s28 = smov %s2160_s29 }
 0x443   : > { %s3067_s29 = smov %s2433_s3  ;;  %s3068_s30 = smov %s2168_s9 }
 0x444   : > { %s3069_s9 = smov %s3071_s17  ;;  %30 = sbr.rel (!%p28_p0) target bundleno = 16 (0x10), region = 143 }
 0x44b   :  { %1488 = vsyncpa [#allocation3], 1 }
 0x44c   :  { %1490 = vsyncpa [#allocation3 + $0x1], 1 }
 0x44d   :  { %1491 = vsyncpa [#allocation6], 1 }
 0x44e   :  { %1492 = vsyncpa [#allocation9], 1 }
 0x44f   :  { %1493 = vsyncpa [#allocation12], 1 }
 0x450   :  { %1494 = vsyncpa [#allocation4], 1 }
 0x451   :  { %1496 = vsyncpa [#allocation4 + $0x1], 1 }
 0x452   :  { %1497 = vsyncpa [#allocation15], 1 }
 0x453   :  { %1499 = vsyncpa [#allocation15 + $0x1], 1 }

// kernel: gpt2_block.4
= control target key start
LH: loop header
LB: loop body
LE: loop exit
PB: predicated region body
PF: predicated region fallthrough
CT: control target
= control target key end

     0   :  { %s2054_s0 = inlined_call_operand.hbm [shape: bf16[2,4,8,8], index: 0, kind: input, shape index: {}]   ;;  %s2055_s1 = inlined_call_operand.hbm [shape: bf16[2,4,8,8], index: 1, kind: input, shape index: {}]   ;;  %s2056_s2 = inlined_call_operand.hbm [shape: bf16[2,4,8,8], index: 2, kind: input, shape index: {}]   ;;  %s2057_s3 = inlined_call_operand.hbm [shape: bf16[2,8,32], index: 3, kind: output, shape index: {}]  }
   0x1   :  { %2067 = sst [smem:[#allocation18_spill]] %s2055_s1 }
   0x2   :  { %8 = vsyncpa [#allocation6], 0 }
   0x3   :  { %10 = vsyncpa [#allocation6 + $0x1], 0 }
   0x4   :  { %11 = vsyncpa [#allocation9], 0 }
   0x5   :  { %13 = vsyncpa [#allocation9 + $0x1], 0 }
   0x6   :  { %14 = vsyncpa [#allocation7], 0 }
   0x7   :  { %16 = vsyncpa [#allocation7 + $0x1], 0  ;;  %s1623_s12 = smov 0   ;;  %s1625_s13 = smov 0  }
   0x8   :  { %s1627_s14 = smov 0   ;;  %s1629_s15 = smov 0  }
   0x9   :  { %s1631_s16 = smov 0   ;;  %s1633_s17 = smov 0  }
   0xa LB: > { %2068 = sst [smem:[#allocation15_spill]] %s1582_s16  ;;  %s1654_s18 = sadd.s32 4294967295, %s1586_s17   ;;  %s1586_s17 = sphi %s1633_s17, %s22_s17   ;;  %s1582_s16 = sphi %s1631_s16, %s2091_s16   ;;  %s1578_s15 = sphi %s1629_s15, %s2090_s15   ;;  %s1574_s14 = sphi %s1627_s14, %s2094_s14   ;;  %s1570_s13 = sphi %s1625_s13, %s2093_s13   ;;  %s1566_s12 = sphi %s1623_s12, %s2092_s12  }
   0xb   : > { %s1203_s19 = sadd.s32 4294967294, %s1586_s17   ;;  %s41_s20 = sadd.s32 1, %s1582_s16 }
   0xc   : > { %s50_s21 = sadd.s32 1, %s1574_s14  ;;  %p43_p0 = scmp.ge.s32.totalorder %s41_s20, 2 }
   0xd   : > { %p57_p1 = scmp.ne.s32.totalorder %s1574_s14, %s1570_s13  ;;  %p58_p2 = scmp.eq.s32.totalorder %s1586_s17, 0 }
   0xe   : > { %p63_p3 = scmp.ne.s32.totalorder %s1570_s13, %s1566_s12  ;;  %s2096_s20 = smov (%p43_p0, %s41_s20), 0 }
   0xf   : > { %2069 = sst [smem:[#allocation16_spill]] %s2096_s20  ;;  %p1666_p4 = por %p58_p2, %p57_p1 }
  0x10   : > { %p64_p5 = scmp.eq.s32.totalorder %s1654_s18, 0  ;;  %s45_s23 = ssub.s32 %s1582_s16, %s2096_s20 }
  0x11   : > { %p145_p6 = scmp.eq.s32.totalorder %s1654_s18, 1  ;;  %p48_p7 = scmp.eq.s32.totalorder %s45_s23, 0 }
  0x12   : > { %p1674_p8 = por %p64_p5, %p63_p3  ;;  %p151_p10 = scmp.eq.s32.totalorder %s1203_s19, 1 }
  0x13   : > { %p1678_p9 = por %p145_p6, %p57_p1  ;;  %p1323_p13 = scmp.lt.s32.totalorder %s1586_s17, 2 }
  0x14   : > { %s2071_s24 = scalar_select %p1674_p8, 1, 0 }
  0x15   : > { %s2072_s25 = scalar_select %p1678_p9, 1, 0 }
  0x16   : > { %s1683_s26 = scalar_select %p48_p7, %s1574_s14, %s50_s21  }
  0x17   : > { %p1685_p11 = por %p151_p10, %p63_p3  ;;  %s2060_s28 = sand.u32 1, %s1574_s14  }
  0x18   : > { %2073 = sst [smem:[#allocation17_spill]] %s1683_s26  ;;  %s1694_s29 = sshll.u32 %s2060_s28, 4 }
  0x19   : > { %s2074_s27 = scalar_select %p1685_p11, 1, 0 }
  0x1a   : > { %s1697_s30 = sshll.u32 %s1582_s16, 8  ;;  %p1701_p0 = pnand %p1323_p13, %p1666_p4 }
  0x1b   : > { %s193_s5 = sand.u32 1, %s1586_s17   ;;  %s2076_s1 = sld [smem:[#allocation18_spill]] }
  0x1c   : > { %s197_s9 = scalar_lea.vmem [#allocation8], %s1694_s29  ;;  %s1717_s11 = scalar_lea.sflag [#allocation9], %s193_s5 }
  0x1d   : > { %s205_s10 = sshll.u32 %s197_s9, 4  ;;  %p1723_p4 = pneg %p1701_p0  ;;  %s1714_s10 = int_to_ptr.vmem [resolvable:$true] %s205_s10 }
  0x21   : > { %s1710_s8 = scalar_lea.hbm %s2076_s1, %s1697_s30  ;;  %s1415_s6 = scalar_lea.hbm %s2076_s1, 512 }
  0x22   : > { %s1410_s19 = scalar_lea.hbm %s1710_s8, 256  ;;  %p1416_p7 = scmp.lt.u32.totalorder %s1710_s8, %s2076_s1 }
  0x23   : > { %p1411_p3 = scmp.ne.s32.totalorder %s1710_s8, %s1410_s19  ;;  %p1417_p10 = scmp.lt.u32.totalorder %s1415_s6, %s1410_s19 }
  0x24   : > { %p1419_p12 = scmp.lt.u32.totalorder %s1410_s19, %s1710_s8 }
  0x25   : > { %p1413_p5 = pnand %p1723_p4, %p1411_p3  ;;  %p1418_p13 = por %p1417_p10, %p1416_p7 }
  0x27   : > { %p1414_p6 = pneg %p1413_p5  ;;  %p1420_p1 = por %p1419_p12, %p1418_p13 }
  0x29   : > { %p1421_p2 = pnand %p1420_p1, %p1414_p6 }
  0x2b   : > { %1424 = shalt.err (!%p1421_p2)
}
  0x2c   : > { %s1425_s5 = scalar_lea.vmem %s1714_s10, 256  ;;  %s1588_s22 = smov [#allocation8]  }
  0x2d   : > { %p1426_p3 = scmp.ne.s32.totalorder %s1714_s10, %s1425_s5  ;;  %s1430_s23 = sshll.u32 %s1588_s22, 4  ;;  %s1431_s23 = int_to_ptr.vmem [resolvable:$false] %s1430_s23 }
  0x2e   : > { %s1432_s7 = scalar_lea.vmem %s1431_s23, 512  ;;  %p1433_p9 = scmp.lt.s32.totalorder %s1714_s10, %s1431_s23 }
  0x2f   : > { %p1428_p5 = pnand %p1426_p3, %p1723_p4  ;;  %p1434_p8 = scmp.lt.s32.totalorder %s1432_s7, %s1425_s5 }
  0x31   : > { %p1429_p11 = pneg %p1428_p5  ;;  %p1435_p7 = por %p1434_p8, %p1433_p9 }
  0x33   : > { %p1436_p10 = pnand %p1435_p7, %p1429_p11 }
  0x35   : > { %1439 = shalt.err (!%p1436_p10)
}
  0x36   : > { %s2061_s19 = smov 64   ;;  %s2063_s6 = smov 4  }
  0x37   : > { %1315 = dma.hbm_to_vmem [thread:$0]  (!%p1701_p0), %s1710_s8, 256, %s1714_s10, %s1717_s11, %s2061_s19, %s2061_s19, %s2063_s6  }
  0x38   : > { %p2078_p8 = scmp.lt.s32.totalorder %s1586_s17, 3  ;;  %p2079_p9 = scmp.ge.s32.totalorder %s1586_s17, 1 }
  0x39   : > { %s1762_s23 = scalar_lea.hbm %s2054_s0, %s1697_s30  ;;  %s175_s7 = scalar_lea.vmem [#allocation5], %s1694_s29 }
  0x3a   : > { %p1754_p11 = pnand %p2079_p9, %p2078_p8  ;;  %s183_s28 = sshll.u32 %s175_s7, 4  ;;  %s1765_s28 = int_to_ptr.vmem [resolvable:$true] %s183_s28 }
  0x3b   : > { %s1771_s19 = scalar_lea.hbm %s2056_s2, %s1697_s30  ;;  %s2081_s6 = sand.u32 1, %s1574_s14  }
  0x3c   : > { %s2080_s9 = scalar_select %p1754_p11, 1, 0 }
  0x3d   : > { %s1775_s1 = scalar_lea.sflag [#allocation6], %s2081_s6  ;;  %s1440_s20 = scalar_lea.hbm %s1762_s23, 256 }
  0x3e   : > { %p1441_p12 = scmp.ne.s32.totalorder %s1762_s23, %s1440_s20  ;;  %s1445_s16 = scalar_lea.hbm %s2054_s0, 512 }
  0x3f   : > { %p1446_p6 = scmp.lt.u32.totalorder %s1762_s23, %s2054_s0  ;;  %p1447_p13 = scmp.lt.u32.totalorder %s1445_s16, %s1440_s20 }
  0x40   : > { %p1443_p1 = pnand %p1441_p12, %p1723_p4  ;;  %p1449_p5 = scmp.lt.u32.totalorder %s1440_s20, %s1762_s23 }
  0x41   : > { %p1448_p3 = por %p1447_p13, %p1446_p6 }
  0x42   : > { %p1444_p2 = pneg %p1443_p1 }
  0x43   : > { %p1450_p7 = por %p1449_p5, %p1448_p3 }
  0x45   : > { %p1451_p10 = pnand %p1450_p7, %p1444_p2 }
  0x47   : > { %1454 = shalt.err (!%p1451_p10)
}
  0x48   : > { %s1455_s30 = scalar_lea.vmem %s1765_s28, 256  ;;  %s1591_s6 = smov [#allocation5]  }
  0x49   : > { %p1456_p8 = scmp.ne.s32.totalorder %s1765_s28, %s1455_s30  ;;  %s1460_s8 = sshll.u32 %s1591_s6, 4  ;;  %s1461_s8 = int_to_ptr.vmem [resolvable:$false] %s1460_s8 }
  0x4a   : > { %s1462_s26 = scalar_lea.vmem %s1461_s8, 512  ;;  %p1463_p1 = scmp.lt.s32.totalorder %s1765_s28, %s1461_s8 }
  0x4b   : > { %p1458_p9 = pnand %p1456_p8, %p1723_p4  ;;  %p1464_p11 = scmp.lt.s32.totalorder %s1462_s26, %s1455_s30 }
  0x4d   : > { %p1459_p12 = pneg %p1458_p9  ;;  %p1465_p6 = por %p1464_p11, %p1463_p1 }
  0x4f   : > { %p1466_p13 = pnand %p1465_p6, %p1459_p12 }
  0x51   : > { %1469 = shalt.err (!%p1466_p13)
}
  0x52   : > { %s2082_s16 = smov 4   ;;  %s2083_s20 = smov 64  }
  0x53   : > { %1312 = dma.hbm_to_vmem [thread:$0]  (!%p1701_p0), %s1762_s23, 256, %s1765_s28, %s1775_s1, %s2083_s20, %s2083_s20, %s2082_s16  }
  0x54   : > { %s219_s10 = scalar_lea.vmem [#allocation10], %s1694_s29  ;;  %s1470_s22 = scalar_lea.hbm %s1771_s19, 256 }
  0x55   : > { %s227_s5 = sshll.u32 %s219_s10, 4  ;;  %p1471_p11 = scmp.ne.s32.totalorder %s1771_s19, %s1470_s22  ;;  %s1803_s5 = int_to_ptr.vmem [resolvable:$true] %s227_s5 }
  0x56   : > { %s1475_s6 = scalar_lea.hbm %s2056_s2, 512  ;;  %p1476_p5 = scmp.lt.u32.totalorder %s1771_s19, %s2056_s2 }
  0x57   : > { %p1473_p2 = pnand %p1471_p11, %p1723_p4  ;;  %p1477_p7 = scmp.lt.u32.totalorder %s1475_s6, %s1470_s22 }
  0x58   : > { %p1479_p8 = scmp.lt.u32.totalorder %s1470_s22, %s1771_s19 }
  0x59   : > { %p1474_p3 = pneg %p1473_p2  ;;  %p1478_p10 = por %p1477_p7, %p1476_p5 }
  0x5b   : > { %p1480_p9 = por %p1479_p8, %p1478_p10 }
  0x5d   : > { %p1481_p12 = pnand %p1480_p9, %p1474_p3 }
  0x5f   : > { %1484 = shalt.err (!%p1481_p12)
}
  0x60   : > { %s1485_s1 = scalar_lea.vmem %s1803_s5, 256  ;;  %s1592_s28 = smov [#allocation10]  }
  0x61   : > { %p1486_p1 = scmp.ne.s32.totalorder %s1803_s5, %s1485_s1  ;;  %s1490_s29 = sshll.u32 %s1592_s28, 4  ;;  %s1491_s29 = int_to_ptr.vmem [resolvable:$false] %s1490_s29 }
  0x62   : > { %s1492_s23 = scalar_lea.vmem %s1491_s29, 512  ;;  %p1493_p11 = scmp.lt.s32.totalorder %s1803_s5, %s1491_s29 }
  0x63   : > { %p1488_p6 = pnand %p1486_p1, %p1723_p4  ;;  %p1494_p2 = scmp.lt.s32.totalorder %s1492_s23, %s1485_s1 }
  0x65   : > { %p1489_p13 = pneg %p1488_p6  ;;  %p1495_p5 = por %p1494_p2, %p1493_p11 }
  0x67   : > { %p1496_p7 = pnand %p1495_p5, %p1489_p13 }
  0x69   : > { %1499 = shalt.err (!%p1496_p7)
}
  0x6a   : > { %1318 = dma.hbm_to_vmem [thread:$0]  (!%p1701_p0), %s1771_s19, 256, %s1803_s5, %s1717_s11, %s2083_s20, %s2083_s20, %s2082_s16  }
  0x6b   : > { %p2084_p4 = scmp.ne.s32.totalorder %s2080_s9, 0 }
  0x6c   : > { %s1833_s21 = sand.u32 (!%p2084_p4), 1, %s1570_s13   ;;  %p2085_p3 = scmp.ne.s32.totalorder (!%p2084_p4), %s2071_s24, 0 }
  0x6d   : > { %239 = sbr.rel (%p2084_p4) target bundleno = 1093 (0x445), region = 32  ;;  %s1836_s10 = sshll.u32 (!%p2084_p4), %s1833_s21, 4 }
  0x6e   : > { %s242_s4 = scalar_lea.sflag (!%p2084_p4), [#allocation6], %s1833_s21  ;;  %s1840_s22 = scalar_lea.vmem (!%p2084_p4), [#allocation5], %s1836_s10 }
  0x74   : > { %1553 = dma.done.wait (%p2085_p3), %s242_s4, 256  }
  0x75   : > { %1555 = vsyncadd (%p2085_p3), %s242_s4, 4294967040  ;;  %s250_s11 = sand.u32 1, %s1654_s18   ;;  %s254_s9 = scalar_lea.vmem [#allocation8], %s1836_s10 }
  0x76   : > { %s251_s19 = scalar_lea.sflag [#allocation9], %s250_s11 }
  0x77   : > { %1557 = dma.done.wait (%p2085_p3), %s251_s19, 512  }
  0x78   : > { %1559 = vsyncadd (%p2085_p3), %s251_s19, 4294966784  ;;  %vm310_vm0 = vcmask 64512   ;;  %v1593_v0 = vmov 0.0   ;;  %vm1594_vm1 = vmmov 0   ;;  %v326_v1 = vld [vmem:[%s254_s9] sm:$0xf]  ;;  %v523_v14 = vlaneseq }
  0x79   : > { %1253 = vmatprep.subr.bf16.mxu0 %v1593_v0  ;;  %311 = vst.msk [vmem:[#allocation4] sm:$0xff] %vm310_vm0, %v1593_v0  ;;  %312 = vst.msk [vmem:[#allocation4 + $0x8] sm:$0xff] %vm310_vm0, %v1593_v0  ;;  %1259 = vmatprep.subr.bf16.mxu1 %v1593_v0  ;;  %v327_v2 = vld [vmem:[%s254_s9 + $0x4] sm:$0xf]  ;;  %v339_v3 = vsel %vm310_vm0, %v326_v1, 0  ;;  %vm301_vm2 = vcmask 7168  }
  0x7a   : > { %313 = vst.msk [vmem:[#allocation4 + $0x10] sm:$0xff] %vm310_vm0, %v1593_v0  ;;  %314 = vst.msk [vmem:[#allocation4 + $0x18] sm:$0xff] %vm310_vm0, %v1593_v0  ;;  %1255 = vmatprep.mubr.msk.bf16.mxu0 %vm1594_vm1, %v1593_v0  ;;  %1261 = vmatprep.mubr.msk.bf16.mxu1 %vm1594_vm1, %v1593_v0  ;;  %v385_v4 = vsel %vm310_vm0, %v327_v2, 0  ;;  %v328_v5 = vld [vmem:[%s254_s9 + $0x8] sm:$0xf]  ;;  %v1902_v15 = vshrl.u32 %v523_v14, 7 }
  0x7b   : > { %1254 = vmatpush3.bf16.xpose.msra.mxu0 %v339_v3  ;;  %1260 = vmatpush3.bf16.xpose.msra.mxu1 %v385_v4  ;;  %v329_v6 = vld [vmem:[%s254_s9 + $0xc] sm:$0xf]  ;;  %v322_v7 = vld [vmem:[%s1840_s22] sm:$0xf]  ;;  %v323_v8 = vld [vmem:[%s1840_s22 + $0x4] sm:$0xf] }
  0x7c   : > { %1265 = vmatprep.subr.bf16.mxu0 %v1593_v0  ;;  %1271 = vmatprep.subr.bf16.mxu1 %v1593_v0  ;;  %v431_v9 = vsel %vm310_vm0, %v328_v5, 0  ;;  %v477_v10 = vsel %vm310_vm0, %v329_v6, 0  ;;  %v324_v11 = vld [vmem:[%s1840_s22 + $0x8] sm:$0xf]  ;;  %v325_v12 = vld [vmem:[%s1840_s22 + $0xc] sm:$0xf] }
  0x7d   : > { %v1595_v13 = vmov -1e+30   ;;  %306 = vst.msk [vmem:[#allocation3] sm:$0xff] %vm301_vm2, %v1593_v0  ;;  %307 = vst.msk [vmem:[#allocation3 + $0x8] sm:$0xff] %vm301_vm2, %v1593_v0  ;;  %v528_v16 = vand.u32 127, %v523_v14  ;;  %v1596_v45 = vmov 0  }
  0x7e   : > { %302 = vst.msk [vmem:[#allocation2] sm:$0xff] %vm301_vm2, %v1595_v13  ;;  %303 = vst.msk [vmem:[#allocation2 + $0x8] sm:$0xff] %vm301_vm2, %v1595_v13  ;;  %1384 = vset.pattern.permute.xlu0 %v1596_v45  ;;  %1385 = vset.pattern.permute.xlu1 %v1596_v45  ;;  %s263_s18 = scalar_lea.vmem [#allocation10], %s1836_s10  ;;  %vm638_vm4 = vcmask 1043456   ;;  %s1599_s24 = smov 16   ;;  %vm1049_vm5 = vcmask 130048  }
  0x7f   : > { %304 = vst.msk [vmem:[#allocation2 + $0x10] sm:$0xff] %vm301_vm2, %v1595_v13  ;;  %305 = vst.msk [vmem:[#allocation2 + $0x18] sm:$0xff] %vm301_vm2, %v1595_v13  ;;  %vm531_vm3 = vcmp.ge.s32.totalorder %v1902_v15, %v528_v16  ;;  %v330_v62 = vld [vmem:[%s263_s18] sm:$0xf]  ;;  %v331_v1 = vld [vmem:[%s263_s18 + $0x4] sm:$0xf] }
  0x80   : > { %308 = vst.msk [vmem:[#allocation3 + $0x10] sm:$0xff] %vm301_vm2, %v1593_v0  ;;  %309 = vst.msk [vmem:[#allocation3 + $0x18] sm:$0xff] %vm301_vm2, %v1593_v0  ;;  %v640_v63 = vsel %vm638_vm4, %v330_v62, 0  ;;  %v686_v2 = vsel %vm638_vm4, %v331_v1, 0  ;;  %v332_v3 = vld [vmem:[%s263_s18 + $0x8] sm:$0xf] }
  0x81   : > { %v732_v4 = vsel %vm638_vm4, %v332_v3, 0  ;;  %v333_v5 = vld [vmem:[%s263_s18 + $0xc] sm:$0xf]  ;;  %s1600_s16 = smov 8   ;;  %s1601_s20 = smov 24   ;;  %vm1051_vm6 = vcmask 195584  }
  0x82   : > { %1256 = vmatmul.mubr.msk.bf16.vlgmr.msra.gmra.mrb[0].mxu0 %vm310_vm0, %v322_v7  ;;  %1262 = vmatmul.mubr.msk.bf16.vlgmr.msra.gmra.mrb[0].mxu1 %vm310_vm0, %v323_v8  ;;  %v778_v6 = vsel %vm638_vm4, %v333_v5, 0  ;;  %v821_v3 = vld [vmem:[#allocation4 + $0x8] sm:$0xff]  ;;  %s1219_s5 = sshll.u32 %s1833_s21, 2  ;;  %s1231_s7 = sshll.u32 %s1578_s15, 6  ;;  %vm1054_vm7 = vcmask 257024  }
  0x83   : > { %1266 = vmatpush3.bf16.xpose.msra.mxu0 %v431_v9  ;;  %1272 = vmatpush3.bf16.xpose.msra.mxu1 %v477_v10  ;;  %s295_s30 = scalar_lea.vmem [#allocation11], %s1219_s5  ;;  %s2005_s1 = scalar_lea.hbm %s2057_s3, %s1231_s7 }
  0x84   : > { %1267 = vmatprep.mubr.msk.bf16.mxu0 %vm1594_vm1, %v1593_v0  ;;  %1273 = vmatprep.mubr.msk.bf16.mxu1 %vm1594_vm1, %v1593_v0  ;;  %s1071_s6 = sshll.u32 %s295_s30, 4  ;;  %s1057_s28 = scalar_lea.sflag [#allocation7], %s1833_s21  ;;  %s2007_s6 = int_to_ptr.vmem [resolvable:$true] %s1071_s6 }
  0x85   : > { %1277 = vmatprep.subr.bf16.mxu0 %v1593_v0  ;;  %1283 = vmatprep.subr.bf16.mxu1 %v1593_v0  ;;  %v1923_v46 = vld [vmem:[#allocation2] sm:$0xff]  ;;  %v1928_v49 = vld [vmem:[#allocation2 + $0x8] sm:$0xff]  ;;  %s1500_s15 = scalar_lea.vmem %s2007_s6, 64  ;;  %p2086_p10 = scmp.ne.s32.totalorder %s2072_s25, 0 }
  0x86   : > { %v1938_v53 = vld [vmem:[#allocation2 + $0x10] sm:$0xff]  ;;  %v1948_v57 = vld [vmem:[#allocation2 + $0x18] sm:$0xff]  ;;  %p1501_p0 = scmp.ne.s32.totalorder %s2007_s6, %s1500_s15  ;;  %s1602_s29 = smov [#allocation11]  }
  0x87   : > { %s1504_s23 = sshll.u32 %s1602_s29, 4  ;;  %s1505_s23 = int_to_ptr.vmem [resolvable:$false] %s1504_s23 }
  0x88   : > { %p1502_p8 = pnand %p1501_p0, %p2086_p10  ;;  %s1506_s10 = scalar_lea.vmem %s1505_s23, 128 }
  0x89   : > { %p1507_p12 = scmp.lt.s32.totalorder %s2007_s6, %s1505_s23  ;;  %p1508_p1 = scmp.lt.s32.totalorder %s1506_s10, %s1500_s15 }
  0x8a   : > { %1268 = vmatmul.mubr.msk.bf16.vlgmr.msra.gmra.mrb[4].mxu0 %vm310_vm0, %v324_v11  ;;  %1274 = vmatmul.mubr.msk.bf16.vlgmr.msra.gmra.mrb[4].mxu1 %vm310_vm0, %v325_v12  ;;  %p1503_p9 = pneg %p1502_p8 }
  0x8b   : > { %1279 = vmatprep.mubr.msk.bf16.mxu0 %vm1594_vm1, %v1593_v0  ;;  %1285 = vmatprep.mubr.msk.bf16.mxu1 %vm1594_vm1, %v1593_v0  ;;  %p1509_p6 = por %p1508_p1, %p1507_p12 }
  0x8c   : > { %1278 = vmatpush3.bf16.msra.mxu0 %v640_v63  ;;  %1284 = vmatpush3.bf16.msra.mxu1 %v686_v2  ;;  %v820_v63 = vld [vmem:[#allocation4] sm:$0xff] }
  0x8d   : > { %1289 = vmatprep.subr.bf16.mxu0 %v1593_v0  ;;  %1295 = vmatprep.subr.bf16.mxu1 %v1593_v0  ;;  %p1510_p13 = pnand %p1509_p6, %p1503_p9 }
 0x155   : > { %v375_v17 = vpop.f32.mrb[0].mxu0  ;;  %v421_v18 = vpop.f32.mrb[0].mxu1 }
 0x156   : > { %v519_v19 = vmul.f32 0.35355338, %v375_v17  ;;  %v1257_v20 = vpop.f32.mrb[1].mxu0  ;;  %v520_v21 = vmul.f32 0.35355338, %v421_v18  ;;  %v1263_v22 = vpop.f32.mrb[1].mxu1 }
 0x157   : > { %v378_v23 = vpop.f32.mrb[2].mxu0  ;;  %v424_v24 = vpop.f32.mrb[2].mxu1 }
 0x158   : > { %v1258_v25 = vpop.f32.mrb[3].mxu0  ;;  %v1264_v26 = vpop.f32.mrb[3].mxu1  ;;  %v1907_v27 = vsel %vm531_vm3, %v519_v19, -1e+30  ;;  %v1911_v28 = vsel %vm531_vm3, %v520_v21, -1e+30 }
 0x159   : > { %v542_v29 = vsel %vm310_vm0, %v1907_v27, -inf  ;;  %v545_v30 = vsel %vm310_vm0, %v1911_v28, -inf }
 0x15a   : > { %543 = vmax.xlane.f32.xlu0 %v542_v29 }
 0x15d   : > { %v467_v31 = vpop.f32.mrb[4].mxu0  ;;  %v513_v32 = vpop.f32.mrb[4].mxu1 }
 0x15e   : > { %v521_v33 = vmul.f32 0.35355338, %v467_v31  ;;  %546 = vmax.xlane.f32.xlu0 %v545_v30  ;;  %v1269_v34 = vpop.f32.mrb[5].mxu0  ;;  %v522_v35 = vmul.f32 0.35355338, %v513_v32  ;;  %v1275_v36 = vpop.f32.mrb[5].mxu1 }
 0x15f   : > { %v470_v37 = vpop.f32.mrb[6].mxu0  ;;  %v516_v38 = vpop.f32.mrb[6].mxu1 }
 0x160   : > { %v1270_v39 = vpop.f32.mrb[7].mxu0  ;;  %v1276_v40 = vpop.f32.mrb[7].mxu1  ;;  %v536_v41 = vsel %vm531_vm3, %v521_v33, -1e+30  ;;  %v537_v42 = vsel %vm531_vm3, %v522_v35, -1e+30 }
 0x161   : > { %v548_v43 = vsel %vm310_vm0, %v536_v41, -inf  ;;  %v551_v44 = vsel %vm310_vm0, %v537_v42, -inf  ;;  %v602_v39 = vld [vmem:[#allocation3] sm:$0xff] }
 0x162   : > { %549 = vmax.xlane.f32.xlu1 %v548_v43 }
 0x166   : > { %552 = vmax.xlane.f32.xlu1 %v551_v44 }
 0x1e7   : > { %v544_v47 = vpop.xlane.xlu0 %543 }
 0x1e8   : > { %v1926_v48 = vmax.f32 %v1923_v46, %v544_v47 }
 0x1ea   : > { %v558_v50 = vsub.f32 %v1923_v46, %v1926_v48  ;;  %856 = vst.msk [vmem:[#allocation2] sm:$0xff] %vm301_vm2, %v1926_v48  ;;  %572 = vperm.xlu0 %1384, %v1926_v48   ;;  %v604_v46 = vld [vmem:[#allocation3 + $0x10] sm:$0xff] }
 0x1eb   : > { %v547_v51 = vpop.xlane.xlu0 %546 }
 0x1ec   : > { %v1936_v52 = vmax.f32 %v1928_v49, %v547_v51 }
 0x1ee   : > { %v559_v54 = vsub.f32 %v1928_v49, %v1936_v52  ;;  %857 = vst.msk [vmem:[#allocation2 + $0x8] sm:$0xff] %vm301_vm2, %v1936_v52  ;;  %577 = vperm.xlu1 %1385, %v1936_v52  }
 0x1ef   : > { %v550_v55 = vpop.xlane.xlu1 %549 }
 0x1f0   : > { %v1946_v56 = vmax.f32 %v1938_v53, %v550_v55  ;;  %v564_v30 = vmul.f32 1.442695, %v559_v54 }
 0x1f2   : > { %v560_v58 = vsub.f32 %v1938_v53, %v1946_v56  ;;  %858 = vst.msk [vmem:[#allocation2 + $0x10] sm:$0xff] %vm301_vm2, %v1946_v56  ;;  %582 = vperm.xlu1 %1385, %v1946_v56  }
 0x1f3   : > { %v553_v59 = vpop.xlane.xlu1 %552 }
 0x1f4   : > { %v1956_v60 = vmax.f32 %v1948_v57, %v553_v59  ;;  %v566_v33 = vmul.f32 1.442695, %v560_v58 }
 0x1f6   : > { %v561_v61 = vsub.f32 %v1948_v57, %v1956_v60  ;;  %859 = vst.msk [vmem:[#allocation2 + $0x18] sm:$0xff] %vm301_vm2, %v1956_v60  ;;  %587 = vperm.xlu1 %1385, %v1956_v60  }
 0x1f8   : > { %v568_v34 = vmul.f32 1.442695, %v561_v61 }
 0x269   : > { %v573_v7 = vpop.permute.xlu0 %572 }
 0x26a   : > { %v590_v8 = vsub.f32 %v1907_v27, %v573_v7 }
 0x26c   : > { %v594_v9 = vmul.f32 1.442695, %v590_v8 }
 0x26d   : > { %v578_v10 = vpop.permute.xlu1 %577 }
 0x26e   : > { %1386 = vpow2.f32 %v594_v9  ;;  %v591_v11 = vsub.f32 %v1911_v28, %v578_v10 }
 0x270   : > { %v596_v12 = vmul.f32 1.442695, %v591_v11 }
 0x271   : > { %v583_v13 = vpop.permute.xlu1 %582 }
 0x272   : > { %1388 = vpow2.f32 %v596_v12  ;;  %v592_v14 = vsub.f32 %v536_v41, %v583_v13  ;;  %v822_v12 = vld [vmem:[#allocation4 + $0x10] sm:$0xff] }
 0x274   : > { %v598_v16 = vmul.f32 1.442695, %v592_v14 }
 0x275   : > { %v588_v17 = vpop.permute.xlu1 %587 }
 0x276   : > { %1390 = vpow2.f32 %v598_v16  ;;  %v593_v18 = vsub.f32 %v537_v42, %v588_v17  ;;  %v603_v42 = vld [vmem:[#allocation3 + $0x8] sm:$0xff] }
 0x278   : > { %v1387_v19 = vpop.eup %1386  ;;  %v600_v20 = vmul.f32 1.442695, %v593_v18 }
 0x279   : > { %v610_v21 = vsel %vm310_vm0, %v1387_v19, 0.0  ;;  %v631_v22 = vpack.c.bf16 %v1387_v19, %v1387_v19 }
 0x27a   : > { %1392 = vpow2.f32 %v600_v20  ;;  %611 = vadd.xlane.f32.xlu1 %v610_v21  ;;  %v823_v20 = vld [vmem:[#allocation4 + $0x18] sm:$0xff] }
 0x27b   : > { %1280 = vmatmul.mubr.msk.bf16.vlgmr.msra.gmra.mrb[8].mxu0 %vm310_vm0, %v631_v22  ;;  %1394 = vpow2.f32 %v564_v30 }
 0x27c   : > { %v1389_v23 = vpop.eup %1388  ;;  %1290 = vmatpush3.bf16.msra.mxu0 %v732_v4  ;;  %1291 = vmatprep.mubr.msk.bf16.mxu0 %vm1594_vm1, %v1593_v0 }
 0x27d   : > { %v613_v24 = vsel %vm310_vm0, %v1389_v23, 0.0  ;;  %v632_v25 = vpack.c.bf16 %v1389_v23, %v1389_v23 }
 0x27e   : > { %614 = vadd.xlane.f32.xlu0 %v613_v24 }
 0x27f   : > { %1286 = vmatmul.mubr.msk.bf16.vlgmr.msra.gmra.mrb[8].mxu1 %vm310_vm0, %v632_v25 }
 0x280   : > { %v1391_v26 = vpop.eup %1390  ;;  %1296 = vmatpush3.bf16.msra.mxu1 %v778_v6  ;;  %1297 = vmatprep.mubr.msk.bf16.mxu1 %vm1594_vm1, %v1593_v0  ;;  %v562_v0 = vmul.f32 1.442695, %v558_v50  ;;  %v605_v50 = vld [vmem:[#allocation3 + $0x18] sm:$0xff] }
 0x281   : > { %v616_v27 = vsel %vm310_vm0, %v1391_v26, 0.0  ;;  %v633_v28 = vpack.c.bf16 %v1391_v26, %v1391_v26 }
 0x282   : > { %617 = vadd.xlane.f32.xlu1 %v616_v27  ;;  %1396 = vpow2.f32 %v562_v0  ;;  %v1597_v0 = vmov 1983009808  }
 0x283   : > { %1292 = vmatmul.mubr.msk.bf16.vlgmr.msra.gmra.mrb[12].mxu0 %vm310_vm0, %v633_v28  ;;  %1398 = vpow2.f32 %v566_v33  ;;  %v902_v33 = vunpack.c.l.s4 %v1597_v0 }
 0x284   : > { %v1393_v29 = vpop.eup %1392  ;;  %1400 = vpow2.f32 %v568_v34 }
 0x285   : > { %v619_v31 = vsel %vm310_vm0, %v1393_v29, 0.0  ;;  %v634_v32 = vpack.c.bf16 %v1393_v29, %v1393_v29  ;;  %v1395_v35 = vpop.eup %1394 }
 0x286   : > { %620 = vadd.xlane.f32.xlu1 %v619_v31  ;;  %v607_v44 = vmul.f32 %v1395_v35, %v603_v42 }
 0x287   : > { %1298 = vmatmul.mubr.msk.bf16.vlgmr.msra.gmra.mrb[12].mxu1 %vm310_vm0, %v634_v32 }
 0x28c   : > { %v1397_v36 = vpop.eup %1396 }
 0x28d   : > { %v1399_v37 = vpop.eup %1398  ;;  %v606_v40 = vmul.f32 %v1397_v36, %v602_v39 }
 0x28e   : > { %v1401_v38 = vpop.eup %1400  ;;  %v608_v48 = vmul.f32 %v1399_v37, %v604_v46 }
 0x28f   : > { %v609_v53 = vmul.f32 %v1401_v38, %v605_v50 }
 0x294   : > { %831 = vperm.xlu0 %1384, %v1395_v35   ;;  %v903_v35 = vunpack.c.0.s8 %v902_v33 }
 0x297   : > { %826 = vperm.xlu1 %1385, %v1397_v36   ;;  %v1598_v36 = vmov 1934713408  }
 0x29b   : > { %836 = vperm.xlu1 %1385, %v1399_v37   ;;  %v934_v37 = vunpack.c.l.s4 %v1598_v36 }
 0x29f   : > { %841 = vperm.xlu1 %1385, %v1401_v38  }
 0x307   : > { %v612_v41 = vpop.xlane.xlu1 %611 }
 0x308   : > { %v622_v43 = vadd.f32 %v612_v41, %v606_v40 }
 0x30a   : > { %627 = vst.msk [vmem:[#allocation3] sm:$0xff] %vm301_vm2, %v622_v43 }
 0x30b   : > { %v615_v45 = vpop.xlane.xlu0 %614 }
 0x30c   : > { %v623_v47 = vadd.f32 %v615_v45, %v607_v44  ;;  %v906_v44 = vsub.s32 %v903_v35, %v1902_v15  ;;  %v935_v45 = vunpack.c.0.s8 %v934_v37 }
 0x30e   : > { %628 = vst.msk [vmem:[#allocation3 + $0x8] sm:$0xff] %vm301_vm2, %v623_v47 }
 0x30f   : > { %v618_v49 = vpop.xlane.xlu1 %617 }
 0x310   : > { %v624_v51 = vadd.f32 %v618_v49, %v608_v48 }
 0x311   : > { %v867_v52 = vld [vmem:[#allocation3] sm:$0xff] }
 0x312   : > { %629 = vst.msk [vmem:[#allocation3 + $0x10] sm:$0xff] %vm301_vm2, %v624_v51  ;;  %1402 = vrcp.f32 %v867_v52 }
 0x313   : > { %v621_v54 = vpop.xlane.xlu1 %620  ;;  %v832_v4 = vpop.permute.xlu0 %831 }
 0x314   : > { %v625_v55 = vadd.f32 %v621_v54, %v609_v53  ;;  %v845_v10 = vmul.f32 %v832_v4, %v821_v3 }
 0x315   : > { %v868_v56 = vld [vmem:[#allocation3 + $0x8] sm:$0xff] }
 0x316   : > { %630 = vst.msk [vmem:[#allocation3 + $0x18] sm:$0xff] %vm301_vm2, %v625_v55  ;;  %1404 = vrcp.f32 %v868_v56  ;;  %v938_v55 = vsub.s32 %v935_v45, %v1902_v15 }
 0x317   : > { %v827_v1 = vpop.permute.xlu1 %826 }
 0x318   : > { %v844_v2 = vmul.f32 %v827_v1, %v820_v63 }
 0x319   : > { %v869_v57 = vld [vmem:[#allocation3 + $0x10] sm:$0xff] }
 0x31a   : > { %1406 = vrcp.f32 %v869_v57 }
 0x31b   : > { %v837_v8 = vpop.permute.xlu1 %836 }
 0x31c   : > { %v1403_v58 = vpop.eup %1402  ;;  %v846_v18 = vmul.f32 %v837_v8, %v822_v12 }
 0x31d   : > { %877 = vperm.xlu1 %1385, %v1403_v58   ;;  %v870_v59 = vld [vmem:[#allocation3 + $0x18] sm:$0xff] }
 0x31e   : > { %1408 = vrcp.f32 %v870_v59 }
 0x31f   : > { %v842_v21 = vpop.permute.xlu1 %841 }
 0x320   : > { %v1405_v60 = vpop.eup %1404  ;;  %v847_v26 = vmul.f32 %v842_v21, %v823_v20 }
 0x321   : > { %882 = vperm.xlu0 %1384, %v1405_v60  }
 0x324   : > { %v1407_v61 = vpop.eup %1406 }
 0x325   : > { %887 = vperm.xlu1 %1385, %v1407_v61  }
 0x328   : > { %v1409_v62 = vpop.eup %1408 }
 0x329   : > { %892 = vperm.xlu0 %1384, %v1409_v62  }
 0x34e   : > { %v676_v5 = vpop.f32.mrb[8].mxu0 }
 0x34f   : > { %v848_v6 = vadd.f32 %v844_v2, %v676_v5  ;;  %v1281_v7 = vpop.f32.mrb[9].mxu0 }
 0x350   : > { %v679_v9 = vpop.f32.mrb[10].mxu0 }
 0x351   : > { %852 = vst.msk [vmem:[#allocation4] sm:$0xff] %vm310_vm0, %v848_v6  ;;  %v1282_v11 = vpop.f32.mrb[11].mxu0 }
 0x352   : > { %v722_v13 = vpop.f32.mrb[8].mxu1 }
 0x353   : > { %v849_v14 = vadd.f32 %v845_v10, %v722_v13  ;;  %v1287_v16 = vpop.f32.mrb[9].mxu1 }
 0x354   : > { %v725_v17 = vpop.f32.mrb[10].mxu1 }
 0x355   : > { %853 = vst.msk [vmem:[#allocation4 + $0x8] sm:$0xff] %vm310_vm0, %v849_v14  ;;  %v1288_v19 = vpop.f32.mrb[11].mxu1 }
 0x356   : > { %v768_v22 = vpop.f32.mrb[12].mxu0 }
 0x357   : > { %v850_v23 = vadd.f32 %v846_v18, %v768_v22  ;;  %v1293_v24 = vpop.f32.mrb[13].mxu0 }
 0x358   : > { %v771_v25 = vpop.f32.mrb[14].mxu0  ;;  %v863_v42 = vld [vmem:[#allocation4] sm:$0xff] }
 0x359   : > { %854 = vst.msk [vmem:[#allocation4 + $0x10] sm:$0xff] %vm310_vm0, %v850_v23  ;;  %v1294_v27 = vpop.f32.mrb[15].mxu0 }
 0x35a   : > { %v814_v28 = vpop.f32.mrb[12].mxu1 }
 0x35b   : > { %v851_v29 = vadd.f32 %v847_v26, %v814_v28  ;;  %v1299_v30 = vpop.f32.mrb[13].mxu1 }
 0x35c   : > { %v817_v31 = vpop.f32.mrb[14].mxu1  ;;  %v864_v46 = vld [vmem:[#allocation4 + $0x8] sm:$0xff] }
 0x35d   : > { %855 = vst.msk [vmem:[#allocation4 + $0x18] sm:$0xff] %vm310_vm0, %v851_v29  ;;  %v1300_v32 = vpop.f32.mrb[15].mxu1 }
 0x360   : > { %v865_v39 = vld [vmem:[#allocation4 + $0x10] sm:$0xff] }
 0x364   : > { %v866_v48 = vld [vmem:[#allocation4 + $0x18] sm:$0xff] }
 0x39c   : > { %v878_v34 = vpop.permute.xlu1 %877 }
 0x39d   : > { %v895_v43 = vmul.f32 %v878_v34, %v863_v42 }
 0x3a0   : > { %v883_v38 = vpop.permute.xlu0 %882 }
 0x3a1   : > { %v896_v49 = vmul.f32 %v883_v38, %v864_v46 }
 0x3a4   : > { %v888_v40 = vpop.permute.xlu1 %887 }
 0x3a5   : > { %v897_v41 = vmul.f32 %v888_v40, %v865_v39 }
 0x3a7   : > { %v899_v50 = vcombine.low %v895_v43, %v897_v41  ;;  %v900_v51 = vcombine.high %v895_v43, %v897_v41 }
 0x3a8   : > { %v893_v47 = vpop.permute.xlu0 %892 }
 0x3a9   : > { %v898_v52 = vmul.f32 %v893_v47, %v866_v48  ;;  %v907_v56 = vrot.slane %v899_v50, %v906_v44  ;;  %v914_v57 = vrot.slane %v900_v51, %v906_v44 }
 0x3ab   : > { %v915_v53 = vcombine.low %v896_v49, %v898_v52  ;;  %v916_v54 = vcombine.high %v896_v49, %v898_v52 }
 0x3ad   : > { %v923_v58 = vrot.slane %v915_v53, %v906_v44  ;;  %v930_v59 = vrot.slane %v916_v54, %v906_v44 }
 0x3af   : > { %v931_v60 = vcombine.low %v907_v56, %v923_v58  ;;  %v932_v61 = vcombine.high %v907_v56, %v923_v58  ;;  %v947_v62 = vcombine.low %v914_v57, %v930_v59  ;;  %v948_v63 = vcombine.high %v914_v57, %v930_v59 }
 0x3b1   : > { %v939_v1 = vrot.slane %v931_v60, %v938_v55  ;;  %v946_v2 = vrot.slane %v932_v61, %v938_v55  ;;  %v955_v3 = vrot.slane %v947_v62, %v938_v55  ;;  %v962_v4 = vrot.slane %v948_v63, %v938_v55 }
 0x3b3   : > { %v967_v5 = vcombine.low %v939_v1, %v946_v2  ;;  %v1228_v6 = vcombine.high %v939_v1, %v946_v2  ;;  %v983_v7 = vcombine.low %v955_v3, %v962_v4  ;;  %v1229_v8 = vcombine.high %v955_v3, %v962_v4 }
 0x3b5   : > { %v974_v9 = vrot.slane %v967_v5, %v906_v44  ;;  %v982_v10 = vrot.slane %v1228_v6, %v906_v44  ;;  %v990_v11 = vrot.slane %v983_v7, %v906_v44  ;;  %v998_v15 = vrot.slane %v1229_v8, %v906_v44 }
 0x3b7   : > { %v1000_v12 = vcombine.high %v974_v9, %v982_v10  ;;  %v1016_v13 = vcombine.high %v990_v11, %v998_v15  ;;  %v999_v14 = vcombine.low %v974_v9, %v982_v10  ;;  %v1015_v16 = vcombine.low %v990_v11, %v998_v15 }
 0x3b9   : > { %v1014_v17 = vrot.slane %v1000_v12, %v938_v55  ;;  %v1030_v18 = vrot.slane %v1016_v13, %v938_v55  ;;  %v1007_v19 = vrot.slane %v999_v14, %v938_v55  ;;  %v1023_v20 = vrot.slane %v1015_v16, %v938_v55 }
 0x3bb   : > { %v1033_v21 = vcombine.low %v1014_v17, %v1030_v18  ;;  %v1032_v22 = vcombine.high %v1007_v19, %v1023_v20  ;;  %v1031_v23 = vcombine.low %v1007_v19, %v1023_v20  ;;  %v1034_v24 = vcombine.high %v1014_v17, %v1030_v18 }
 0x3bd   : > { %1040 = vrot.lane.b32.xlu0 %v1033_v21, %s1599_s24  ;;  %1036 = vrot.lane.b32.xlu1 %v1032_v22, %s1600_s16 }
 0x3c1   : > { %1044 = vrot.lane.b32.xlu1 %v1034_v24, %s1601_s20 }
 0x42f   : > { %v1037_v25 = vpop.permute.xlu1 %1036  ;;  %v1041_v26 = vpop.permute.xlu0 %1040 }
 0x430   : > { %v1048_v27 = vsel %vm310_vm0, %v1031_v23, %v1037_v25 }
 0x431   : > { %v1050_v29 = vsel %vm1049_vm5, %v1048_v27, %v1041_v26 }
 0x433   : > { %v1045_v28 = vpop.permute.xlu1 %1044 }
 0x434   : > { %v1052_v30 = vsel %vm1051_vm6, %v1050_v29, %v1045_v28 }
 0x435   : > { %v1053_v31 = vpack.c.bf16 %v1052_v30, %v1052_v30 }
 0x437   : > { %1055 = vst.msk [vmem:[%s295_s30] sm:$0xf] %vm1054_vm7, %v1053_v31 }
 0x438   : > { %1513 = shalt.err (!%p1510_p13)
}
 0x439   : > { %s1514_s21 = scalar_lea.hbm %s2005_s1, 64  ;;  %s1518_s11 = scalar_lea.hbm %s2057_s3, 128 }
 0x43a   : > { %p1515_p11 = scmp.ne.s32.totalorder %s2005_s1, %s1514_s21  ;;  %p1519_p7 = scmp.lt.u32.totalorder %s2005_s1, %s2057_s3 }
 0x43b   : > { %p1520_p4 = scmp.lt.u32.totalorder %s1518_s11, %s1514_s21  ;;  %p1522_p0 = scmp.lt.u32.totalorder %s1514_s21, %s2005_s1 }
 0x43c   : > { %p1516_p2 = pnand %p1515_p11, %p2086_p10 }
 0x43d   : > { %p1521_p3 = por %p1520_p4, %p1519_p7 }
 0x43e   : > { %p1517_p5 = pneg %p1516_p2 }
 0x43f   : > { %p1523_p8 = por %p1522_p0, %p1521_p3 }
 0x441   : > { %p1524_p9 = pnand %p1523_p8, %p1517_p5 }
 0x443   : > { %1527 = shalt.err (!%p1524_p9)
}
 0x444   : > { %1307 = dma.vmem_to_hbm [thread:$0]  (%p2086_p10), %s2007_s6, 64, %s2005_s1, %s1057_s28  }
 0x445 PF: > { %s1083_s18 = sand.u32 1, %s1566_s12   ;;  %p2087_p12 = scmp.ne.s32.totalorder %s2074_s27, 0 }
 0x446   : > { %p2088_p1 = scmp.ge.s32.totalorder %s1586_s17, 2  ;;  %s1084_s24 = scalar_lea.sflag [#allocation7], %s1083_s18 }
 0x448   : > { %p1320_p6 = pnand %p2088_p1, %p2087_p12 }
 0x44a   : > { %1561 = dma.done.wait (!%p1320_p6), %s1084_s24, 64  }
 0x44b   : > { %1563 = vsyncadd (!%p1320_p6), %s1084_s24, 4294967232  ;;  %s22_s17 = sadd.s32 1, %s1586_s17   ;;  %s2089_s25 = sld [smem:[#allocation17_spill]] }
 0x44c   : > { %p19_p13 = scmp.ge.s32.totalorder %s22_s17, 4   ;;  %s2090_s15 = sld [smem:[#allocation15_spill]] }
 0x44d   : > { %s2091_s16 = sld [smem:[#allocation16_spill]]  ;;  %s2092_s12 = smov %s1570_s13 }
 0x44e   : > { %s2093_s13 = smov %s1574_s14  ;;  %21 = sbr.rel (!%p19_p13) target bundleno = 10 (0xa), region = 113 }
 0x451   : > { %s2094_s14 = smov %s2089_s25 }
 0x455   :  { %1089 = vsyncpa [#allocation6], 1 }
 0x456   :  { %1091 = vsyncpa [#allocation6 + $0x1], 1 }
 0x457   :  { %1092 = vsyncpa [#allocation9], 1 }
 0x458   :  { %1094 = vsyncpa [#allocation9 + $0x1], 1 }
 0x459   :  { %1095 = vsyncpa [#allocation7], 1 }
 0x45a   :  { %1097 = vsyncpa [#allocation7 + $0x1], 1 }

</bundles_post_ra>
